<compile_context>
chip_gen: v7x
topology: tpu7x:2x2x1
jax: 0.10.0
libtpu: 0.0.40
codegen_flags: <defaults>
</compile_context>

<pallas_src>
import math
import functools

import jax
import jax.numpy as jnp
from jax import lax
from jax.experimental import pallas as pl
from jax.experimental.pallas import tpu as pltpu

# ----------------------------- config (module hyper-params) ------------------
INPUT_DIM = 32        # d_model
ATTN_HEADS = 4
ATTN_DROPOUT = 0.1    # TODO(synk): dropout not applied (eval-mode semantics)
TRF_LAYERS = 2
FC_HIDDEN = 64
WORD_PAD_IDX = 0
DIM_FEEDFORWARD = 2048   # nn.TransformerEncoderLayer default
LN_EPS = 1e-5
MAX_LEN = 500
MASK_BIAS = -1e30     # finite "neg-inf": avoids NaN even if a row is fully padded


# ----------------------------- fused Pallas kernel ----------------------------
def _fused_transformer_kernel(n_layers, n_heads, scale,
                              x_ref, pe_ref, bias_ref, *refs):
    """One grid step = full forward for one batch element.

    refs = 12 weight refs per layer, 4 fc-head refs, then the output ref.
    Per-layer order: wqkv(3E,E), bqkv(3H,Dh), woutT(E,E), bout(1,E),
                     w1(F,E) bf16, b1(1,F), w2(E,F) bf16, b2(1,E),
                     g1, be1, g2, be2 (each (1,E)).
    """
    out_ref = refs[-1]
    prm = refs[:-1]
    f32 = jnp.float32

    def layer_norm(v, g, b):
        mean = jnp.mean(v, axis=-1, keepdims=True)
        c = v - mean
        var = jnp.mean(c * c, axis=-1, keepdims=True)
        return c * lax.rsqrt(var + LN_EPS) * g + b

    def mm_nk(a, w_nk):   # a:(M,K) @ w:(N,K)^T -> (M,N); torch layout, trans_b on MXU
        return lax.dot_general(a, w_nk, (((1,), (1,)), ((), ())),
                               preferred_element_type=f32)

    def mm_kn(a, w_kn):   # a:(M,K) @ w:(K,N) -> (M,N)
        return lax.dot_general(a, w_kn, (((1,), (0,)), ((), ())),
                               preferred_element_type=f32)

    x = x_ref[0] + pe_ref[...]            # (S, E): positional encoding folded in
    kbias = bias_ref[0]                   # (1, S): 0 / -1e30 key-padding bias
    E = x.shape[-1]
    H = n_heads
    Dh = E // H

    for l in range(n_layers):
        (wqkv, bqkv, woutT, bout, w1, b1, w2, b2,
         g1, be1, g2, be2) = prm[12 * l:12 * (l + 1)]

        # ---------- multi-head self-attention (all heads in this invocation) --
        attn = None
        for h in range(H):
            # per-head projections: sublane-aligned ref slices of the torch weights
            q = mm_nk(x, wqkv[h * Dh:(h + 1) * Dh, :]) + bqkv[h:h + 1, :]
            k = mm_nk(x, wqkv[E + h * Dh:E + (h + 1) * Dh, :]) + bqkv[H + h:H + h + 1, :]
            v = mm_nk(x, wqkv[2 * E + h * Dh:2 * E + (h + 1) * Dh, :]) + bqkv[2 * H + h:2 * H + h + 1, :]
            s = mm_nk(q, k) * scale + kbias                     # (S, S), contract on Dh
            s = s - jnp.max(s, axis=-1, keepdims=True)
            e = jnp.exp(s)
            p = e * pl.reciprocal(jnp.sum(e, axis=-1, keepdims=True), approx=True)
            o_h = jnp.dot(p, v, preferred_element_type=f32)     # (S, Dh)
            proj = mm_kn(o_h, woutT[h * Dh:(h + 1) * Dh, :])    # (S, E) per-head out-proj
            attn = proj if attn is None else attn + proj
        attn = attn + bout[...]
        x = layer_norm(x + attn, g1[...], be1[...])

        # ---------- feed-forward (bf16 MXU operands, f32 accumulate/elementwise)
        w1v = w1[...]                                           # (F, E) bf16
        hid = mm_nk(x.astype(w1v.dtype), w1v) + b1[...]         # (S, F) f32
        hid = jnp.maximum(hid, 0.0)
        w2v = w2[...]                                           # (E, F) bf16
        ff = mm_nk(hid.astype(w2v.dtype), w2v) + b2[...]        # (S, E) f32
        x = layer_norm(x + ff, g2[...], be2[...])

    # ---------- fc -> exact GELU -> LayerNorm ---------------------------------
    wfc, bfc, gfc, befc = prm[12 * n_layers:12 * n_layers + 4]
    y = mm_nk(x, wfc[...]) + bfc[...]
    y = 0.5 * y * (1.0 + lax.erf(y * (1.0 / math.sqrt(2.0))))   # nn.GELU default
    y = layer_norm(y, gfc[...], befc[...])
    out_ref[0] = y


# ----------------------------- parameters ------------------------------------
def build_pe(max_len, d_model):
    position = jnp.arange(max_len, dtype=jnp.float32)[:, None]
    div_term = jnp.exp(jnp.arange(0, d_model, 2, dtype=jnp.float32)
                       * (-math.log(10000.0) / d_model))
    pe = jnp.zeros((max_len, d_model), jnp.float32)
    pe = pe.at[:, 0::2].set(jnp.sin(position * div_term))
    pe = pe.at[:, 1::2].set(jnp.cos(position * div_term))
    return pe                                     # (max_len, d_model)


def init_params(key):
    E, F, FH = INPUT_DIM, DIM_FEEDFORWARD, FC_HIDDEN
    keys = iter(jax.random.split(key, 8 * TRF_LAYERS + 4))

    def nrm(shape, s=0.02):
        return s * jax.random.normal(next(keys), shape, dtype=jnp.float32)

    params = {"pe": build_pe(MAX_LEN, E), "layers": []}
    for _ in range(TRF_LAYERS):
        params["layers"].append({
            "in_proj_w": nrm((3 * E, E)), "in_proj_b": nrm((3 * E,)),
            "out_proj_w": nrm((E, E)),    "out_proj_b": nrm((E,)),
            "lin1_w": nrm((F, E)),        "lin1_b": nrm((F,)),
            "lin2_w": nrm((E, F)),        "lin2_b": nrm((E,)),
            "norm1_w": jnp.ones((E,), jnp.float32),
            "norm1_b": jnp.zeros((E,), jnp.float32),
            "norm2_w": jnp.ones((E,), jnp.float32),
            "norm2_b": jnp.zeros((E,), jnp.float32),
        })
    params["fc_w"] = nrm((FH, E))
    params["fc_b"] = nrm((FH,))
    params["fc_norm_w"] = jnp.ones((FH,), jnp.float32)
    params["fc_norm_b"] = jnp.zeros((FH,), jnp.float32)
    return params


def prepare_params(params):
    """One-time layout prep (hoisted out of the hot path):
    biases/LN params -> (1, N); in_proj bias -> (3H, Dh) rows; out_proj
    transposed once to (E_in, E_out); big FFN weights cast to bf16 (MXU operands)."""
    H, Dh = ATTN_HEADS, INPUT_DIM // ATTN_HEADS
    flat = []
    for lp in params["layers"]:
        flat += [
            lp["in_proj_w"],                            # (3E, E) torch (N, K) layout
            lp["in_proj_b"].reshape(3 * H, Dh),         # row j = (q|k|v, head) chunk
            lp["out_proj_w"].T,                         # (E_in, E_out): per-head row slabs
            lp["out_proj_b"].reshape(1, -1),
            lp["lin1_w"].astype(jnp.bfloat16),          # bf16 MXU operand only
            lp["lin1_b"].reshape(1, -1),
            lp["lin2_w"].astype(jnp.bfloat16),          # bf16 MXU operand only
            lp["lin2_b"].reshape(1, -1),
            lp["norm1_w"].reshape(1, -1), lp["norm1_b"].reshape(1, -1),
            lp["norm2_w"].reshape(1, -1), lp["norm2_b"].reshape(1, -1),
        ]
    flat += [
        params["fc_w"], params["fc_b"].reshape(1, -1),
        params["fc_norm_w"].reshape(1, -1), params["fc_norm_b"].reshape(1, -1),
    ]
    return [jnp.asarray(p) for p in flat], params["pe"]


# ----------------------------- forward ----------------------------------------
@jax.jit
def transformer_forward(words, word_features, flat_params, pe):
    """words: (S, B) int32; word_features: (S, B, E) f32 -> (S, B, FC_HIDDEN)."""
    S, B, E = word_features.shape
    H = ATTN_HEADS
    scale = 1.0 / math.sqrt(E // H)

    x_bse = jnp.transpose(word_features.astype(jnp.float32), (1, 0, 2))  # (B, S, E)
    # key_padding_mask = (words == pad).T -> additive bias (finite neg-inf)
    bias = jnp.where((words == WORD_PAD_IDX).T, MASK_BIAS, 0.0)
    bias = bias.astype(jnp.float32).reshape(B, 1, S)
    pe_s = pe[:S].astype(jnp.float32)                                    # (S, E)

    kernel = functools.partial(_fused_transformer_kernel, TRF_LAYERS, H, scale)

    in_specs = [
        pl.BlockSpec((1, S, E), lambda b: (b, 0, 0)),          # x (per batch element)
        pl.BlockSpec((S, E), lambda b: (0, 0)),                # positional encoding
        pl.BlockSpec((1, 1, S), lambda b: (b, 0, 0)),          # key-padding bias
    ] + [pl.BlockSpec(p.shape, lambda b: (0, 0)) for p in flat_params]   # resident weights

    out = pl.pallas_call(
        kernel,
        out_shape=jax.ShapeDtypeStruct((B, S, FC_HIDDEN), jnp.float32),
        grid=(B,),
        in_specs=in_specs,
        out_specs=pl.BlockSpec((1, S, FC_HIDDEN), lambda b: (b, 0, 0)),
        compiler_params=pltpu.CompilerParams(
            dimension_semantics=("parallel",)),                 # v7x: 2nd TC gets a batch
    )(x_bse, pe_s, bias, *flat_params)

    return jnp.transpose(out, (1, 0, 2))                        # back to (S, B, FC_HIDDEN)


# ----------------------------- main -------------------------------------------
if __name__ == "__main__":
    SEQ, BATCH = 8, 2
    key = jax.random.PRNGKey(0)
    k_words, k_feat, k_param = jax.random.split(key, 3)

    words = jax.random.randint(k_words, (SEQ, BATCH), 0, 5, dtype=jnp.int32)
    words = words.at[0].set(1)   # guarantee at least one non-pad token per batch col
    word_features = jax.random.normal(k_feat, (SEQ, BATCH, INPUT_DIM),
                                      dtype=jnp.float32)

    params = init_params(k_param)
    flat_params, pe = prepare_params(params)     # one-time layout prep

    out = transformer_forward(words, word_features, flat_params, pe)
    out = jax.block_until_ready(out)

    assert out.shape == (SEQ, BATCH, FC_HIDDEN), out.shape
    assert bool(jnp.all(jnp.isfinite(out)))
    print("KERNEL_OK")
</pallas_src>

<mosaic_0001>
module attributes {stable_mosaic.version = 11 : i64} {
  func.func @_fused_transformer_kernel(%arg0: i32, %arg1: memref<1x8x32xf32, #tpu.memory_space<vmem>>, %arg2: memref<8x32xf32, #tpu.memory_space<vmem>>, %arg3: memref<1x1x8xf32, #tpu.memory_space<vmem>>, %arg4: memref<96x32xf32, #tpu.memory_space<vmem>>, %arg5: memref<12x8xf32, #tpu.memory_space<vmem>>, %arg6: memref<32x32xf32, #tpu.memory_space<vmem>>, %arg7: memref<1x32xf32, #tpu.memory_space<vmem>>, %arg8: memref<2048x32xbf16, #tpu.memory_space<vmem>>, %arg9: memref<1x2048xf32, #tpu.memory_space<vmem>>, %arg10: memref<32x2048xbf16, #tpu.memory_space<vmem>>, %arg11: memref<1x32xf32, #tpu.memory_space<vmem>>, %arg12: memref<1x32xf32, #tpu.memory_space<vmem>>, %arg13: memref<1x32xf32, #tpu.memory_space<vmem>>, %arg14: memref<1x32xf32, #tpu.memory_space<vmem>>, %arg15: memref<1x32xf32, #tpu.memory_space<vmem>>, %arg16: memref<96x32xf32, #tpu.memory_space<vmem>>, %arg17: memref<12x8xf32, #tpu.memory_space<vmem>>, %arg18: memref<32x32xf32, #tpu.memory_space<vmem>>, %arg19: memref<1x32xf32, #tpu.memory_space<vmem>>, %arg20: memref<2048x32xbf16, #tpu.memory_space<vmem>>, %arg21: memref<1x2048xf32, #tpu.memory_space<vmem>>, %arg22: memref<32x2048xbf16, #tpu.memory_space<vmem>>, %arg23: memref<1x32xf32, #tpu.memory_space<vmem>>, %arg24: memref<1x32xf32, #tpu.memory_space<vmem>>, %arg25: memref<1x32xf32, #tpu.memory_space<vmem>>, %arg26: memref<1x32xf32, #tpu.memory_space<vmem>>, %arg27: memref<1x32xf32, #tpu.memory_space<vmem>>, %arg28: memref<64x32xf32, #tpu.memory_space<vmem>>, %arg29: memref<1x64xf32, #tpu.memory_space<vmem>>, %arg30: memref<1x64xf32, #tpu.memory_space<vmem>>, %arg31: memref<1x64xf32, #tpu.memory_space<vmem>>, %arg32: memref<1x8x64xf32, #tpu.memory_space<vmem>>) attributes {dimension_semantics = [#tpu.dimension_semantics<parallel>], iteration_bounds = array<i64: 2>, scalar_prefetch = 0 : i64, scratch_operands = 0 : i64, tpu.core_type = #tpu.core_type<tc>, window_params = [{transform_indices = @transform_0, window_bounds = array<i64: 1, 8, 32>}, {pipeline_mode = #tpu.pipeline_mode<synchronous>, transform_indices = @transform_1, window_bounds = array<i64: 8, 32>}, {transform_indices = @transform_2, window_bounds = array<i64: 1, 1, 8>}, {pipeline_mode = #tpu.pipeline_mode<synchronous>, transform_indices = @transform_3, window_bounds = array<i64: 96, 32>}, {pipeline_mode = #tpu.pipeline_mode<synchronous>, transform_indices = @transform_4, window_bounds = array<i64: 12, 8>}, {pipeline_mode = #tpu.pipeline_mode<synchronous>, transform_indices = @transform_5, window_bounds = array<i64: 32, 32>}, {pipeline_mode = #tpu.pipeline_mode<synchronous>, transform_indices = @transform_6, window_bounds = array<i64: 1, 32>}, {pipeline_mode = #tpu.pipeline_mode<synchronous>, transform_indices = @transform_7, window_bounds = array<i64: 2048, 32>}, {pipeline_mode = #tpu.pipeline_mode<synchronous>, transform_indices = @transform_8, window_bounds = array<i64: 1, 2048>}, {pipeline_mode = #tpu.pipeline_mode<synchronous>, transform_indices = @transform_9, window_bounds = array<i64: 32, 2048>}, {pipeline_mode = #tpu.pipeline_mode<synchronous>, transform_indices = @transform_10, window_bounds = array<i64: 1, 32>}, {pipeline_mode = #tpu.pipeline_mode<synchronous>, transform_indices = @transform_11, window_bounds = array<i64: 1, 32>}, {pipeline_mode = #tpu.pipeline_mode<synchronous>, transform_indices = @transform_12, window_bounds = array<i64: 1, 32>}, {pipeline_mode = #tpu.pipeline_mode<synchronous>, transform_indices = @transform_13, window_bounds = array<i64: 1, 32>}, {pipeline_mode = #tpu.pipeline_mode<synchronous>, transform_indices = @transform_14, window_bounds = array<i64: 1, 32>}, {pipeline_mode = #tpu.pipeline_mode<synchronous>, transform_indices = @transform_15, window_bounds = array<i64: 96, 32>}, {pipeline_mode = #tpu.pipeline_mode<synchronous>, transform_indices = @transform_16, window_bounds = array<i64: 12, 8>}, {pipeline_mode = #tpu.pipeline_mode<synchronous>, transform_indices = @transform_17, window_bounds = array<i64: 32, 32>}, {pipeline_mode = #tpu.pipeline_mode<synchronous>, transform_indices = @transform_18, window_bounds = array<i64: 1, 32>}, {pipeline_mode = #tpu.pipeline_mode<synchronous>, transform_indices = @transform_19, window_bounds = array<i64: 2048, 32>}, {pipeline_mode = #tpu.pipeline_mode<synchronous>, transform_indices = @transform_20, window_bounds = array<i64: 1, 2048>}, {pipeline_mode = #tpu.pipeline_mode<synchronous>, transform_indices = @transform_21, window_bounds = array<i64: 32, 2048>}, {pipeline_mode = #tpu.pipeline_mode<synchronous>, transform_indices = @transform_22, window_bounds = array<i64: 1, 32>}, {pipeline_mode = #tpu.pipeline_mode<synchronous>, transform_indices = @transform_23, window_bounds = array<i64: 1, 32>}, {pipeline_mode = #tpu.pipeline_mode<synchronous>, transform_indices = @transform_24, window_bounds = array<i64: 1, 32>}, {pipeline_mode = #tpu.pipeline_mode<synchronous>, transform_indices = @transform_25, window_bounds = array<i64: 1, 32>}, {pipeline_mode = #tpu.pipeline_mode<synchronous>, transform_indices = @transform_26, window_bounds = array<i64: 1, 32>}, {pipeline_mode = #tpu.pipeline_mode<synchronous>, transform_indices = @transform_27, window_bounds = array<i64: 64, 32>}, {pipeline_mode = #tpu.pipeline_mode<synchronous>, transform_indices = @transform_28, window_bounds = array<i64: 1, 64>}, {pipeline_mode = #tpu.pipeline_mode<synchronous>, transform_indices = @transform_29, window_bounds = array<i64: 1, 64>}, {pipeline_mode = #tpu.pipeline_mode<synchronous>, transform_indices = @transform_30, window_bounds = array<i64: 1, 64>}, {transform_indices = @transform_31, window_bounds = array<i64: 1, 8, 64>}]} {
    %c0 = arith.constant 0 : index
    %c0_0 = arith.constant 0 : index
    %c0_1 = arith.constant 0 : index
    %0 = vector.load %arg1[%c0, %c0_0, %c0_1] : memref<1x8x32xf32, #tpu.memory_space<vmem>>, vector<1x8x32xf32>
    %1 = vector.shape_cast %0 : vector<1x8x32xf32> to vector<8x32xf32>
    %c0_2 = arith.constant 0 : index
    %c0_3 = arith.constant 0 : index
    %2 = vector.load %arg2[%c0_2, %c0_3] : memref<8x32xf32, #tpu.memory_space<vmem>>, vector<8x32xf32>
    %3 = arith.addf %1, %2 : vector<8x32xf32>
    %c0_4 = arith.constant 0 : index
    %c0_5 = arith.constant 0 : index
    %c0_6 = arith.constant 0 : index
    %4 = vector.load %arg3[%c0_4, %c0_5, %c0_6] : memref<1x1x8xf32, #tpu.memory_space<vmem>>, vector<1x1x8xf32>
    %5 = vector.shape_cast %4 : vector<1x1x8xf32> to vector<1x8xf32>
    %c0_7 = arith.constant 0 : index
    %c0_8 = arith.constant 0 : index
    %6 = vector.load %arg4[%c0_7, %c0_8] : memref<96x32xf32, #tpu.memory_space<vmem>>, vector<8x32xf32>
    %cst = arith.constant dense<0.000000e+00> : vector<8x8xf32>
    %7 = tpu.matmul %3, %6, %cst {dimension_numbers = #tpu.dot_dimension_numbers<[1], [1], [0], [0], [0, 0, 1, 0], [], []>} : vector<8x32xf32>, vector<8x32xf32>, vector<8x8xf32> -> vector<8x8xf32>
    %c0_9 = arith.constant 0 : index
    %c0_10 = arith.constant 0 : index
    %8 = vector.load %arg5[%c0_9, %c0_10] : memref<12x8xf32, #tpu.memory_space<vmem>>, vector<1x8xf32>
    %9 = vector.broadcast %8 : vector<1x8xf32> to vector<8x8xf32>
    %10 = arith.addf %7, %9 : vector<8x8xf32>
    %c32 = arith.constant 32 : index
    %c0_11 = arith.constant 0 : index
    %11 = vector.load %arg4[%c32, %c0_11] : memref<96x32xf32, #tpu.memory_space<vmem>>, vector<8x32xf32>
    %cst_12 = arith.constant dense<0.000000e+00> : vector<8x8xf32>
    %12 = tpu.matmul %3, %11, %cst_12 {dimension_numbers = #tpu.dot_dimension_numbers<[1], [1], [0], [0], [0, 0, 1, 0], [], []>} : vector<8x32xf32>, vector<8x32xf32>, vector<8x8xf32> -> vector<8x8xf32>
    %c4 = arith.constant 4 : index
    %c0_13 = arith.constant 0 : index
    %13 = vector.load %arg5[%c4, %c0_13] : memref<12x8xf32, #tpu.memory_space<vmem>>, vector<1x8xf32>
    %14 = vector.broadcast %13 : vector<1x8xf32> to vector<8x8xf32>
    %15 = arith.addf %12, %14 : vector<8x8xf32>
    %c64 = arith.constant 64 : index
    %c0_14 = arith.constant 0 : index
    %16 = vector.load %arg4[%c64, %c0_14] : memref<96x32xf32, #tpu.memory_space<vmem>>, vector<8x32xf32>
    %cst_15 = arith.constant dense<0.000000e+00> : vector<8x8xf32>
    %17 = tpu.matmul %3, %16, %cst_15 {dimension_numbers = #tpu.dot_dimension_numbers<[1], [1], [0], [0], [0, 0, 1, 0], [], []>} : vector<8x32xf32>, vector<8x32xf32>, vector<8x8xf32> -> vector<8x8xf32>
    %c8 = arith.constant 8 : index
    %c0_16 = arith.constant 0 : index
    %18 = vector.load %arg5[%c8, %c0_16] : memref<12x8xf32, #tpu.memory_space<vmem>>, vector<1x8xf32>
    %19 = vector.broadcast %18 : vector<1x8xf32> to vector<8x8xf32>
    %20 = arith.addf %17, %19 : vector<8x8xf32>
    %cst_17 = arith.constant dense<0.000000e+00> : vector<8x8xf32>
    %21 = tpu.matmul %10, %15, %cst_17 {dimension_numbers = #tpu.dot_dimension_numbers<[1], [1], [0], [0], [0, 0, 1, 0], [], []>} : vector<8x8xf32>, vector<8x8xf32>, vector<8x8xf32> -> vector<8x8xf32>
    %cst_18 = arith.constant 0.353553385 : f32
    %22 = vector.broadcast %cst_18 : f32 to vector<8x8xf32>
    %23 = arith.mulf %21, %22 : vector<8x8xf32>
    %24 = vector.broadcast %5 : vector<1x8xf32> to vector<8x8xf32>
    %25 = arith.addf %23, %24 : vector<8x8xf32>
    %cst_19 = arith.constant dense<0xFF800000> : vector<8xf32>
    %26 = vector.multi_reduction <maximumf>, %25, %cst_19 [1] : vector<8x8xf32> to vector<8xf32>
    %27 = vector.shape_cast %26 : vector<8xf32> to vector<8x1xf32>
    %28 = vector.broadcast %27 : vector<8x1xf32> to vector<8x8xf32>
    %29 = arith.subf %25, %28 : vector<8x8xf32>
    %30 = math.exp %29 : vector<8x8xf32>
    %cst_20 = arith.constant dense<0.000000e+00> : vector<8xf32>
    %31 = vector.multi_reduction <add>, %30, %cst_20 [1] : vector<8x8xf32> to vector<8xf32>
    %32 = vector.shape_cast %31 : vector<8xf32> to vector<8x1xf32>
    %33 = tpu.reciprocal %32 {approx = true} : vector<8x1xf32> -> vector<8x1xf32>
    %34 = vector.broadcast %33 : vector<8x1xf32> to vector<8x8xf32>
    %35 = arith.mulf %30, %34 : vector<8x8xf32>
    %cst_21 = arith.constant dense<0.000000e+00> : vector<8x8xf32>
    %36 = tpu.matmul %35, %20, %cst_21 {dimension_numbers = #tpu.dot_dimension_numbers<[1], [0], [0], [1], [0, 0, 1, 1], [], []>} : vector<8x8xf32>, vector<8x8xf32>, vector<8x8xf32> -> vector<8x8xf32>
    %c0_22 = arith.constant 0 : index
    %c0_23 = arith.constant 0 : index
    %37 = vector.load %arg6[%c0_22, %c0_23] : memref<32x32xf32, #tpu.memory_space<vmem>>, vector<8x32xf32>
    %cst_24 = arith.constant dense<0.000000e+00> : vector<8x32xf32>
    %38 = tpu.matmul %36, %37, %cst_24 {dimension_numbers = #tpu.dot_dimension_numbers<[1], [0], [0], [1], [0, 0, 1, 1], [], []>} : vector<8x8xf32>, vector<8x32xf32>, vector<8x32xf32> -> vector<8x32xf32>
    %c8_25 = arith.constant 8 : index
    %c0_26 = arith.constant 0 : index
    %39 = vector.load %arg4[%c8_25, %c0_26] : memref<96x32xf32, #tpu.memory_space<vmem>>, vector<8x32xf32>
    %cst_27 = arith.constant dense<0.000000e+00> : vector<8x8xf32>
    %40 = tpu.matmul %3, %39, %cst_27 {dimension_numbers = #tpu.dot_dimension_numbers<[1], [1], [0], [0], [0, 0, 1, 0], [], []>} : vector<8x32xf32>, vector<8x32xf32>, vector<8x8xf32> -> vector<8x8xf32>
    %c1 = arith.constant 1 : index
    %c0_28 = arith.constant 0 : index
    %41 = vector.load %arg5[%c1, %c0_28] : memref<12x8xf32, #tpu.memory_space<vmem>>, vector<1x8xf32>
    %42 = vector.broadcast %41 : vector<1x8xf32> to vector<8x8xf32>
    %43 = arith.addf %40, %42 : vector<8x8xf32>
    %c40 = arith.constant 40 : index
    %c0_29 = arith.constant 0 : index
    %44 = vector.load %arg4[%c40, %c0_29] : memref<96x32xf32, #tpu.memory_space<vmem>>, vector<8x32xf32>
    %cst_30 = arith.constant dense<0.000000e+00> : vector<8x8xf32>
    %45 = tpu.matmul %3, %44, %cst_30 {dimension_numbers = #tpu.dot_dimension_numbers<[1], [1], [0], [0], [0, 0, 1, 0], [], []>} : vector<8x32xf32>, vector<8x32xf32>, vector<8x8xf32> -> vector<8x8xf32>
    %c5 = arith.constant 5 : index
    %c0_31 = arith.constant 0 : index
    %46 = vector.load %arg5[%c5, %c0_31] : memref<12x8xf32, #tpu.memory_space<vmem>>, vector<1x8xf32>
    %47 = vector.broadcast %46 : vector<1x8xf32> to vector<8x8xf32>
    %48 = arith.addf %45, %47 : vector<8x8xf32>
    %c72 = arith.constant 72 : index
    %c0_32 = arith.constant 0 : index
    %49 = vector.load %arg4[%c72, %c0_32] : memref<96x32xf32, #tpu.memory_space<vmem>>, vector<8x32xf32>
    %cst_33 = arith.constant dense<0.000000e+00> : vector<8x8xf32>
    %50 = tpu.matmul %3, %49, %cst_33 {dimension_numbers = #tpu.dot_dimension_numbers<[1], [1], [0], [0], [0, 0, 1, 0], [], []>} : vector<8x32xf32>, vector<8x32xf32>, vector<8x8xf32> -> vector<8x8xf32>
    %c9 = arith.constant 9 : index
    %c0_34 = arith.constant 0 : index
    %51 = vector.load %arg5[%c9, %c0_34] : memref<12x8xf32, #tpu.memory_space<vmem>>, vector<1x8xf32>
    %52 = vector.broadcast %51 : vector<1x8xf32> to vector<8x8xf32>
    %53 = arith.addf %50, %52 : vector<8x8xf32>
    %cst_35 = arith.constant dense<0.000000e+00> : vector<8x8xf32>
    %54 = tpu.matmul %43, %48, %cst_35 {dimension_numbers = #tpu.dot_dimension_numbers<[1], [1], [0], [0], [0, 0, 1, 0], [], []>} : vector<8x8xf32>, vector<8x8xf32>, vector<8x8xf32> -> vector<8x8xf32>
    %cst_36 = arith.constant 0.353553385 : f32
    %55 = vector.broadcast %cst_36 : f32 to vector<8x8xf32>
    %56 = arith.mulf %54, %55 : vector<8x8xf32>
    %57 = vector.broadcast %5 : vector<1x8xf32> to vector<8x8xf32>
    %58 = arith.addf %56, %57 : vector<8x8xf32>
    %cst_37 = arith.constant dense<0xFF800000> : vector<8xf32>
    %59 = vector.multi_reduction <maximumf>, %58, %cst_37 [1] : vector<8x8xf32> to vector<8xf32>
    %60 = vector.shape_cast %59 : vector<8xf32> to vector<8x1xf32>
    %61 = vector.broadcast %60 : vector<8x1xf32> to vector<8x8xf32>
    %62 = arith.subf %58, %61 : vector<8x8xf32>
    %63 = math.exp %62 : vector<8x8xf32>
    %cst_38 = arith.constant dense<0.000000e+00> : vector<8xf32>
    %64 = vector.multi_reduction <add>, %63, %cst_38 [1] : vector<8x8xf32> to vector<8xf32>
    %65 = vector.shape_cast %64 : vector<8xf32> to vector<8x1xf32>
    %66 = tpu.reciprocal %65 {approx = true} : vector<8x1xf32> -> vector<8x1xf32>
    %67 = vector.broadcast %66 : vector<8x1xf32> to vector<8x8xf32>
    %68 = arith.mulf %63, %67 : vector<8x8xf32>
    %cst_39 = arith.constant dense<0.000000e+00> : vector<8x8xf32>
    %69 = tpu.matmul %68, %53, %cst_39 {dimension_numbers = #tpu.dot_dimension_numbers<[1], [0], [0], [1], [0, 0, 1, 1], [], []>} : vector<8x8xf32>, vector<8x8xf32>, vector<8x8xf32> -> vector<8x8xf32>
    %c8_40 = arith.constant 8 : index
    %c0_41 = arith.constant 0 : index
    %70 = vector.load %arg6[%c8_40, %c0_41] : memref<32x32xf32, #tpu.memory_space<vmem>>, vector<8x32xf32>
    %cst_42 = arith.constant dense<0.000000e+00> : vector<8x32xf32>
    %71 = tpu.matmul %69, %70, %cst_42 {dimension_numbers = #tpu.dot_dimension_numbers<[1], [0], [0], [1], [0, 0, 1, 1], [], []>} : vector<8x8xf32>, vector<8x32xf32>, vector<8x32xf32> -> vector<8x32xf32>
    %72 = arith.addf %38, %71 : vector<8x32xf32>
    %c16 = arith.constant 16 : index
    %c0_43 = arith.constant 0 : index
    %73 = vector.load %arg4[%c16, %c0_43] : memref<96x32xf32, #tpu.memory_space<vmem>>, vector<8x32xf32>
    %cst_44 = arith.constant dense<0.000000e+00> : vector<8x8xf32>
    %74 = tpu.matmul %3, %73, %cst_44 {dimension_numbers = #tpu.dot_dimension_numbers<[1], [1], [0], [0], [0, 0, 1, 0], [], []>} : vector<8x32xf32>, vector<8x32xf32>, vector<8x8xf32> -> vector<8x8xf32>
    %c2 = arith.constant 2 : index
    %c0_45 = arith.constant 0 : index
    %75 = vector.load %arg5[%c2, %c0_45] : memref<12x8xf32, #tpu.memory_space<vmem>>, vector<1x8xf32>
    %76 = vector.broadcast %75 : vector<1x8xf32> to vector<8x8xf32>
    %77 = arith.addf %74, %76 : vector<8x8xf32>
    %c48 = arith.constant 48 : index
    %c0_46 = arith.constant 0 : index
    %78 = vector.load %arg4[%c48, %c0_46] : memref<96x32xf32, #tpu.memory_space<vmem>>, vector<8x32xf32>
    %cst_47 = arith.constant dense<0.000000e+00> : vector<8x8xf32>
    %79 = tpu.matmul %3, %78, %cst_47 {dimension_numbers = #tpu.dot_dimension_numbers<[1], [1], [0], [0], [0, 0, 1, 0], [], []>} : vector<8x32xf32>, vector<8x32xf32>, vector<8x8xf32> -> vector<8x8xf32>
    %c6 = arith.constant 6 : index
    %c0_48 = arith.constant 0 : index
    %80 = vector.load %arg5[%c6, %c0_48] : memref<12x8xf32, #tpu.memory_space<vmem>>, vector<1x8xf32>
    %81 = vector.broadcast %80 : vector<1x8xf32> to vector<8x8xf32>
    %82 = arith.addf %79, %81 : vector<8x8xf32>
    %c80 = arith.constant 80 : index
    %c0_49 = arith.constant 0 : index
    %83 = vector.load %arg4[%c80, %c0_49] : memref<96x32xf32, #tpu.memory_space<vmem>>, vector<8x32xf32>
    %cst_50 = arith.constant dense<0.000000e+00> : vector<8x8xf32>
    %84 = tpu.matmul %3, %83, %cst_50 {dimension_numbers = #tpu.dot_dimension_numbers<[1], [1], [0], [0], [0, 0, 1, 0], [], []>} : vector<8x32xf32>, vector<8x32xf32>, vector<8x8xf32> -> vector<8x8xf32>
    %c10 = arith.constant 10 : index
    %c0_51 = arith.constant 0 : index
    %85 = vector.load %arg5[%c10, %c0_51] : memref<12x8xf32, #tpu.memory_space<vmem>>, vector<1x8xf32>
    %86 = vector.broadcast %85 : vector<1x8xf32> to vector<8x8xf32>
    %87 = arith.addf %84, %86 : vector<8x8xf32>
    %cst_52 = arith.constant dense<0.000000e+00> : vector<8x8xf32>
    %88 = tpu.matmul %77, %82, %cst_52 {dimension_numbers = #tpu.dot_dimension_numbers<[1], [1], [0], [0], [0, 0, 1, 0], [], []>} : vector<8x8xf32>, vector<8x8xf32>, vector<8x8xf32> -> vector<8x8xf32>
    %cst_53 = arith.constant 0.353553385 : f32
    %89 = vector.broadcast %cst_53 : f32 to vector<8x8xf32>
    %90 = arith.mulf %88, %89 : vector<8x8xf32>
    %91 = vector.broadcast %5 : vector<1x8xf32> to vector<8x8xf32>
    %92 = arith.addf %90, %91 : vector<8x8xf32>
    %cst_54 = arith.constant dense<0xFF800000> : vector<8xf32>
    %93 = vector.multi_reduction <maximumf>, %92, %cst_54 [1] : vector<8x8xf32> to vector<8xf32>
    %94 = vector.shape_cast %93 : vector<8xf32> to vector<8x1xf32>
    %95 = vector.broadcast %94 : vector<8x1xf32> to vector<8x8xf32>
    %96 = arith.subf %92, %95 : vector<8x8xf32>
    %97 = math.exp %96 : vector<8x8xf32>
    %cst_55 = arith.constant dense<0.000000e+00> : vector<8xf32>
    %98 = vector.multi_reduction <add>, %97, %cst_55 [1] : vector<8x8xf32> to vector<8xf32>
    %99 = vector.shape_cast %98 : vector<8xf32> to vector<8x1xf32>
    %100 = tpu.reciprocal %99 {approx = true} : vector<8x1xf32> -> vector<8x1xf32>
    %101 = vector.broadcast %100 : vector<8x1xf32> to vector<8x8xf32>
    %102 = arith.mulf %97, %101 : vector<8x8xf32>
    %cst_56 = arith.constant dense<0.000000e+00> : vector<8x8xf32>
    %103 = tpu.matmul %102, %87, %cst_56 {dimension_numbers = #tpu.dot_dimension_numbers<[1], [0], [0], [1], [0, 0, 1, 1], [], []>} : vector<8x8xf32>, vector<8x8xf32>, vector<8x8xf32> -> vector<8x8xf32>
    %c16_57 = arith.constant 16 : index
    %c0_58 = arith.constant 0 : index
    %104 = vector.load %arg6[%c16_57, %c0_58] : memref<32x32xf32, #tpu.memory_space<vmem>>, vector<8x32xf32>
    %cst_59 = arith.constant dense<0.000000e+00> : vector<8x32xf32>
    %105 = tpu.matmul %103, %104, %cst_59 {dimension_numbers = #tpu.dot_dimension_numbers<[1], [0], [0], [1], [0, 0, 1, 1], [], []>} : vector<8x8xf32>, vector<8x32xf32>, vector<8x32xf32> -> vector<8x32xf32>
    %106 = arith.addf %72, %105 : vector<8x32xf32>
    %c24 = arith.constant 24 : index
    %c0_60 = arith.constant 0 : index
    %107 = vector.load %arg4[%c24, %c0_60] : memref<96x32xf32, #tpu.memory_space<vmem>>, vector<8x32xf32>
    %cst_61 = arith.constant dense<0.000000e+00> : vector<8x8xf32>
    %108 = tpu.matmul %3, %107, %cst_61 {dimension_numbers = #tpu.dot_dimension_numbers<[1], [1], [0], [0], [0, 0, 1, 0], [], []>} : vector<8x32xf32>, vector<8x32xf32>, vector<8x8xf32> -> vector<8x8xf32>
    %c3 = arith.constant 3 : index
    %c0_62 = arith.constant 0 : index
    %109 = vector.load %arg5[%c3, %c0_62] : memref<12x8xf32, #tpu.memory_space<vmem>>, vector<1x8xf32>
    %110 = vector.broadcast %109 : vector<1x8xf32> to vector<8x8xf32>
    %111 = arith.addf %108, %110 : vector<8x8xf32>
    %c56 = arith.constant 56 : index
    %c0_63 = arith.constant 0 : index
    %112 = vector.load %arg4[%c56, %c0_63] : memref<96x32xf32, #tpu.memory_space<vmem>>, vector<8x32xf32>
    %cst_64 = arith.constant dense<0.000000e+00> : vector<8x8xf32>
    %113 = tpu.matmul %3, %112, %cst_64 {dimension_numbers = #tpu.dot_dimension_numbers<[1], [1], [0], [0], [0, 0, 1, 0], [], []>} : vector<8x32xf32>, vector<8x32xf32>, vector<8x8xf32> -> vector<8x8xf32>
    %c7 = arith.constant 7 : index
    %c0_65 = arith.constant 0 : index
    %114 = vector.load %arg5[%c7, %c0_65] : memref<12x8xf32, #tpu.memory_space<vmem>>, vector<1x8xf32>
    %115 = vector.broadcast %114 : vector<1x8xf32> to vector<8x8xf32>
    %116 = arith.addf %113, %115 : vector<8x8xf32>
    %c88 = arith.constant 88 : index
    %c0_66 = arith.constant 0 : index
    %117 = vector.load %arg4[%c88, %c0_66] : memref<96x32xf32, #tpu.memory_space<vmem>>, vector<8x32xf32>
    %cst_67 = arith.constant dense<0.000000e+00> : vector<8x8xf32>
    %118 = tpu.matmul %3, %117, %cst_67 {dimension_numbers = #tpu.dot_dimension_numbers<[1], [1], [0], [0], [0, 0, 1, 0], [], []>} : vector<8x32xf32>, vector<8x32xf32>, vector<8x8xf32> -> vector<8x8xf32>
    %c11 = arith.constant 11 : index
    %c0_68 = arith.constant 0 : index
    %119 = vector.load %arg5[%c11, %c0_68] : memref<12x8xf32, #tpu.memory_space<vmem>>, vector<1x8xf32>
    %120 = vector.broadcast %119 : vector<1x8xf32> to vector<8x8xf32>
    %121 = arith.addf %118, %120 : vector<8x8xf32>
    %cst_69 = arith.constant dense<0.000000e+00> : vector<8x8xf32>
    %122 = tpu.matmul %111, %116, %cst_69 {dimension_numbers = #tpu.dot_dimension_numbers<[1], [1], [0], [0], [0, 0, 1, 0], [], []>} : vector<8x8xf32>, vector<8x8xf32>, vector<8x8xf32> -> vector<8x8xf32>
    %cst_70 = arith.constant 0.353553385 : f32
    %123 = vector.broadcast %cst_70 : f32 to vector<8x8xf32>
    %124 = arith.mulf %122, %123 : vector<8x8xf32>
    %125 = vector.broadcast %5 : vector<1x8xf32> to vector<8x8xf32>
    %126 = arith.addf %124, %125 : vector<8x8xf32>
    %cst_71 = arith.constant dense<0xFF800000> : vector<8xf32>
    %127 = vector.multi_reduction <maximumf>, %126, %cst_71 [1] : vector<8x8xf32> to vector<8xf32>
    %128 = vector.shape_cast %127 : vector<8xf32> to vector<8x1xf32>
    %129 = vector.broadcast %128 : vector<8x1xf32> to vector<8x8xf32>
    %130 = arith.subf %126, %129 : vector<8x8xf32>
    %131 = math.exp %130 : vector<8x8xf32>
    %cst_72 = arith.constant dense<0.000000e+00> : vector<8xf32>
    %132 = vector.multi_reduction <add>, %131, %cst_72 [1] : vector<8x8xf32> to vector<8xf32>
    %133 = vector.shape_cast %132 : vector<8xf32> to vector<8x1xf32>
    %134 = tpu.reciprocal %133 {approx = true} : vector<8x1xf32> -> vector<8x1xf32>
    %135 = vector.broadcast %134 : vector<8x1xf32> to vector<8x8xf32>
    %136 = arith.mulf %131, %135 : vector<8x8xf32>
    %cst_73 = arith.constant dense<0.000000e+00> : vector<8x8xf32>
    %137 = tpu.matmul %136, %121, %cst_73 {dimension_numbers = #tpu.dot_dimension_numbers<[1], [0], [0], [1], [0, 0, 1, 1], [], []>} : vector<8x8xf32>, vector<8x8xf32>, vector<8x8xf32> -> vector<8x8xf32>
    %c24_74 = arith.constant 24 : index
    %c0_75 = arith.constant 0 : index
    %138 = vector.load %arg6[%c24_74, %c0_75] : memref<32x32xf32, #tpu.memory_space<vmem>>, vector<8x32xf32>
    %cst_76 = arith.constant dense<0.000000e+00> : vector<8x32xf32>
    %139 = tpu.matmul %137, %138, %cst_76 {dimension_numbers = #tpu.dot_dimension_numbers<[1], [0], [0], [1], [0, 0, 1, 1], [], []>} : vector<8x8xf32>, vector<8x32xf32>, vector<8x32xf32> -> vector<8x32xf32>
    %140 = arith.addf %106, %139 : vector<8x32xf32>
    %c0_77 = arith.constant 0 : index
    %c0_78 = arith.constant 0 : index
    %141 = vector.load %arg7[%c0_77, %c0_78] : memref<1x32xf32, #tpu.memory_space<vmem>>, vector<1x32xf32>
    %142 = vector.broadcast %141 : vector<1x32xf32> to vector<8x32xf32>
    %143 = arith.addf %140, %142 : vector<8x32xf32>
    %144 = arith.addf %3, %143 : vector<8x32xf32>
    %c0_79 = arith.constant 0 : index
    %c0_80 = arith.constant 0 : index
    %145 = vector.load %arg12[%c0_79, %c0_80] : memref<1x32xf32, #tpu.memory_space<vmem>>, vector<1x32xf32>
    %c0_81 = arith.constant 0 : index
    %c0_82 = arith.constant 0 : index
    %146 = vector.load %arg13[%c0_81, %c0_82] : memref<1x32xf32, #tpu.memory_space<vmem>>, vector<1x32xf32>
    %cst_83 = arith.constant dense<0.000000e+00> : vector<8xf32>
    %147 = vector.multi_reduction <add>, %144, %cst_83 [1] : vector<8x32xf32> to vector<8xf32>
    %148 = vector.shape_cast %147 : vector<8xf32> to vector<8x1xf32>
    %cst_84 = arith.constant 3.200000e+01 : f32
    %149 = vector.broadcast %cst_84 : f32 to vector<8x1xf32>
    %150 = arith.divf %148, %149 : vector<8x1xf32>
    %151 = vector.broadcast %150 : vector<8x1xf32> to vector<8x32xf32>
    %152 = arith.subf %144, %151 : vector<8x32xf32>
    %153 = arith.mulf %152, %152 : vector<8x32xf32>
    %cst_85 = arith.constant dense<0.000000e+00> : vector<8xf32>
    %154 = vector.multi_reduction <add>, %153, %cst_85 [1] : vector<8x32xf32> to vector<8xf32>
    %155 = vector.shape_cast %154 : vector<8xf32> to vector<8x1xf32>
    %cst_86 = arith.constant 3.200000e+01 : f32
    %156 = vector.broadcast %cst_86 : f32 to vector<8x1xf32>
    %157 = arith.divf %155, %156 : vector<8x1xf32>
    %cst_87 = arith.constant 9.99999974E-6 : f32
    %158 = vector.broadcast %cst_87 : f32 to vector<8x1xf32>
    %159 = arith.addf %157, %158 : vector<8x1xf32>
    %160 = math.rsqrt %159 : vector<8x1xf32>
    %161 = vector.broadcast %160 : vector<8x1xf32> to vector<8x32xf32>
    %162 = arith.mulf %152, %161 : vector<8x32xf32>
    %163 = vector.broadcast %145 : vector<1x32xf32> to vector<8x32xf32>
    %164 = arith.mulf %162, %163 : vector<8x32xf32>
    %165 = vector.broadcast %146 : vector<1x32xf32> to vector<8x32xf32>
    %166 = arith.addf %164, %165 : vector<8x32xf32>
    %c0_88 = arith.constant 0 : index
    %c0_89 = arith.constant 0 : index
    %167 = vector.load %arg8[%c0_88, %c0_89] : memref<2048x32xbf16, #tpu.memory_space<vmem>>, vector<2048x32xbf16>
    %168 = arith.truncf %166 : vector<8x32xf32> to vector<8x32xbf16>
    %cst_90 = arith.constant dense<0.000000e+00> : vector<8x2048xf32>
    %169 = tpu.matmul %168, %167, %cst_90 {dimension_numbers = #tpu.dot_dimension_numbers<[1], [1], [0], [0], [0, 0, 1, 0], [], []>} : vector<8x32xbf16>, vector<2048x32xbf16>, vector<8x2048xf32> -> vector<8x2048xf32>
    %c0_91 = arith.constant 0 : index
    %c0_92 = arith.constant 0 : index
    %170 = vector.load %arg9[%c0_91, %c0_92] : memref<1x2048xf32, #tpu.memory_space<vmem>>, vector<1x2048xf32>
    %171 = vector.broadcast %170 : vector<1x2048xf32> to vector<8x2048xf32>
    %172 = arith.addf %169, %171 : vector<8x2048xf32>
    %cst_93 = arith.constant 0.000000e+00 : f32
    %173 = vector.broadcast %cst_93 : f32 to vector<8x2048xf32>
    %174 = arith.maximumf %172, %173 : vector<8x2048xf32>
    %c0_94 = arith.constant 0 : index
    %c0_95 = arith.constant 0 : index
    %175 = vector.load %arg10[%c0_94, %c0_95] : memref<32x2048xbf16, #tpu.memory_space<vmem>>, vector<32x2048xbf16>
    %176 = arith.truncf %174 : vector<8x2048xf32> to vector<8x2048xbf16>
    %cst_96 = arith.constant dense<0.000000e+00> : vector<8x32xf32>
    %177 = tpu.matmul %176, %175, %cst_96 {dimension_numbers = #tpu.dot_dimension_numbers<[1], [1], [0], [0], [0, 0, 1, 0], [], []>} : vector<8x2048xbf16>, vector<32x2048xbf16>, vector<8x32xf32> -> vector<8x32xf32>
    %c0_97 = arith.constant 0 : index
    %c0_98 = arith.constant 0 : index
    %178 = vector.load %arg11[%c0_97, %c0_98] : memref<1x32xf32, #tpu.memory_space<vmem>>, vector<1x32xf32>
    %179 = vector.broadcast %178 : vector<1x32xf32> to vector<8x32xf32>
    %180 = arith.addf %177, %179 : vector<8x32xf32>
    %181 = arith.addf %166, %180 : vector<8x32xf32>
    %c0_99 = arith.constant 0 : index
    %c0_100 = arith.constant 0 : index
    %182 = vector.load %arg14[%c0_99, %c0_100] : memref<1x32xf32, #tpu.memory_space<vmem>>, vector<1x32xf32>
    %c0_101 = arith.constant 0 : index
    %c0_102 = arith.constant 0 : index
    %183 = vector.load %arg15[%c0_101, %c0_102] : memref<1x32xf32, #tpu.memory_space<vmem>>, vector<1x32xf32>
    %cst_103 = arith.constant dense<0.000000e+00> : vector<8xf32>
    %184 = vector.multi_reduction <add>, %181, %cst_103 [1] : vector<8x32xf32> to vector<8xf32>
    %185 = vector.shape_cast %184 : vector<8xf32> to vector<8x1xf32>
    %cst_104 = arith.constant 3.200000e+01 : f32
    %186 = vector.broadcast %cst_104 : f32 to vector<8x1xf32>
    %187 = arith.divf %185, %186 : vector<8x1xf32>
    %188 = vector.broadcast %187 : vector<8x1xf32> to vector<8x32xf32>
    %189 = arith.subf %181, %188 : vector<8x32xf32>
    %190 = arith.mulf %189, %189 : vector<8x32xf32>
    %cst_105 = arith.constant dense<0.000000e+00> : vector<8xf32>
    %191 = vector.multi_reduction <add>, %190, %cst_105 [1] : vector<8x32xf32> to vector<8xf32>
    %192 = vector.shape_cast %191 : vector<8xf32> to vector<8x1xf32>
    %cst_106 = arith.constant 3.200000e+01 : f32
    %193 = vector.broadcast %cst_106 : f32 to vector<8x1xf32>
    %194 = arith.divf %192, %193 : vector<8x1xf32>
    %cst_107 = arith.constant 9.99999974E-6 : f32
    %195 = vector.broadcast %cst_107 : f32 to vector<8x1xf32>
    %196 = arith.addf %194, %195 : vector<8x1xf32>
    %197 = math.rsqrt %196 : vector<8x1xf32>
    %198 = vector.broadcast %197 : vector<8x1xf32> to vector<8x32xf32>
    %199 = arith.mulf %189, %198 : vector<8x32xf32>
    %200 = vector.broadcast %182 : vector<1x32xf32> to vector<8x32xf32>
    %201 = arith.mulf %199, %200 : vector<8x32xf32>
    %202 = vector.broadcast %183 : vector<1x32xf32> to vector<8x32xf32>
    %203 = arith.addf %201, %202 : vector<8x32xf32>
    %c0_108 = arith.constant 0 : index
    %c0_109 = arith.constant 0 : index
    %204 = vector.load %arg16[%c0_108, %c0_109] : memref<96x32xf32, #tpu.memory_space<vmem>>, vector<8x32xf32>
    %cst_110 = arith.constant dense<0.000000e+00> : vector<8x8xf32>
    %205 = tpu.matmul %203, %204, %cst_110 {dimension_numbers = #tpu.dot_dimension_numbers<[1], [1], [0], [0], [0, 0, 1, 0], [], []>} : vector<8x32xf32>, vector<8x32xf32>, vector<8x8xf32> -> vector<8x8xf32>
    %c0_111 = arith.constant 0 : index
    %c0_112 = arith.constant 0 : index
    %206 = vector.load %arg17[%c0_111, %c0_112] : memref<12x8xf32, #tpu.memory_space<vmem>>, vector<1x8xf32>
    %207 = vector.broadcast %206 : vector<1x8xf32> to vector<8x8xf32>
    %208 = arith.addf %205, %207 : vector<8x8xf32>
    %c32_113 = arith.constant 32 : index
    %c0_114 = arith.constant 0 : index
    %209 = vector.load %arg16[%c32_113, %c0_114] : memref<96x32xf32, #tpu.memory_space<vmem>>, vector<8x32xf32>
    %cst_115 = arith.constant dense<0.000000e+00> : vector<8x8xf32>
    %210 = tpu.matmul %203, %209, %cst_115 {dimension_numbers = #tpu.dot_dimension_numbers<[1], [1], [0], [0], [0, 0, 1, 0], [], []>} : vector<8x32xf32>, vector<8x32xf32>, vector<8x8xf32> -> vector<8x8xf32>
    %c4_116 = arith.constant 4 : index
    %c0_117 = arith.constant 0 : index
    %211 = vector.load %arg17[%c4_116, %c0_117] : memref<12x8xf32, #tpu.memory_space<vmem>>, vector<1x8xf32>
    %212 = vector.broadcast %211 : vector<1x8xf32> to vector<8x8xf32>
    %213 = arith.addf %210, %212 : vector<8x8xf32>
    %c64_118 = arith.constant 64 : index
    %c0_119 = arith.constant 0 : index
    %214 = vector.load %arg16[%c64_118, %c0_119] : memref<96x32xf32, #tpu.memory_space<vmem>>, vector<8x32xf32>
    %cst_120 = arith.constant dense<0.000000e+00> : vector<8x8xf32>
    %215 = tpu.matmul %203, %214, %cst_120 {dimension_numbers = #tpu.dot_dimension_numbers<[1], [1], [0], [0], [0, 0, 1, 0], [], []>} : vector<8x32xf32>, vector<8x32xf32>, vector<8x8xf32> -> vector<8x8xf32>
    %c8_121 = arith.constant 8 : index
    %c0_122 = arith.constant 0 : index
    %216 = vector.load %arg17[%c8_121, %c0_122] : memref<12x8xf32, #tpu.memory_space<vmem>>, vector<1x8xf32>
    %217 = vector.broadcast %216 : vector<1x8xf32> to vector<8x8xf32>
    %218 = arith.addf %215, %217 : vector<8x8xf32>
    %cst_123 = arith.constant dense<0.000000e+00> : vector<8x8xf32>
    %219 = tpu.matmul %208, %213, %cst_123 {dimension_numbers = #tpu.dot_dimension_numbers<[1], [1], [0], [0], [0, 0, 1, 0], [], []>} : vector<8x8xf32>, vector<8x8xf32>, vector<8x8xf32> -> vector<8x8xf32>
    %cst_124 = arith.constant 0.353553385 : f32
    %220 = vector.broadcast %cst_124 : f32 to vector<8x8xf32>
    %221 = arith.mulf %219, %220 : vector<8x8xf32>
    %222 = vector.broadcast %5 : vector<1x8xf32> to vector<8x8xf32>
    %223 = arith.addf %221, %222 : vector<8x8xf32>
    %cst_125 = arith.constant dense<0xFF800000> : vector<8xf32>
    %224 = vector.multi_reduction <maximumf>, %223, %cst_125 [1] : vector<8x8xf32> to vector<8xf32>
    %225 = vector.shape_cast %224 : vector<8xf32> to vector<8x1xf32>
    %226 = vector.broadcast %225 : vector<8x1xf32> to vector<8x8xf32>
    %227 = arith.subf %223, %226 : vector<8x8xf32>
    %228 = math.exp %227 : vector<8x8xf32>
    %cst_126 = arith.constant dense<0.000000e+00> : vector<8xf32>
    %229 = vector.multi_reduction <add>, %228, %cst_126 [1] : vector<8x8xf32> to vector<8xf32>
    %230 = vector.shape_cast %229 : vector<8xf32> to vector<8x1xf32>
    %231 = tpu.reciprocal %230 {approx = true} : vector<8x1xf32> -> vector<8x1xf32>
    %232 = vector.broadcast %231 : vector<8x1xf32> to vector<8x8xf32>
    %233 = arith.mulf %228, %232 : vector<8x8xf32>
    %cst_127 = arith.constant dense<0.000000e+00> : vector<8x8xf32>
    %234 = tpu.matmul %233, %218, %cst_127 {dimension_numbers = #tpu.dot_dimension_numbers<[1], [0], [0], [1], [0, 0, 1, 1], [], []>} : vector<8x8xf32>, vector<8x8xf32>, vector<8x8xf32> -> vector<8x8xf32>
    %c0_128 = arith.constant 0 : index
    %c0_129 = arith.constant 0 : index
    %235 = vector.load %arg18[%c0_128, %c0_129] : memref<32x32xf32, #tpu.memory_space<vmem>>, vector<8x32xf32>
    %cst_130 = arith.constant dense<0.000000e+00> : vector<8x32xf32>
    %236 = tpu.matmul %234, %235, %cst_130 {dimension_numbers = #tpu.dot_dimension_numbers<[1], [0], [0], [1], [0, 0, 1, 1], [], []>} : vector<8x8xf32>, vector<8x32xf32>, vector<8x32xf32> -> vector<8x32xf32>
    %c8_131 = arith.constant 8 : index
    %c0_132 = arith.constant 0 : index
    %237 = vector.load %arg16[%c8_131, %c0_132] : memref<96x32xf32, #tpu.memory_space<vmem>>, vector<8x32xf32>
    %cst_133 = arith.constant dense<0.000000e+00> : vector<8x8xf32>
    %238 = tpu.matmul %203, %237, %cst_133 {dimension_numbers = #tpu.dot_dimension_numbers<[1], [1], [0], [0], [0, 0, 1, 0], [], []>} : vector<8x32xf32>, vector<8x32xf32>, vector<8x8xf32> -> vector<8x8xf32>
    %c1_134 = arith.constant 1 : index
    %c0_135 = arith.constant 0 : index
    %239 = vector.load %arg17[%c1_134, %c0_135] : memref<12x8xf32, #tpu.memory_space<vmem>>, vector<1x8xf32>
    %240 = vector.broadcast %239 : vector<1x8xf32> to vector<8x8xf32>
    %241 = arith.addf %238, %240 : vector<8x8xf32>
    %c40_136 = arith.constant 40 : index
    %c0_137 = arith.constant 0 : index
    %242 = vector.load %arg16[%c40_136, %c0_137] : memref<96x32xf32, #tpu.memory_space<vmem>>, vector<8x32xf32>
    %cst_138 = arith.constant dense<0.000000e+00> : vector<8x8xf32>
    %243 = tpu.matmul %203, %242, %cst_138 {dimension_numbers = #tpu.dot_dimension_numbers<[1], [1], [0], [0], [0, 0, 1, 0], [], []>} : vector<8x32xf32>, vector<8x32xf32>, vector<8x8xf32> -> vector<8x8xf32>
    %c5_139 = arith.constant 5 : index
    %c0_140 = arith.constant 0 : index
    %244 = vector.load %arg17[%c5_139, %c0_140] : memref<12x8xf32, #tpu.memory_space<vmem>>, vector<1x8xf32>
    %245 = vector.broadcast %244 : vector<1x8xf32> to vector<8x8xf32>
    %246 = arith.addf %243, %245 : vector<8x8xf32>
    %c72_141 = arith.constant 72 : index
    %c0_142 = arith.constant 0 : index
    %247 = vector.load %arg16[%c72_141, %c0_142] : memref<96x32xf32, #tpu.memory_space<vmem>>, vector<8x32xf32>
    %cst_143 = arith.constant dense<0.000000e+00> : vector<8x8xf32>
    %248 = tpu.matmul %203, %247, %cst_143 {dimension_numbers = #tpu.dot_dimension_numbers<[1], [1], [0], [0], [0, 0, 1, 0], [], []>} : vector<8x32xf32>, vector<8x32xf32>, vector<8x8xf32> -> vector<8x8xf32>
    %c9_144 = arith.constant 9 : index
    %c0_145 = arith.constant 0 : index
    %249 = vector.load %arg17[%c9_144, %c0_145] : memref<12x8xf32, #tpu.memory_space<vmem>>, vector<1x8xf32>
    %250 = vector.broadcast %249 : vector<1x8xf32> to vector<8x8xf32>
    %251 = arith.addf %248, %250 : vector<8x8xf32>
    %cst_146 = arith.constant dense<0.000000e+00> : vector<8x8xf32>
    %252 = tpu.matmul %241, %246, %cst_146 {dimension_numbers = #tpu.dot_dimension_numbers<[1], [1], [0], [0], [0, 0, 1, 0], [], []>} : vector<8x8xf32>, vector<8x8xf32>, vector<8x8xf32> -> vector<8x8xf32>
    %cst_147 = arith.constant 0.353553385 : f32
    %253 = vector.broadcast %cst_147 : f32 to vector<8x8xf32>
    %254 = arith.mulf %252, %253 : vector<8x8xf32>
    %255 = vector.broadcast %5 : vector<1x8xf32> to vector<8x8xf32>
    %256 = arith.addf %254, %255 : vector<8x8xf32>
    %cst_148 = arith.constant dense<0xFF800000> : vector<8xf32>
    %257 = vector.multi_reduction <maximumf>, %256, %cst_148 [1] : vector<8x8xf32> to vector<8xf32>
    %258 = vector.shape_cast %257 : vector<8xf32> to vector<8x1xf32>
    %259 = vector.broadcast %258 : vector<8x1xf32> to vector<8x8xf32>
    %260 = arith.subf %256, %259 : vector<8x8xf32>
    %261 = math.exp %260 : vector<8x8xf32>
    %cst_149 = arith.constant dense<0.000000e+00> : vector<8xf32>
    %262 = vector.multi_reduction <add>, %261, %cst_149 [1] : vector<8x8xf32> to vector<8xf32>
    %263 = vector.shape_cast %262 : vector<8xf32> to vector<8x1xf32>
    %264 = tpu.reciprocal %263 {approx = true} : vector<8x1xf32> -> vector<8x1xf32>
    %265 = vector.broadcast %264 : vector<8x1xf32> to vector<8x8xf32>
    %266 = arith.mulf %261, %265 : vector<8x8xf32>
    %cst_150 = arith.constant dense<0.000000e+00> : vector<8x8xf32>
    %267 = tpu.matmul %266, %251, %cst_150 {dimension_numbers = #tpu.dot_dimension_numbers<[1], [0], [0], [1], [0, 0, 1, 1], [], []>} : vector<8x8xf32>, vector<8x8xf32>, vector<8x8xf32> -> vector<8x8xf32>
    %c8_151 = arith.constant 8 : index
    %c0_152 = arith.constant 0 : index
    %268 = vector.load %arg18[%c8_151, %c0_152] : memref<32x32xf32, #tpu.memory_space<vmem>>, vector<8x32xf32>
    %cst_153 = arith.constant dense<0.000000e+00> : vector<8x32xf32>
    %269 = tpu.matmul %267, %268, %cst_153 {dimension_numbers = #tpu.dot_dimension_numbers<[1], [0], [0], [1], [0, 0, 1, 1], [], []>} : vector<8x8xf32>, vector<8x32xf32>, vector<8x32xf32> -> vector<8x32xf32>
    %270 = arith.addf %236, %269 : vector<8x32xf32>
    %c16_154 = arith.constant 16 : index
    %c0_155 = arith.constant 0 : index
    %271 = vector.load %arg16[%c16_154, %c0_155] : memref<96x32xf32, #tpu.memory_space<vmem>>, vector<8x32xf32>
    %cst_156 = arith.constant dense<0.000000e+00> : vector<8x8xf32>
    %272 = tpu.matmul %203, %271, %cst_156 {dimension_numbers = #tpu.dot_dimension_numbers<[1], [1], [0], [0], [0, 0, 1, 0], [], []>} : vector<8x32xf32>, vector<8x32xf32>, vector<8x8xf32> -> vector<8x8xf32>
    %c2_157 = arith.constant 2 : index
    %c0_158 = arith.constant 0 : index
    %273 = vector.load %arg17[%c2_157, %c0_158] : memref<12x8xf32, #tpu.memory_space<vmem>>, vector<1x8xf32>
    %274 = vector.broadcast %273 : vector<1x8xf32> to vector<8x8xf32>
    %275 = arith.addf %272, %274 : vector<8x8xf32>
    %c48_159 = arith.constant 48 : index
    %c0_160 = arith.constant 0 : index
    %276 = vector.load %arg16[%c48_159, %c0_160] : memref<96x32xf32, #tpu.memory_space<vmem>>, vector<8x32xf32>
    %cst_161 = arith.constant dense<0.000000e+00> : vector<8x8xf32>
    %277 = tpu.matmul %203, %276, %cst_161 {dimension_numbers = #tpu.dot_dimension_numbers<[1], [1], [0], [0], [0, 0, 1, 0], [], []>} : vector<8x32xf32>, vector<8x32xf32>, vector<8x8xf32> -> vector<8x8xf32>
    %c6_162 = arith.constant 6 : index
    %c0_163 = arith.constant 0 : index
    %278 = vector.load %arg17[%c6_162, %c0_163] : memref<12x8xf32, #tpu.memory_space<vmem>>, vector<1x8xf32>
    %279 = vector.broadcast %278 : vector<1x8xf32> to vector<8x8xf32>
    %280 = arith.addf %277, %279 : vector<8x8xf32>
    %c80_164 = arith.constant 80 : index
    %c0_165 = arith.constant 0 : index
    %281 = vector.load %arg16[%c80_164, %c0_165] : memref<96x32xf32, #tpu.memory_space<vmem>>, vector<8x32xf32>
    %cst_166 = arith.constant dense<0.000000e+00> : vector<8x8xf32>
    %282 = tpu.matmul %203, %281, %cst_166 {dimension_numbers = #tpu.dot_dimension_numbers<[1], [1], [0], [0], [0, 0, 1, 0], [], []>} : vector<8x32xf32>, vector<8x32xf32>, vector<8x8xf32> -> vector<8x8xf32>
    %c10_167 = arith.constant 10 : index
    %c0_168 = arith.constant 0 : index
    %283 = vector.load %arg17[%c10_167, %c0_168] : memref<12x8xf32, #tpu.memory_space<vmem>>, vector<1x8xf32>
    %284 = vector.broadcast %283 : vector<1x8xf32> to vector<8x8xf32>
    %285 = arith.addf %282, %284 : vector<8x8xf32>
    %cst_169 = arith.constant dense<0.000000e+00> : vector<8x8xf32>
    %286 = tpu.matmul %275, %280, %cst_169 {dimension_numbers = #tpu.dot_dimension_numbers<[1], [1], [0], [0], [0, 0, 1, 0], [], []>} : vector<8x8xf32>, vector<8x8xf32>, vector<8x8xf32> -> vector<8x8xf32>
    %cst_170 = arith.constant 0.353553385 : f32
    %287 = vector.broadcast %cst_170 : f32 to vector<8x8xf32>
    %288 = arith.mulf %286, %287 : vector<8x8xf32>
    %289 = vector.broadcast %5 : vector<1x8xf32> to vector<8x8xf32>
    %290 = arith.addf %288, %289 : vector<8x8xf32>
    %cst_171 = arith.constant dense<0xFF800000> : vector<8xf32>
    %291 = vector.multi_reduction <maximumf>, %290, %cst_171 [1] : vector<8x8xf32> to vector<8xf32>
    %292 = vector.shape_cast %291 : vector<8xf32> to vector<8x1xf32>
    %293 = vector.broadcast %292 : vector<8x1xf32> to vector<8x8xf32>
    %294 = arith.subf %290, %293 : vector<8x8xf32>
    %295 = math.exp %294 : vector<8x8xf32>
    %cst_172 = arith.constant dense<0.000000e+00> : vector<8xf32>
    %296 = vector.multi_reduction <add>, %295, %cst_172 [1] : vector<8x8xf32> to vector<8xf32>
    %297 = vector.shape_cast %296 : vector<8xf32> to vector<8x1xf32>
    %298 = tpu.reciprocal %297 {approx = true} : vector<8x1xf32> -> vector<8x1xf32>
    %299 = vector.broadcast %298 : vector<8x1xf32> to vector<8x8xf32>
    %300 = arith.mulf %295, %299 : vector<8x8xf32>
    %cst_173 = arith.constant dense<0.000000e+00> : vector<8x8xf32>
    %301 = tpu.matmul %300, %285, %cst_173 {dimension_numbers = #tpu.dot_dimension_numbers<[1], [0], [0], [1], [0, 0, 1, 1], [], []>} : vector<8x8xf32>, vector<8x8xf32>, vector<8x8xf32> -> vector<8x8xf32>
    %c16_174 = arith.constant 16 : index
    %c0_175 = arith.constant 0 : index
    %302 = vector.load %arg18[%c16_174, %c0_175] : memref<32x32xf32, #tpu.memory_space<vmem>>, vector<8x32xf32>
    %cst_176 = arith.constant dense<0.000000e+00> : vector<8x32xf32>
    %303 = tpu.matmul %301, %302, %cst_176 {dimension_numbers = #tpu.dot_dimension_numbers<[1], [0], [0], [1], [0, 0, 1, 1], [], []>} : vector<8x8xf32>, vector<8x32xf32>, vector<8x32xf32> -> vector<8x32xf32>
    %304 = arith.addf %270, %303 : vector<8x32xf32>
    %c24_177 = arith.constant 24 : index
    %c0_178 = arith.constant 0 : index
    %305 = vector.load %arg16[%c24_177, %c0_178] : memref<96x32xf32, #tpu.memory_space<vmem>>, vector<8x32xf32>
    %cst_179 = arith.constant dense<0.000000e+00> : vector<8x8xf32>
    %306 = tpu.matmul %203, %305, %cst_179 {dimension_numbers = #tpu.dot_dimension_numbers<[1], [1], [0], [0], [0, 0, 1, 0], [], []>} : vector<8x32xf32>, vector<8x32xf32>, vector<8x8xf32> -> vector<8x8xf32>
    %c3_180 = arith.constant 3 : index
    %c0_181 = arith.constant 0 : index
    %307 = vector.load %arg17[%c3_180, %c0_181] : memref<12x8xf32, #tpu.memory_space<vmem>>, vector<1x8xf32>
    %308 = vector.broadcast %307 : vector<1x8xf32> to vector<8x8xf32>
    %309 = arith.addf %306, %308 : vector<8x8xf32>
    %c56_182 = arith.constant 56 : index
    %c0_183 = arith.constant 0 : index
    %310 = vector.load %arg16[%c56_182, %c0_183] : memref<96x32xf32, #tpu.memory_space<vmem>>, vector<8x32xf32>
    %cst_184 = arith.constant dense<0.000000e+00> : vector<8x8xf32>
    %311 = tpu.matmul %203, %310, %cst_184 {dimension_numbers = #tpu.dot_dimension_numbers<[1], [1], [0], [0], [0, 0, 1, 0], [], []>} : vector<8x32xf32>, vector<8x32xf32>, vector<8x8xf32> -> vector<8x8xf32>
    %c7_185 = arith.constant 7 : index
    %c0_186 = arith.constant 0 : index
    %312 = vector.load %arg17[%c7_185, %c0_186] : memref<12x8xf32, #tpu.memory_space<vmem>>, vector<1x8xf32>
    %313 = vector.broadcast %312 : vector<1x8xf32> to vector<8x8xf32>
    %314 = arith.addf %311, %313 : vector<8x8xf32>
    %c88_187 = arith.constant 88 : index
    %c0_188 = arith.constant 0 : index
    %315 = vector.load %arg16[%c88_187, %c0_188] : memref<96x32xf32, #tpu.memory_space<vmem>>, vector<8x32xf32>
    %cst_189 = arith.constant dense<0.000000e+00> : vector<8x8xf32>
    %316 = tpu.matmul %203, %315, %cst_189 {dimension_numbers = #tpu.dot_dimension_numbers<[1], [1], [0], [0], [0, 0, 1, 0], [], []>} : vector<8x32xf32>, vector<8x32xf32>, vector<8x8xf32> -> vector<8x8xf32>
    %c11_190 = arith.constant 11 : index
    %c0_191 = arith.constant 0 : index
    %317 = vector.load %arg17[%c11_190, %c0_191] : memref<12x8xf32, #tpu.memory_space<vmem>>, vector<1x8xf32>
    %318 = vector.broadcast %317 : vector<1x8xf32> to vector<8x8xf32>
    %319 = arith.addf %316, %318 : vector<8x8xf32>
    %cst_192 = arith.constant dense<0.000000e+00> : vector<8x8xf32>
    %320 = tpu.matmul %309, %314, %cst_192 {dimension_numbers = #tpu.dot_dimension_numbers<[1], [1], [0], [0], [0, 0, 1, 0], [], []>} : vector<8x8xf32>, vector<8x8xf32>, vector<8x8xf32> -> vector<8x8xf32>
    %cst_193 = arith.constant 0.353553385 : f32
    %321 = vector.broadcast %cst_193 : f32 to vector<8x8xf32>
    %322 = arith.mulf %320, %321 : vector<8x8xf32>
    %323 = vector.broadcast %5 : vector<1x8xf32> to vector<8x8xf32>
    %324 = arith.addf %322, %323 : vector<8x8xf32>
    %cst_194 = arith.constant dense<0xFF800000> : vector<8xf32>
    %325 = vector.multi_reduction <maximumf>, %324, %cst_194 [1] : vector<8x8xf32> to vector<8xf32>
    %326 = vector.shape_cast %325 : vector<8xf32> to vector<8x1xf32>
    %327 = vector.broadcast %326 : vector<8x1xf32> to vector<8x8xf32>
    %328 = arith.subf %324, %327 : vector<8x8xf32>
    %329 = math.exp %328 : vector<8x8xf32>
    %cst_195 = arith.constant dense<0.000000e+00> : vector<8xf32>
    %330 = vector.multi_reduction <add>, %329, %cst_195 [1] : vector<8x8xf32> to vector<8xf32>
    %331 = vector.shape_cast %330 : vector<8xf32> to vector<8x1xf32>
    %332 = tpu.reciprocal %331 {approx = true} : vector<8x1xf32> -> vector<8x1xf32>
    %333 = vector.broadcast %332 : vector<8x1xf32> to vector<8x8xf32>
    %334 = arith.mulf %329, %333 : vector<8x8xf32>
    %cst_196 = arith.constant dense<0.000000e+00> : vector<8x8xf32>
    %335 = tpu.matmul %334, %319, %cst_196 {dimension_numbers = #tpu.dot_dimension_numbers<[1], [0], [0], [1], [0, 0, 1, 1], [], []>} : vector<8x8xf32>, vector<8x8xf32>, vector<8x8xf32> -> vector<8x8xf32>
    %c24_197 = arith.constant 24 : index
    %c0_198 = arith.constant 0 : index
    %336 = vector.load %arg18[%c24_197, %c0_198] : memref<32x32xf32, #tpu.memory_space<vmem>>, vector<8x32xf32>
    %cst_199 = arith.constant dense<0.000000e+00> : vector<8x32xf32>
    %337 = tpu.matmul %335, %336, %cst_199 {dimension_numbers = #tpu.dot_dimension_numbers<[1], [0], [0], [1], [0, 0, 1, 1], [], []>} : vector<8x8xf32>, vector<8x32xf32>, vector<8x32xf32> -> vector<8x32xf32>
    %338 = arith.addf %304, %337 : vector<8x32xf32>
    %c0_200 = arith.constant 0 : index
    %c0_201 = arith.constant 0 : index
    %339 = vector.load %arg19[%c0_200, %c0_201] : memref<1x32xf32, #tpu.memory_space<vmem>>, vector<1x32xf32>
    %340 = vector.broadcast %339 : vector<1x32xf32> to vector<8x32xf32>
    %341 = arith.addf %338, %340 : vector<8x32xf32>
    %342 = arith.addf %203, %341 : vector<8x32xf32>
    %c0_202 = arith.constant 0 : index
    %c0_203 = arith.constant 0 : index
    %343 = vector.load %arg24[%c0_202, %c0_203] : memref<1x32xf32, #tpu.memory_space<vmem>>, vector<1x32xf32>
    %c0_204 = arith.constant 0 : index
    %c0_205 = arith.constant 0 : index
    %344 = vector.load %arg25[%c0_204, %c0_205] : memref<1x32xf32, #tpu.memory_space<vmem>>, vector<1x32xf32>
    %cst_206 = arith.constant dense<0.000000e+00> : vector<8xf32>
    %345 = vector.multi_reduction <add>, %342, %cst_206 [1] : vector<8x32xf32> to vector<8xf32>
    %346 = vector.shape_cast %345 : vector<8xf32> to vector<8x1xf32>
    %cst_207 = arith.constant 3.200000e+01 : f32
    %347 = vector.broadcast %cst_207 : f32 to vector<8x1xf32>
    %348 = arith.divf %346, %347 : vector<8x1xf32>
    %349 = vector.broadcast %348 : vector<8x1xf32> to vector<8x32xf32>
    %350 = arith.subf %342, %349 : vector<8x32xf32>
    %351 = arith.mulf %350, %350 : vector<8x32xf32>
    %cst_208 = arith.constant dense<0.000000e+00> : vector<8xf32>
    %352 = vector.multi_reduction <add>, %351, %cst_208 [1] : vector<8x32xf32> to vector<8xf32>
    %353 = vector.shape_cast %352 : vector<8xf32> to vector<8x1xf32>
    %cst_209 = arith.constant 3.200000e+01 : f32
    %354 = vector.broadcast %cst_209 : f32 to vector<8x1xf32>
    %355 = arith.divf %353, %354 : vector<8x1xf32>
    %cst_210 = arith.constant 9.99999974E-6 : f32
    %356 = vector.broadcast %cst_210 : f32 to vector<8x1xf32>
    %357 = arith.addf %355, %356 : vector<8x1xf32>
    %358 = math.rsqrt %357 : vector<8x1xf32>
    %359 = vector.broadcast %358 : vector<8x1xf32> to vector<8x32xf32>
    %360 = arith.mulf %350, %359 : vector<8x32xf32>
    %361 = vector.broadcast %343 : vector<1x32xf32> to vector<8x32xf32>
    %362 = arith.mulf %360, %361 : vector<8x32xf32>
    %363 = vector.broadcast %344 : vector<1x32xf32> to vector<8x32xf32>
    %364 = arith.addf %362, %363 : vector<8x32xf32>
    %c0_211 = arith.constant 0 : index
    %c0_212 = arith.constant 0 : index
    %365 = vector.load %arg20[%c0_211, %c0_212] : memref<2048x32xbf16, #tpu.memory_space<vmem>>, vector<2048x32xbf16>
    %366 = arith.truncf %364 : vector<8x32xf32> to vector<8x32xbf16>
    %cst_213 = arith.constant dense<0.000000e+00> : vector<8x2048xf32>
    %367 = tpu.matmul %366, %365, %cst_213 {dimension_numbers = #tpu.dot_dimension_numbers<[1], [1], [0], [0], [0, 0, 1, 0], [], []>} : vector<8x32xbf16>, vector<2048x32xbf16>, vector<8x2048xf32> -> vector<8x2048xf32>
    %c0_214 = arith.constant 0 : index
    %c0_215 = arith.constant 0 : index
    %368 = vector.load %arg21[%c0_214, %c0_215] : memref<1x2048xf32, #tpu.memory_space<vmem>>, vector<1x2048xf32>
    %369 = vector.broadcast %368 : vector<1x2048xf32> to vector<8x2048xf32>
    %370 = arith.addf %367, %369 : vector<8x2048xf32>
    %cst_216 = arith.constant 0.000000e+00 : f32
    %371 = vector.broadcast %cst_216 : f32 to vector<8x2048xf32>
    %372 = arith.maximumf %370, %371 : vector<8x2048xf32>
    %c0_217 = arith.constant 0 : index
    %c0_218 = arith.constant 0 : index
    %373 = vector.load %arg22[%c0_217, %c0_218] : memref<32x2048xbf16, #tpu.memory_space<vmem>>, vector<32x2048xbf16>
    %374 = arith.truncf %372 : vector<8x2048xf32> to vector<8x2048xbf16>
    %cst_219 = arith.constant dense<0.000000e+00> : vector<8x32xf32>
    %375 = tpu.matmul %374, %373, %cst_219 {dimension_numbers = #tpu.dot_dimension_numbers<[1], [1], [0], [0], [0, 0, 1, 0], [], []>} : vector<8x2048xbf16>, vector<32x2048xbf16>, vector<8x32xf32> -> vector<8x32xf32>
    %c0_220 = arith.constant 0 : index
    %c0_221 = arith.constant 0 : index
    %376 = vector.load %arg23[%c0_220, %c0_221] : memref<1x32xf32, #tpu.memory_space<vmem>>, vector<1x32xf32>
    %377 = vector.broadcast %376 : vector<1x32xf32> to vector<8x32xf32>
    %378 = arith.addf %375, %377 : vector<8x32xf32>
    %379 = arith.addf %364, %378 : vector<8x32xf32>
    %c0_222 = arith.constant 0 : index
    %c0_223 = arith.constant 0 : index
    %380 = vector.load %arg26[%c0_222, %c0_223] : memref<1x32xf32, #tpu.memory_space<vmem>>, vector<1x32xf32>
    %c0_224 = arith.constant 0 : index
    %c0_225 = arith.constant 0 : index
    %381 = vector.load %arg27[%c0_224, %c0_225] : memref<1x32xf32, #tpu.memory_space<vmem>>, vector<1x32xf32>
    %cst_226 = arith.constant dense<0.000000e+00> : vector<8xf32>
    %382 = vector.multi_reduction <add>, %379, %cst_226 [1] : vector<8x32xf32> to vector<8xf32>
    %383 = vector.shape_cast %382 : vector<8xf32> to vector<8x1xf32>
    %cst_227 = arith.constant 3.200000e+01 : f32
    %384 = vector.broadcast %cst_227 : f32 to vector<8x1xf32>
    %385 = arith.divf %383, %384 : vector<8x1xf32>
    %386 = vector.broadcast %385 : vector<8x1xf32> to vector<8x32xf32>
    %387 = arith.subf %379, %386 : vector<8x32xf32>
    %388 = arith.mulf %387, %387 : vector<8x32xf32>
    %cst_228 = arith.constant dense<0.000000e+00> : vector<8xf32>
    %389 = vector.multi_reduction <add>, %388, %cst_228 [1] : vector<8x32xf32> to vector<8xf32>
    %390 = vector.shape_cast %389 : vector<8xf32> to vector<8x1xf32>
    %cst_229 = arith.constant 3.200000e+01 : f32
    %391 = vector.broadcast %cst_229 : f32 to vector<8x1xf32>
    %392 = arith.divf %390, %391 : vector<8x1xf32>
    %cst_230 = arith.constant 9.99999974E-6 : f32
    %393 = vector.broadcast %cst_230 : f32 to vector<8x1xf32>
    %394 = arith.addf %392, %393 : vector<8x1xf32>
    %395 = math.rsqrt %394 : vector<8x1xf32>
    %396 = vector.broadcast %395 : vector<8x1xf32> to vector<8x32xf32>
    %397 = arith.mulf %387, %396 : vector<8x32xf32>
    %398 = vector.broadcast %380 : vector<1x32xf32> to vector<8x32xf32>
    %399 = arith.mulf %397, %398 : vector<8x32xf32>
    %400 = vector.broadcast %381 : vector<1x32xf32> to vector<8x32xf32>
    %401 = arith.addf %399, %400 : vector<8x32xf32>
    %c0_231 = arith.constant 0 : index
    %c0_232 = arith.constant 0 : index
    %402 = vector.load %arg28[%c0_231, %c0_232] : memref<64x32xf32, #tpu.memory_space<vmem>>, vector<64x32xf32>
    %cst_233 = arith.constant dense<0.000000e+00> : vector<8x64xf32>
    %403 = tpu.matmul %401, %402, %cst_233 {dimension_numbers = #tpu.dot_dimension_numbers<[1], [1], [0], [0], [0, 0, 1, 0], [], []>} : vector<8x32xf32>, vector<64x32xf32>, vector<8x64xf32> -> vector<8x64xf32>
    %c0_234 = arith.constant 0 : index
    %c0_235 = arith.constant 0 : index
    %404 = vector.load %arg29[%c0_234, %c0_235] : memref<1x64xf32, #tpu.memory_space<vmem>>, vector<1x64xf32>
    %405 = vector.broadcast %404 : vector<1x64xf32> to vector<8x64xf32>
    %406 = arith.addf %403, %405 : vector<8x64xf32>
    %cst_236 = arith.constant 5.000000e-01 : f32
    %407 = vector.broadcast %cst_236 : f32 to vector<8x64xf32>
    %408 = arith.mulf %407, %406 : vector<8x64xf32>
    %cst_237 = arith.constant 0.707106769 : f32
    %409 = vector.broadcast %cst_237 : f32 to vector<8x64xf32>
    %410 = arith.mulf %406, %409 : vector<8x64xf32>
    %411 = math.erf %410 : vector<8x64xf32>
    %cst_238 = arith.constant 1.000000e+00 : f32
    %412 = vector.broadcast %cst_238 : f32 to vector<8x64xf32>
    %413 = arith.addf %412, %411 : vector<8x64xf32>
    %414 = arith.mulf %408, %413 : vector<8x64xf32>
    %c0_239 = arith.constant 0 : index
    %c0_240 = arith.constant 0 : index
    %415 = vector.load %arg30[%c0_239, %c0_240] : memref<1x64xf32, #tpu.memory_space<vmem>>, vector<1x64xf32>
    %c0_241 = arith.constant 0 : index
    %c0_242 = arith.constant 0 : index
    %416 = vector.load %arg31[%c0_241, %c0_242] : memref<1x64xf32, #tpu.memory_space<vmem>>, vector<1x64xf32>
    %cst_243 = arith.constant dense<0.000000e+00> : vector<8xf32>
    %417 = vector.multi_reduction <add>, %414, %cst_243 [1] : vector<8x64xf32> to vector<8xf32>
    %418 = vector.shape_cast %417 : vector<8xf32> to vector<8x1xf32>
    %cst_244 = arith.constant 6.400000e+01 : f32
    %419 = vector.broadcast %cst_244 : f32 to vector<8x1xf32>
    %420 = arith.divf %418, %419 : vector<8x1xf32>
    %421 = vector.broadcast %420 : vector<8x1xf32> to vector<8x64xf32>
    %422 = arith.subf %414, %421 : vector<8x64xf32>
    %423 = arith.mulf %422, %422 : vector<8x64xf32>
    %cst_245 = arith.constant dense<0.000000e+00> : vector<8xf32>
    %424 = vector.multi_reduction <add>, %423, %cst_245 [1] : vector<8x64xf32> to vector<8xf32>
    %425 = vector.shape_cast %424 : vector<8xf32> to vector<8x1xf32>
    %cst_246 = arith.constant 6.400000e+01 : f32
    %426 = vector.broadcast %cst_246 : f32 to vector<8x1xf32>
    %427 = arith.divf %425, %426 : vector<8x1xf32>
    %cst_247 = arith.constant 9.99999974E-6 : f32
    %428 = vector.broadcast %cst_247 : f32 to vector<8x1xf32>
    %429 = arith.addf %427, %428 : vector<8x1xf32>
    %430 = math.rsqrt %429 : vector<8x1xf32>
    %431 = vector.broadcast %430 : vector<8x1xf32> to vector<8x64xf32>
    %432 = arith.mulf %422, %431 : vector<8x64xf32>
    %433 = vector.broadcast %415 : vector<1x64xf32> to vector<8x64xf32>
    %434 = arith.mulf %432, %433 : vector<8x64xf32>
    %435 = vector.broadcast %416 : vector<1x64xf32> to vector<8x64xf32>
    %436 = arith.addf %434, %435 : vector<8x64xf32>
    %c0_248 = arith.constant 0 : index
    %c0_249 = arith.constant 0 : index
    %c0_250 = arith.constant 0 : index
    %437 = vector.load %arg32[%c0_248, %c0_249, %c0_250] : memref<1x8x64xf32, #tpu.memory_space<vmem>>, vector<1x8x64xf32>
    %438 = vector.shape_cast %437 : vector<1x8x64xf32> to vector<8x64xf32>
    %439 = vector.shape_cast %436 : vector<8x64xf32> to vector<1x8x64xf32>
    tpu.vector_store %arg32[%c0_248, %c0_249, %c0_250], %439 {strides = array<i32>} : memref<1x8x64xf32, #tpu.memory_space<vmem>>, vector<1x8x64xf32>,
    return
  }
  func.func @transform_0(%arg0: i32) -> (i32, i32, i32) {
    %c0_i32 = arith.constant 0 : i32
    %c0_i32_0 = arith.constant 0 : i32
    %c0_i32_1 = arith.constant 0 : i32
    return %arg0, %c0_i32, %c0_i32_0 : i32, i32, i32
  }
  func.func @transform_1(%arg0: i32) -> (i32, i32) {
    %c0_i32 = arith.constant 0 : i32
    %c0_i32_0 = arith.constant 0 : i32
    %c0_i32_1 = arith.constant 0 : i32
    return %c0_i32, %c0_i32_0 : i32, i32
  }
  func.func @transform_2(%arg0: i32) -> (i32, i32, i32) {
    %c0_i32 = arith.constant 0 : i32
    %c0_i32_0 = arith.constant 0 : i32
    %c0_i32_1 = arith.constant 0 : i32
    return %arg0, %c0_i32, %c0_i32_0 : i32, i32, i32
  }
  func.func @transform_3(%arg0: i32) -> (i32, i32) {
    %c0_i32 = arith.constant 0 : i32
    %c0_i32_0 = arith.constant 0 : i32
    %c0_i32_1 = arith.constant 0 : i32
    return %c0_i32, %c0_i32_0 : i32, i32
  }
  func.func @transform_4(%arg0: i32) -> (i32, i32) {
    %c0_i32 = arith.constant 0 : i32
    %c0_i32_0 = arith.constant 0 : i32
    %c0_i32_1 = arith.constant 0 : i32
    return %c0_i32, %c0_i32_0 : i32, i32
  }
  func.func @transform_5(%arg0: i32) -> (i32, i32) {
    %c0_i32 = arith.constant 0 : i32
    %c0_i32_0 = arith.constant 0 : i32
    %c0_i32_1 = arith.constant 0 : i32
    return %c0_i32, %c0_i32_0 : i32, i32
  }
  func.func @transform_6(%arg0: i32) -> (i32, i32) {
    %c0_i32 = arith.constant 0 : i32
    %c0_i32_0 = arith.constant 0 : i32
    %c0_i32_1 = arith.constant 0 : i32
    return %c0_i32, %c0_i32_0 : i32, i32
  }
  func.func @transform_7(%arg0: i32) -> (i32, i32) {
    %c0_i32 = arith.constant 0 : i32
    %c0_i32_0 = arith.constant 0 : i32
    %c0_i32_1 = arith.constant 0 : i32
    return %c0_i32, %c0_i32_0 : i32, i32
  }
  func.func @transform_8(%arg0: i32) -> (i32, i32) {
    %c0_i32 = arith.constant 0 : i32
    %c0_i32_0 = arith.constant 0 : i32
    %c0_i32_1 = arith.constant 0 : i32
    return %c0_i32, %c0_i32_0 : i32, i32
  }
  func.func @transform_9(%arg0: i32) -> (i32, i32) {
    %c0_i32 = arith.constant 0 : i32
    %c0_i32_0 = arith.constant 0 : i32
    %c0_i32_1 = arith.constant 0 : i32
    return %c0_i32, %c0_i32_0 : i32, i32
  }
  func.func @transform_10(%arg0: i32) -> (i32, i32) {
    %c0_i32 = arith.constant 0 : i32
    %c0_i32_0 = arith.constant 0 : i32
    %c0_i32_1 = arith.constant 0 : i32
    return %c0_i32, %c0_i32_0 : i32, i32
  }
  func.func @transform_11(%arg0: i32) -> (i32, i32) {
    %c0_i32 = arith.constant 0 : i32
    %c0_i32_0 = arith.constant 0 : i32
    %c0_i32_1 = arith.constant 0 : i32
    return %c0_i32, %c0_i32_0 : i32, i32
  }
  func.func @transform_12(%arg0: i32) -> (i32, i32) {
    %c0_i32 = arith.constant 0 : i32
    %c0_i32_0 = arith.constant 0 : i32
    %c0_i32_1 = arith.constant 0 : i32
    return %c0_i32, %c0_i32_0 : i32, i32
  }
  func.func @transform_13(%arg0: i32) -> (i32, i32) {
    %c0_i32 = arith.constant 0 : i32
    %c0_i32_0 = arith.constant 0 : i32
    %c0_i32_1 = arith.constant 0 : i32
    return %c0_i32, %c0_i32_0 : i32, i32
  }
  func.func @transform_14(%arg0: i32) -> (i32, i32) {
    %c0_i32 = arith.constant 0 : i32
    %c0_i32_0 = arith.constant 0 : i32
    %c0_i32_1 = arith.constant 0 : i32
    return %c0_i32, %c0_i32_0 : i32, i32
  }
  func.func @transform_15(%arg0: i32) -> (i32, i32) {
    %c0_i32 = arith.constant 0 : i32
    %c0_i32_0 = arith.constant 0 : i32
    %c0_i32_1 = arith.constant 0 : i32
    return %c0_i32, %c0_i32_0 : i32, i32
  }
  func.func @transform_16(%arg0: i32) -> (i32, i32) {
    %c0_i32 = arith.constant 0 : i32
    %c0_i32_0 = arith.constant 0 : i32
    %c0_i32_1 = arith.constant 0 : i32
    return %c0_i32, %c0_i32_0 : i32, i32
  }
  func.func @transform_17(%arg0: i32) -> (i32, i32) {
    %c0_i32 = arith.constant 0 : i32
    %c0_i32_0 = arith.constant 0 : i32
    %c0_i32_1 = arith.constant 0 : i32
    return %c0_i32, %c0_i32_0 : i32, i32
  }
  func.func @transform_18(%arg0: i32) -> (i32, i32) {
    %c0_i32 = arith.constant 0 : i32
    %c0_i32_0 = arith.constant 0 : i32
    %c0_i32_1 = arith.constant 0 : i32
    return %c0_i32, %c0_i32_0 : i32, i32
  }
  func.func @transform_19(%arg0: i32) -> (i32, i32) {
    %c0_i32 = arith.constant 0 : i32
    %c0_i32_0 = arith.constant 0 : i32
    %c0_i32_1 = arith.constant 0 : i32
    return %c0_i32, %c0_i32_0 : i32, i32
  }
  func.func @transform_20(%arg0: i32) -> (i32, i32) {
    %c0_i32 = arith.constant 0 : i32
    %c0_i32_0 = arith.constant 0 : i32
    %c0_i32_1 = arith.constant 0 : i32
    return %c0_i32, %c0_i32_0 : i32, i32
  }
  func.func @transform_21(%arg0: i32) -> (i32, i32) {
    %c0_i32 = arith.constant 0 : i32
    %c0_i32_0 = arith.constant 0 : i32
    %c0_i32_1 = arith.constant 0 : i32
    return %c0_i32, %c0_i32_0 : i32, i32
  }
  func.func @transform_22(%arg0: i32) -> (i32, i32) {
    %c0_i32 = arith.constant 0 : i32
    %c0_i32_0 = arith.constant 0 : i32
    %c0_i32_1 = arith.constant 0 : i32
    return %c0_i32, %c0_i32_0 : i32, i32
  }
  func.func @transform_23(%arg0: i32) -> (i32, i32) {
    %c0_i32 = arith.constant 0 : i32
    %c0_i32_0 = arith.constant 0 : i32
    %c0_i32_1 = arith.constant 0 : i32
    return %c0_i32, %c0_i32_0 : i32, i32
  }
  func.func @transform_24(%arg0: i32) -> (i32, i32) {
    %c0_i32 = arith.constant 0 : i32
    %c0_i32_0 = arith.constant 0 : i32
    %c0_i32_1 = arith.constant 0 : i32
    return %c0_i32, %c0_i32_0 : i32, i32
  }
  func.func @transform_25(%arg0: i32) -> (i32, i32) {
    %c0_i32 = arith.constant 0 : i32
    %c0_i32_0 = arith.constant 0 : i32
    %c0_i32_1 = arith.constant 0 : i32
    return %c0_i32, %c0_i32_0 : i32, i32
  }
  func.func @transform_26(%arg0: i32) -> (i32, i32) {
    %c0_i32 = arith.constant 0 : i32
    %c0_i32_0 = arith.constant 0 : i32
    %c0_i32_1 = arith.constant 0 : i32
    return %c0_i32, %c0_i32_0 : i32, i32
  }
  func.func @transform_27(%arg0: i32) -> (i32, i32) {
    %c0_i32 = arith.constant 0 : i32
    %c0_i32_0 = arith.constant 0 : i32
    %c0_i32_1 = arith.constant 0 : i32
    return %c0_i32, %c0_i32_0 : i32, i32
  }
  func.func @transform_28(%arg0: i32) -> (i32, i32) {
    %c0_i32 = arith.constant 0 : i32
    %c0_i32_0 = arith.constant 0 : i32
    %c0_i32_1 = arith.constant 0 : i32
    return %c0_i32, %c0_i32_0 : i32, i32
  }
  func.func @transform_29(%arg0: i32) -> (i32, i32) {
    %c0_i32 = arith.constant 0 : i32
    %c0_i32_0 = arith.constant 0 : i32
    %c0_i32_1 = arith.constant 0 : i32
    return %c0_i32, %c0_i32_0 : i32, i32
  }
  func.func @transform_30(%arg0: i32) -> (i32, i32) {
    %c0_i32 = arith.constant 0 : i32
    %c0_i32_0 = arith.constant 0 : i32
    %c0_i32_1 = arith.constant 0 : i32
    return %c0_i32, %c0_i32_0 : i32, i32
  }
  func.func @transform_31(%arg0: i32) -> (i32, i32, i32) {
    %c0_i32 = arith.constant 0 : i32
    %c0_i32_0 = arith.constant 0 : i32
    %c0_i32_1 = arith.constant 0 : i32
    return %arg0, %c0_i32, %c0_i32_0 : i32, i32, i32
  }
}

</mosaic_0001>

<bundles_post_ra>
// kernel: transformer_forward.1
= control target key start
LH: loop header
LB: loop body
LE: loop exit
PB: predicated region body
PF: predicated region fallthrough
CT: control target
= control target key end

     0   :  { %s11269_s6 = smov 1   ;;  %s11270_s10 = smov 2   ;;  %s12634_s0 = inlined_call_operand.smem [shape: u32[32], index: -1, kind: input, shape index: {}] }
   0x1   :  { %s11311_s5 = sld [smem:[%s12634_s0]]   ;;  %s11271_s14 = smov 3  }
   0x2   :  { %s11316_s9 = sld [smem:[%s12634_s0 + %s11269_s6]]   ;;  %s11272_s18 = smov 4  }
   0x3   :  { %s11321_s13 = sld [smem:[%s12634_s0 + %s11270_s10]]   ;;  %s11273_s22 = smov 5  }
   0x4   :  { %s11326_s17 = sld [smem:[%s12634_s0 + %s11271_s14]]   ;;  %s11274_s26 = smov 6  }
   0x5   :  { %s11331_s21 = sld [smem:[%s12634_s0 + %s11272_s18]]   ;;  %s11275_s30 = smov 7  }
   0x6   :  { %s11336_s25 = sld [smem:[%s12634_s0 + %s11273_s22]]   ;;  %s11276_s4 = smov 8  }
   0x7   :  { %s11341_s29 = sld [smem:[%s12634_s0 + %s11274_s26]]   ;;  %s11277_s10 = smov 9  }
   0x8   :  { %s11346_s3 = sld [smem:[%s12634_s0 + %s11275_s30]]   ;;  %s11278_s15 = smov 10  }
   0x9   :  { %s11351_s8 = sld [smem:[%s12634_s0 + %s11276_s4]]   ;;  %s11279_s20 = smov 11  }
   0xa   :  { %s11356_s14 = sld [smem:[%s12634_s0 + %s11277_s10]]   ;;  %s11280_s26 = smov 12  }
   0xb   :  { %s11361_s19 = sld [smem:[%s12634_s0 + %s11278_s15]]   ;;  %s11281_s1 = smov 13  }
   0xc   :  { %s11366_s24 = sld [smem:[%s12634_s0 + %s11279_s20]]   ;;  %s11282_s7 = smov 14  }
   0xd   :  { %s11371_s30 = sld [smem:[%s12634_s0 + %s11280_s26]]   ;;  %s11283_s15 = smov 15  }
   0xe   :  { %s11376_s6 = sld [smem:[%s12634_s0 + %s11281_s1]]   ;;  %s11284_s22 = smov 16  }
   0xf   :  { %s11381_s12 = sld [smem:[%s12634_s0 + %s11282_s7]]   ;;  %s11285_s28 = smov 17  }
  0x10   :  { %s11386_s20 = sld [smem:[%s12634_s0 + %s11283_s15]]   ;;  %s11286_s7 = smov 18  }
  0x11   :  { %s11391_s27 = sld [smem:[%s12634_s0 + %s11284_s22]]   ;;  %s11287_s15 = smov 19  }
  0x12   :  { %s11396_s4 = sld [smem:[%s12634_s0 + %s11285_s28]]   ;;  %s11288_s22 = smov 20  }
  0x13   :  { %s11289_s28 = smov 21  }
  0x14   :  { %12641 = sst [smem:[#allocation2_spill]] %s11376_s6 }
  0x15   :  { %12642 = sst [smem:[#allocation3_spill]] %s11381_s12 }
  0x16   :  { %s11401_s12 = sld [smem:[%s12634_s0 + %s11286_s7]]   ;;  %s11290_s7 = smov 22  }
  0x17   :  { %12643 = sst [smem:[#allocation4_spill]] %s11391_s27 }
  0x18   :  { %12644 = sst [smem:[#allocation5_spill]] %s11396_s4 }
  0x19   :  { %s11406_s6 = sld [smem:[%s12634_s0 + %s11287_s15]]   ;;  %s11291_s15 = smov 23  }
  0x1a   :  { %s11411_s27 = sld [smem:[%s12634_s0 + %s11288_s22]]   ;;  %s11292_s22 = smov 24  }
  0x1b   :  { %s11416_s4 = sld [smem:[%s12634_s0 + %s11289_s28]]   ;;  %s11293_s28 = smov 25  }
  0x1c   :  { %12645 = sst [smem:[#allocation6_spill]] %s11401_s12 }
  0x1d   :  { %s11421_s12 = sld [smem:[%s12634_s0 + %s11290_s7]]   ;;  %s11294_s7 = smov 26  }
  0x1f   :  { %12646 = sst [smem:[#allocation7_spill]] %s11406_s6 }
  0x20   :  { %12647 = sst [smem:[#allocation8_spill]] %s11411_s27 }
  0x21   :  { %12648 = sst [smem:[#allocation9_spill]] %s11416_s4 }
  0x22   :  { %s11426_s6 = sld [smem:[%s12634_s0 + %s11291_s15]]   ;;  %s11295_s15 = smov 27  }
  0x23   :  { %12649 = sst [smem:[#allocation10_spill]] %s11421_s12 }
  0x24   :  { %s11431_s27 = sld [smem:[%s12634_s0 + %s11292_s22]]   ;;  %s11296_s22 = smov 28  }
  0x25   :  { %s11436_s4 = sld [smem:[%s12634_s0 + %s11293_s28]]   ;;  %s11297_s28 = smov 29  }
  0x26   :  { %s11441_s12 = sld [smem:[%s12634_s0 + %s11294_s7]]   ;;  %s11298_s7 = smov 30  }
  0x28   :  { %12650 = sst [smem:[#allocation11_spill]] %s11426_s6 }
  0x29   :  { %s11446_s6 = sld [smem:[%s12634_s0 + %s11295_s15]]   ;;  %s11299_s15 = smov 31  }
  0x2a   :  { %12651 = sst [smem:[#allocation12_spill]] %s11431_s27 }
  0x2b   :  { %12652 = sst [smem:[#allocation13_spill]] %s11436_s4 }
  0x2c   :  { %12653 = sst [smem:[#allocation14_spill]] %s11441_s12 }
  0x2d   :  { %s11451_s27 = sld [smem:[%s12634_s0 + %s11296_s22]]   ;;  %s11468_s22 = smov 0  }
  0x2e   :  { %s11456_s4 = sld [smem:[%s12634_s0 + %s11297_s28]]  }
  0x2f   :  { %12654 = sst [smem:[#allocation15_spill]] %s11446_s6 }
  0x30   :  { %s11461_s12 = sld [smem:[%s12634_s0 + %s11298_s7]]  }
  0x31   :  { %s11466_s6 = sld [smem:[%s12634_s0 + %s11299_s15]]  }
  0x32 LB: > { %s9648_s23 = sadd.s32 4294967295, %s11267_s22   ;;  %p9652_p0 = scmp.ge.s32.totalorder %s11267_s22, 1  ;;  %s11267_s22 = sphi %s11468_s22, %s73_s22  }
  0x33   : > { %p876_p1 = scmp.lt.s32.totalorder %s11267_s22, 3 }
  0x35   : > { %p877_p2 = pnand %p9652_p0, %p876_p1 }
  0x36   : > { %vm979_vm0 = vcmask (!%p877_p2), 261120   ;;  %v1056_v0 = vld [vmem:[%s11326_s17 + $0x20] sm:$0xff] (!%p877_p2)  ;;  %p957_p3 = scmp.lt.s32.totalorder (!%p877_p2), %s9648_s23, 1  ;;  %v11300_v2 = vmov (!%p877_p2), 0.0   ;;  %vm11301_vm1 = vmmov (!%p877_p2), 0   ;;  %vm1214_vm2 = vcmask (!%p877_p2), 64512  }
  0x37   : > { %880 = sbr.rel (%p877_p2) target bundleno = 10833 (0x2a51), region = 144  ;;  %v973_v1 = vld [vmem:[%s11326_s17] sm:$0xff] (!%p877_p2)  ;;  %10520 = vmatprep.subr.mxu1 (!%p877_p2), %v11300_v2  ;;  %10515 = vmatprep.subr.mxu0 (!%p877_p2), %v11300_v2  ;;  %v9661_v27 = vld [vmem:[%s11331_s21 + $0x8] ss:$0 sm:$0xff] (!%p877_p2)  ;;  %v9674_v57 = vld [vmem:[%s11331_s21 + $0x9] ss:$0 sm:$0xff] (!%p877_p2) }
  0x38   : > { %10521 = vmatpush3.xpose.msk.msra.mxu1 (!%p877_p2), %vm979_vm0, %v1056_v0  ;;  %10516 = vmatpush3.xpose.msk.msra.mxu0 (!%p877_p2), %vm979_vm0, %v973_v1  ;;  %v970_v3 = vld [vmem:[%s11316_s9] sm:$0xff] (!%p877_p2)  ;;  %v1384_v30 = vld [vmem:[%s11326_s17 + $0x8] sm:$0xff] (!%p877_p2)  ;;  %v2009_v1 = vld [vmem:[%s11326_s17 + $0x30] sm:$0xff] (!%p877_p2)  ;;  %s12655_s1 = sld [smem:[#allocation2_spill]] (!%p877_p2)  ;;  %s12656_s2 = sld [smem:[#allocation3_spill]] (!%p877_p2)  ;;  %vm9525_vm4 = vcmask (!%p877_p2), 523264  }
  0x39   : > { %10522 = vmatprep.mubr.msk.f32.mxu1 (!%p877_p2), %vm11301_vm1, %v11300_v2  ;;  %10517 = vmatprep.mubr.msk.f32.mxu0 (!%p877_p2), %vm11301_vm1, %v11300_v2  ;;  %v9658_v6 = vld [vmem:[%s11331_s21 + $0x4] ss:$0 sm:$0xff] (!%p877_p2)  ;;  %v9655_v7 = vld [vmem:[%s11331_s21] ss:$0 sm:$0xff] (!%p877_p2)  ;;  %v1463_v34 = vld [vmem:[%s11326_s17 + $0x28] sm:$0xff] (!%p877_p2)  ;;  %s12657_s7 = sld [smem:[#allocation4_spill]] (!%p877_p2) }
  0x3a   : > { %10530 = vmatprep.subr.mxu1 (!%p877_p2), %v11300_v2  ;;  %10525 = vmatprep.subr.mxu0 (!%p877_p2), %v11300_v2  ;;  %v1135_v14 = vld [vmem:[%s11326_s17 + $0x40] sm:$0xff] (!%p877_p2)  ;;  %v1542_v45 = vld [vmem:[%s11326_s17 + $0x48] sm:$0xff] (!%p877_p2)  ;;  %s12658_s10 = sld [smem:[#allocation5_spill]] (!%p877_p2)  ;;  %s12659_s11 = sld [smem:[#allocation6_spill]] (!%p877_p2)  ;;  %vm12600_vm3 = vmpackc.low (!%p877_p2), %vm979_vm0, %vm979_vm0 }
  0x3b   : > { %v9671_v39 = vld [vmem:[%s11331_s21 + $0x5] ss:$0 sm:$0xff] (!%p877_p2)  ;;  %v9668_v40 = vld [vmem:[%s11331_s21 + $0x1] ss:$0 sm:$0xff] (!%p877_p2)  ;;  %v1783_v60 = vld [vmem:[%s11336_s25 + $0x8] sm:$0xff] (!%p877_p2)  ;;  %s12660_s15 = sld [smem:[#allocation7_spill]] (!%p877_p2) }
  0x3c   : > { %v1383_v0 = vld [vmem:[%s11336_s25] sm:$0xff] (!%p877_p2)  ;;  %s12661_s16 = sld [smem:[#allocation11_spill]] (!%p877_p2)  ;;  %s12662_s18 = sld [smem:[#allocation12_spill]] (!%p877_p2) }
  0x3e   : > { %s12672_s23 = smov (!%p957_p3, %s9648_s23), 1 }
  0x3f   : > { %s9653_s0 = sshll.u32 %s12672_s23, 3  ;;  %s11521_s28 = scalar_lea.vmem %s11321_s13, %s12672_s23 }
  0x40   : > { %s960_s26 = scalar_lea.vmem %s11311_s5, %s9653_s0  ;;  %v11524_v16 = vld [vmem:[%s11521_s28] ss:$0 sm:$0xff] }
  0x41   : > { %v969_v4 = vld [vmem:[%s960_s26] sm:$0xff]  ;;  %s12663_s26 = sld [smem:[#allocation9_spill]] }
  0x42   : > { %v11495_v5 = vadd.f32 %v970_v3, %v969_v4  ;;  %v1930_v3 = vld [vmem:[%s11326_s17 + $0x10] sm:$0xff] }
  0x44   : > { %10523 = vmatmul.mubr.msk.f32.vlgmr.msra.gmra.mrb[0].mxu1 %vm979_vm0, %v11495_v5  ;;  %10518 = vmatmul.mubr.msk.f32.vlgmr.msra.gmra.mrb[0].mxu0 %vm979_vm0, %v11495_v5 }
  0x45   : > { %10532 = vmatprep.mubr.msk.f32.mxu1 %vm11301_vm1, %v11300_v2  ;;  %10527 = vmatprep.mubr.msk.f32.mxu0 %vm11301_vm1, %v11300_v2 }
  0x46   : > { %10526 = vmatpush3.xpose.msk.msra.mxu0 %vm979_vm0, %v1135_v14 }
  0x47   : > { %10535 = vmatprep.subr.mxu0 %v11300_v2 }
  0x49   : > { %10528 = vmatmul.mubr.msk.f32.vlgmr.msra.gmra.mrb[2].mxu0 %vm979_vm0, %v11495_v5 }
  0x4a   : > { %10537 = vmatprep.mubr.msk.f32.mxu0 %vm11301_vm1, %v11300_v2 }
 0x117   : > { %v1131_v8 = vpop.f32.mrb[0].mxu1  ;;  %v1052_v9 = vpop.f32.mrb[0].mxu0 }
 0x118   : > { %v1132_v10 = vadd.f32 %v9658_v6, %v1131_v8  ;;  %v10524_v11 = vpop.f32.mrb[1].mxu1  ;;  %v10519_v12 = vpop.f32.mrb[1].mxu0  ;;  %v1053_v13 = vadd.f32 %v9655_v7, %v1052_v9 }
 0x11a   : > { %10531 = vmatpush3.xpose.msk.msra.mxu1 %vm1214_vm2, %v1132_v10  ;;  %v9685_v10 = vld [vmem:[%s11331_s21 + $0x6] ss:$0 sm:$0xff] }
 0x11b   : > { %10540 = vmatprep.subr.mxu1 %v11300_v2 }
 0x11c   : > { %v1210_v26 = vpop.f32.mrb[2].mxu0 }
 0x11d   : > { %10533 = vmatmul.mubr.msk.f32.vlgmr.msra.gmra.mrb[2].mxu1 %vm1214_vm2, %v1053_v13  ;;  %v10529_v28 = vpop.f32.mrb[3].mxu0  ;;  %v1211_v29 = vadd.f32 %v9661_v27, %v1210_v26 }
 0x11e   : > { %10542 = vmatprep.mubr.msk.f32.mxu1 %vm11301_vm1, %v11300_v2  ;;  %10541 = vmatpush3.xpose.msk.msra.mxu1 %vm979_vm0, %v1384_v30 }
 0x11f   : > { %10536 = vmatpush3.msra.mxu0 %v1211_v29  ;;  %10550 = vmatprep.subr.mxu1 %v11300_v2 }
 0x120   : > { %10545 = vmatprep.subr.mxu0 %v11300_v2 }
 0x121   : > { %10543 = vmatmul.mubr.msk.f32.vlgmr.msra.gmra.mrb[4].mxu1 %vm979_vm0, %v11495_v5 }
 0x122   : > { %10552 = vmatprep.mubr.msk.f32.mxu1 %vm11301_vm1, %v11300_v2  ;;  %10551 = vmatpush3.xpose.msk.msra.mxu1 %vm979_vm0, %v1542_v45 }
 0x123   : > { %10560 = vmatprep.subr.mxu1 %v11300_v2 }
 0x125   : > { %10553 = vmatmul.mubr.msk.f32.vlgmr.msra.gmra.mrb[6].mxu1 %vm979_vm0, %v11495_v5 }
 0x126   : > { %10562 = vmatprep.mubr.msk.f32.mxu1 %vm11301_vm1, %v11300_v2 }
 0x1f0   : > { %v1287_v15 = vpop.f32.mrb[2].mxu1 }
 0x1f1   : > { %v1291_v17 = vmul.f32 0.35355338, %v1287_v15  ;;  %v10534_v18 = vpop.f32.mrb[3].mxu1 }
 0x1f3   : > { %v1298_v19 = vadd.f32 %v11524_v16, %v1291_v17  ;;  %v9682_v17 = vld [vmem:[%s11331_s21 + $0x2] ss:$0 sm:$0xff] }
 0x1f4   : > { %v1459_v35 = vpop.f32.mrb[4].mxu1 }
 0x1f5   : > { %v1299_v20 = vsel %vm1214_vm2, %v1298_v19, -inf  ;;  %v10544_v36 = vpop.f32.mrb[5].mxu1  ;;  %v1460_v44 = vadd.f32 %v9668_v40, %v1459_v35  ;;  %v2404_v40 = vld [vmem:[%s11326_s17 + $0x18] sm:$0xff] }
 0x1f6   : > { %1300 = vmax.xlane.f32.xlu0 %v1299_v20  ;;  %v2329_v36 = vld [vmem:[%s11336_s25 + $0x10] sm:$0xff] }
 0x1f8   : > { %v1617_v56 = vpop.f32.mrb[6].mxu1 }
 0x1f9   : > { %v10554_v58 = vpop.f32.mrb[7].mxu1  ;;  %v1618_v59 = vadd.f32 %v9674_v57, %v1617_v56 }
 0x1fb   : > { %10561 = vmatpush3.msra.mxu1 %v1618_v59 }
 0x1fc   : > { %10570 = vmatprep.subr.mxu1 %v11300_v2 }
 0x283   : > { %v1301_v21 = vpop.xlane.xlu0 %1300 }
 0x284   : > { %v1302_v22 = vsub.f32 %v1298_v19, %v1301_v21  ;;  %v2088_v21 = vld [vmem:[%s11326_s17 + $0x50] sm:$0xff] }
 0x286   : > { %v1303_v23 = vmul.f32 1.442695, %v1302_v22 }
 0x288   : > { %11216 = vpow2.f32 %v1303_v23 }
 0x292   : > { %v11217_v24 = vpop.eup %11216 }
 0x293   : > { %v1305_v25 = vsel %vm1214_vm2, %v11217_v24, 0.0 }
 0x294   : > { %1306 = vadd.xlane.f32.xlu0 %v1305_v25 }
 0x321   : > { %v1307_v31 = vpop.xlane.xlu0 %1306 }
 0x322   : > { %11218 = vrcp.f32 %v1307_v31 }
 0x32c   : > { %v11219_v32 = vpop.eup %11218 }
 0x32d   : > { %v1309_v33 = vmul.f32 %v11219_v32, %v11217_v24 }
 0x32f   : > { %10538 = vmatmul.mubr.msk.f32.vlgmr.msra.gmra.mrb[4].mxu0 %vm1214_vm2, %v1309_v33  ;;  %v9688_v33 = vld [vmem:[%s11331_s21 + $0xa] ss:$0 sm:$0xff] }
 0x330   : > { %10546 = vmatpush3.xpose.msk.msra.mxu0 %vm979_vm0, %v1463_v34  ;;  %10547 = vmatprep.mubr.msk.f32.mxu0 %vm11301_vm1, %v11300_v2 }
 0x331   : > { %10555 = vmatprep.subr.mxu0 %v11300_v2 }
 0x333   : > { %10548 = vmatmul.mubr.msk.f32.vlgmr.msra.gmra.mrb[6].mxu0 %vm979_vm0, %v11495_v5 }
 0x334   : > { %10557 = vmatprep.mubr.msk.f32.mxu0 %vm11301_vm1, %v11300_v2 }
 0x402   : > { %v1379_v37 = vpop.f32.mrb[4].mxu0 }
 0x403   : > { %v10539_v38 = vpop.f32.mrb[5].mxu0 }
 0x406   : > { %v1538_v41 = vpop.f32.mrb[6].mxu0 }
 0x407   : > { %v1539_v42 = vadd.f32 %v9671_v39, %v1538_v41  ;;  %v10549_v43 = vpop.f32.mrb[7].mxu0  ;;  %v2483_v41 = vld [vmem:[%s11326_s17 + $0x38] sm:$0xff] }
 0x409   : > { %10556 = vmatpush3.xpose.msk.msra.mxu0 %vm1214_vm2, %v1539_v42 }
 0x40a   : > { %10565 = vmatprep.subr.mxu0 %v11300_v2 }
 0x40c   : > { %10558 = vmatmul.mubr.msk.f32.vlgmr.msra.gmra.mrb[8].mxu0 %vm1214_vm2, %v1460_v44 }
 0x40d   : > { %10567 = vmatprep.mubr.msk.f32.mxu0 %vm11301_vm1, %v11300_v2  ;;  %10566 = vmatpush3.msra.mxu0 %v1783_v60 }
 0x40e   : > { %10575 = vmatprep.subr.mxu0 %v11300_v2 }
 0x4df   : > { %v1693_v46 = vpop.f32.mrb[8].mxu0 }
 0x4e0   : > { %v1697_v47 = vmul.f32 0.35355338, %v1693_v46  ;;  %v10559_v48 = vpop.f32.mrb[9].mxu0 }
 0x4e2   : > { %v1698_v49 = vadd.f32 %v11524_v16, %v1697_v47 }
 0x4e4   : > { %v1699_v50 = vsel %vm1214_vm2, %v1698_v49, -inf }
 0x4e5   : > { %1700 = vmax.xlane.f32.xlu1 %v1699_v50  ;;  %v9695_v50 = vld [vmem:[%s11331_s21 + $0x3] ss:$0 sm:$0xff] }
 0x572   : > { %v1701_v51 = vpop.xlane.xlu1 %1700 }
 0x573   : > { %v1702_v52 = vsub.f32 %v1698_v49, %v1701_v51  ;;  %v9698_v49 = vld [vmem:[%s11331_s21 + $0x7] ss:$0 sm:$0xff] }
 0x575   : > { %v1703_v53 = vmul.f32 1.442695, %v1702_v52 }
 0x577   : > { %11220 = vpow2.f32 %v1703_v53 }
 0x581   : > { %v11221_v54 = vpop.eup %11220 }
 0x582   : > { %v1705_v55 = vsel %vm1214_vm2, %v11221_v54, 0.0 }
 0x583   : > { %1706 = vadd.xlane.f32.xlu1 %v1705_v55  ;;  %v2562_v55 = vld [vmem:[%s11326_s17 + $0x58] sm:$0xff] }
 0x610   : > { %v1707_v61 = vpop.xlane.xlu1 %1706 }
 0x611   : > { %11222 = vrcp.f32 %v1707_v61 }
 0x61b   : > { %v11223_v62 = vpop.eup %11222 }
 0x61c   : > { %v1709_v63 = vmul.f32 %v11223_v62, %v11221_v54 }
 0x61e   : > { %10563 = vmatmul.mubr.msk.f32.vlgmr.msra.gmra.mrb[8].mxu1 %vm1214_vm2, %v1709_v63 }
 0x61f   : > { %10571 = vmatpush3.msra.mxu1 %v1383_v0  ;;  %10572 = vmatprep.mubr.msk.f32.mxu1 %vm11301_vm1, %v11300_v2 }
 0x620   : > { %10580 = vmatprep.subr.mxu1 %v11300_v2 }
 0x622   : > { %10573 = vmatmul.mubr.msk.f32.vlgmr.msra.gmra.mrb[10].mxu1 %vm1214_vm2, %v1379_v37 }
 0x623   : > { %10582 = vmatprep.mubr.msk.f32.mxu1 %vm11301_vm1, %v11300_v2 }
 0x626   : > { %10581 = vmatpush3.xpose.msk.msra.mxu1 %vm979_vm0, %v2009_v1 }
 0x627   : > { %10590 = vmatprep.subr.mxu1 %v11300_v2 }
 0x629   : > { %10583 = vmatmul.mubr.msk.f32.vlgmr.msra.gmra.mrb[12].mxu1 %vm979_vm0, %v11495_v5 }
 0x62a   : > { %10592 = vmatprep.mubr.msk.f32.mxu1 %vm11301_vm1, %v11300_v2 }
 0x6f1   : > { %v1779_v4 = vpop.f32.mrb[8].mxu1 }
 0x6f2   : > { %v10564_v6 = vpop.f32.mrb[9].mxu1  ;;  %10568 = vmatmul.mubr.msk.f32.vlgmr.msra.gmra.mrb[10].mxu0 %vm1214_vm2, %v1779_v4  ;;  %v9701_v4 = vld [vmem:[%s11331_s21 + $0xb] ss:$0 sm:$0xff] }
 0x6f3   : > { %10576 = vmatpush3.xpose.msk.msra.mxu0 %vm979_vm0, %v1930_v3  ;;  %10577 = vmatprep.mubr.msk.f32.mxu0 %vm11301_vm1, %v11300_v2 }
 0x6f4   : > { %10585 = vmatprep.subr.mxu0 %v11300_v2 }
 0x6f5   : > { %v1926_v7 = vpop.f32.mrb[10].mxu1 }
 0x6f6   : > { %v10574_v8 = vpop.f32.mrb[11].mxu1  ;;  %10578 = vmatmul.mubr.msk.f32.vlgmr.msra.gmra.mrb[12].mxu0 %vm979_vm0, %v11495_v5 }
 0x6f7   : > { %10587 = vmatprep.mubr.msk.f32.mxu0 %vm11301_vm1, %v11300_v2  ;;  %10586 = vmatpush3.xpose.msk.msra.mxu0 %vm979_vm0, %v2088_v21  ;;  %v2803_v8 = vld [vmem:[%s11336_s25 + $0x18] sm:$0xff]  ;;  %v10960_v21 = vld [vmem:[%s11346_s3 + $0x40] sm:$0xff]  }
 0x6f8   : > { %10595 = vmatprep.subr.mxu0 %v11300_v2 }
 0x6fa   : > { %10588 = vmatmul.mubr.msk.f32.vlgmr.msra.gmra.mrb[14].mxu0 %vm979_vm0, %v11495_v5 }
 0x6fb   : > { %10597 = vmatprep.mubr.msk.f32.mxu0 %vm11301_vm1, %v11300_v2 }
 0x6fc   : > { %v2084_v9 = vpop.f32.mrb[12].mxu1 }
 0x6fd   : > { %v10584_v11 = vpop.f32.mrb[13].mxu1  ;;  %v2085_v12 = vadd.f32 %v9685_v10, %v2084_v9 }
 0x6ff   : > { %10591 = vmatpush3.xpose.msk.msra.mxu1 %vm1214_vm2, %v2085_v12 }
 0x700   : > { %10600 = vmatprep.subr.mxu1 %v11300_v2 }
 0x7c5   : > { %v1853_v13 = vpop.f32.mrb[10].mxu0 }
 0x7c6   : > { %v1927_v14 = vadd.f32 %v1926_v7, %v1853_v13  ;;  %v10569_v15 = vpop.f32.mrb[11].mxu0 }
 0x7c9   : > { %v2005_v18 = vpop.f32.mrb[12].mxu0 }
 0x7ca   : > { %v2006_v19 = vadd.f32 %v9682_v17, %v2005_v18  ;;  %v10579_v20 = vpop.f32.mrb[13].mxu0 }
 0x7cc   : > { %10593 = vmatmul.mubr.msk.f32.vlgmr.msra.gmra.mrb[14].mxu1 %vm1214_vm2, %v2006_v19 }
 0x7cd   : > { %10602 = vmatprep.mubr.msk.f32.mxu1 %vm11301_vm1, %v11300_v2  ;;  %v2163_v32 = vpop.f32.mrb[14].mxu0  ;;  %10601 = vmatpush3.msra.mxu1 %v2329_v36 }
 0x7ce   : > { %v10589_v34 = vpop.f32.mrb[15].mxu0  ;;  %v2164_v35 = vadd.f32 %v9688_v33, %v2163_v32  ;;  %10610 = vmatprep.subr.mxu1 %v11300_v2  ;;  %v10969_v33 = vld [vmem:[%s11346_s3 + $0xd0] sm:$0xff]  }
 0x7cf   : > { %v10970_v34 = vld [vmem:[%s11346_s3 + $0x10] sm:$0xff]  }
 0x7d0   : > { %10596 = vmatpush3.msra.mxu0 %v2164_v35  ;;  %v10971_v35 = vld [vmem:[%s11346_s3 + $0x90] sm:$0xff]   ;;  %v3908_v36 = vsel %vm979_vm0, %v10970_v34, 0 }
 0x7d1   : > { %10605 = vmatprep.subr.mxu0 %v11300_v2  ;;  %v11002_v34 = vld [vmem:[%s11346_s3 + $0x110] sm:$0xff]  }
 0x89f   : > { %v2239_v22 = vpop.f32.mrb[14].mxu1 }
 0x8a0   : > { %v2243_v23 = vmul.f32 0.35355338, %v2239_v22  ;;  %v10594_v24 = vpop.f32.mrb[15].mxu1  ;;  %v10961_v22 = vld [vmem:[%s11346_s3 + $0xc0] sm:$0xff]  }
 0x8a1   : > { %v10963_v24 = vld [vmem:[%s11346_s3 + $0x80] sm:$0xff]  }
 0x8a2   : > { %v2244_v25 = vadd.f32 %v11524_v16, %v2243_v23  ;;  %v10962_v23 = vld [vmem:[%s11346_s3] sm:$0xff]  }
 0x8a4   : > { %v2245_v26 = vsel %vm1214_vm2, %v2244_v25, -inf }
 0x8a5   : > { %2246 = vmax.xlane.f32.xlu0 %v2245_v26  ;;  %v10965_v26 = vld [vmem:[%s11346_s3 + $0xc8] sm:$0xff]  }
 0x932   : > { %v2247_v27 = vpop.xlane.xlu0 %2246 }
 0x933   : > { %v2248_v28 = vsub.f32 %v2244_v25, %v2247_v27  ;;  %v10964_v25 = vld [vmem:[%s11346_s3 + $0x48] sm:$0xff]   ;;  %v3950_v27 = vsel %vm979_vm0, %v10963_v24, 0 }
 0x935   : > { %v2249_v29 = vmul.f32 1.442695, %v2248_v28  ;;  %v10966_v28 = vld [vmem:[%s11346_s3 + $0x8] sm:$0xff]  }
 0x937   : > { %11224 = vpow2.f32 %v2249_v29  ;;  %v10967_v29 = vld [vmem:[%s11346_s3 + $0x88] sm:$0xff]  }
 0x938   : > { %v3953_v32 = vsel %vm979_vm0, %v10967_v29, 0  ;;  %v10999_v29 = vld [vmem:[%s11346_s3 + $0x188] sm:$0xff]  }
 0x941   : > { %v11225_v30 = vpop.eup %11224 }
 0x942   : > { %v2251_v31 = vsel %vm1214_vm2, %v11225_v30, 0.0 }
 0x943   : > { %2252 = vadd.xlane.f32.xlu1 %v2251_v31  ;;  %v10968_v31 = vld [vmem:[%s11346_s3 + $0x50] sm:$0xff]  }
 0x9d0   : > { %v2253_v37 = vpop.xlane.xlu1 %2252 }
 0x9d1   : > { %11226 = vrcp.f32 %v2253_v37  ;;  %v10972_v37 = vld [vmem:[%s11346_s3 + $0x58] sm:$0xff]  }
 0x9db   : > { %v11227_v38 = vpop.eup %11226 }
 0x9dc   : > { %v2255_v39 = vmul.f32 %v11227_v38, %v11225_v30  ;;  %v3905_v30 = vsel %vm979_vm0, %v10966_v28, 0  ;;  %v3956_v38 = vsel %vm979_vm0, %v10971_v35, 0  ;;  %v10998_v28 = vld [vmem:[%s11346_s3 + $0x108] sm:$0xff]   ;;  %v11003_v35 = vld [vmem:[%s11346_s3 + $0x190] sm:$0xff]  }
 0x9de   : > { %10598 = vmatmul.mubr.msk.f32.vlgmr.msra.gmra.mrb[16].mxu0 %vm1214_vm2, %v2255_v39  ;;  %v10973_v39 = vld [vmem:[%s11346_s3 + $0xd8] sm:$0xff]  }
 0x9df   : > { %10607 = vmatprep.mubr.msk.f32.mxu0 %vm11301_vm1, %v11300_v2  ;;  %10606 = vmatpush3.xpose.msk.msra.mxu0 %vm979_vm0, %v2404_v40  ;;  %v10974_v40 = vld [vmem:[%s11346_s3 + $0x18] sm:$0xff]  }
 0x9e0   : > { %10615 = vmatprep.subr.mxu0 %v11300_v2 }
 0x9e2   : > { %10608 = vmatmul.mubr.msk.f32.vlgmr.msra.gmra.mrb[18].mxu0 %vm979_vm0, %v11495_v5 }
 0x9e3   : > { %10617 = vmatprep.mubr.msk.f32.mxu0 %vm11301_vm1, %v11300_v2  ;;  %10616 = vmatpush3.xpose.msk.msra.mxu0 %vm979_vm0, %v2562_v55 }
 0x9e4   : > { %10625 = vmatprep.subr.mxu0 %v11300_v2 }
 0x9e6   : > { %10618 = vmatmul.mubr.msk.f32.vlgmr.msra.gmra.mrb[20].mxu0 %vm979_vm0, %v11495_v5 }
 0x9e7   : > { %10627 = vmatprep.mubr.msk.f32.mxu0 %vm11301_vm1, %v11300_v2 }
 0xab1   : > { %v2325_v42 = vpop.f32.mrb[16].mxu0 }
 0xab2   : > { %v10599_v43 = vpop.f32.mrb[17].mxu0  ;;  %10603 = vmatmul.mubr.msk.f32.vlgmr.msra.gmra.mrb[16].mxu1 %vm1214_vm2, %v2325_v42  ;;  %v3911_v42 = vsel %vm979_vm0, %v10974_v40, 0  ;;  %v11006_v40 = vld [vmem:[%s11346_s3 + $0x118] sm:$0xff]  }
 0xab3   : > { %10611 = vmatpush3.xpose.msk.msra.mxu1 %vm979_vm0, %v2483_v41  ;;  %10612 = vmatprep.mubr.msk.f32.mxu1 %vm11301_vm1, %v11300_v2  ;;  %v10975_v41 = vld [vmem:[%s11346_s3 + $0x98] sm:$0xff]   ;;  %v10976_v43 = vld [vmem:[%s11346_s3 + $0x60] sm:$0xff]  }
 0xab4   : > { %10620 = vmatprep.subr.mxu1 %v11300_v2 }
 0xab5   : > { %v2479_v44 = vpop.f32.mrb[18].mxu0 }
 0xab6   : > { %10613 = vmatmul.mubr.msk.f32.vlgmr.msra.gmra.mrb[18].mxu1 %vm979_vm0, %v11495_v5  ;;  %v10609_v45 = vpop.f32.mrb[19].mxu0  ;;  %v2480_v54 = vadd.f32 %v9695_v50, %v2479_v44  ;;  %v3959_v44 = vsel %vm979_vm0, %v10975_v41, 0  ;;  %v11007_v41 = vld [vmem:[%s11346_s3 + $0x198] sm:$0xff]  }
 0xab7   : > { %10622 = vmatprep.mubr.msk.f32.mxu1 %vm11301_vm1, %v11300_v2  ;;  %v10977_v45 = vld [vmem:[%s11346_s3 + $0xe0] sm:$0xff]  }
 0xab9   : > { %v2637_v3 = vpop.f32.mrb[20].mxu0 }
 0xaba   : > { %v10619_v6 = vpop.f32.mrb[21].mxu0  ;;  %v2638_v7 = vadd.f32 %v9701_v4, %v2637_v3  ;;  %v10988_v4 = vld [vmem:[%s11346_s3 + $0x78] sm:$0xff]  }
 0xabb   : > { %v10989_v6 = vld [vmem:[%s11346_s3 + $0xf8] sm:$0xff]  }
 0xabc   : > { %10626 = vmatpush3.msra.mxu0 %v2638_v7  ;;  %v10990_v7 = vld [vmem:[%s11346_s3 + $0x38] sm:$0xff]  }
 0xabd   : > { %10790 = vmatprep.subr.msk.bf16.mxu0 %vm979_vm0, %v10960_v21  ;;  %v10994_v21 = vld [vmem:[%s11346_s3 + $0x100] sm:$0xff]  }
 0xb85   : > { %v2399_v46 = vpop.f32.mrb[16].mxu1 }
 0xb86   : > { %v2403_v47 = vadd.f32 %v2399_v46, %v1927_v14  ;;  %v10604_v48 = vpop.f32.mrb[17].mxu1  ;;  %v9708_v14 = vld [vmem:[%s11341_s29] ss:$0 sm:$0xff] }
 0xb87   : > { %v10978_v46 = vld [vmem:[%s11346_s3 + $0x20] sm:$0xff]  }
 0xb88   : > { %v3914_v48 = vsel %vm979_vm0, %v10978_v46, 0  ;;  %v11010_v46 = vld [vmem:[%s11346_s3 + $0x120] sm:$0xff]  }
 0xb89   : > { %v2558_v51 = vpop.f32.mrb[18].mxu1 }
 0xb8a   : > { %v2559_v52 = vadd.f32 %v9698_v49, %v2558_v51  ;;  %v10614_v53 = vpop.f32.mrb[19].mxu1  ;;  %v10980_v49 = vld [vmem:[%s11346_s3 + $0x68] sm:$0xff]  }
 0xb8b   : > { %v10981_v51 = vld [vmem:[%s11346_s3 + $0xe8] sm:$0xff]  }
 0xb8c   : > { %10621 = vmatpush3.xpose.msk.msra.mxu1 %vm1214_vm2, %v2559_v52 }
 0xb8d   : > { %10630 = vmatprep.subr.mxu1 %v11300_v2 }
 0xb8f   : > { %10623 = vmatmul.mubr.msk.f32.vlgmr.msra.gmra.mrb[20].mxu1 %vm1214_vm2, %v2480_v54 }
 0xb90   : > { %10632 = vmatprep.mubr.msk.f32.mxu1 %vm11301_vm1, %v11300_v2  ;;  %10631 = vmatpush3.msra.mxu1 %v2803_v8  ;;  %v10991_v8 = vld [vmem:[%s11346_s3 + $0xb8] sm:$0xff]  }
 0xb91   : > { %10798 = vmatprep.subr.msk.bf16.mxu1 %vm979_vm0, %v10961_v22  ;;  %v10995_v22 = vld [vmem:[%s11346_s3 + $0x180] sm:$0xff]  }
 0xc62   : > { %v2713_v56 = vpop.f32.mrb[20].mxu1 }
 0xc63   : > { %v2717_v57 = vmul.f32 0.35355338, %v2713_v56  ;;  %v10624_v58 = vpop.f32.mrb[21].mxu1 }
 0xc64   : > { %v10983_v58 = vld [vmem:[%s11346_s3 + $0xa8] sm:$0xff]  }
 0xc65   : > { %v2718_v59 = vadd.f32 %v11524_v16, %v2717_v57  ;;  %v10982_v57 = vld [vmem:[%s11346_s3 + $0x28] sm:$0xff]  }
 0xc67   : > { %v2719_v60 = vsel %vm1214_vm2, %v2718_v59, -inf }
 0xc68   : > { %2720 = vmax.xlane.f32.xlu0 %v2719_v60  ;;  %v3965_v60 = vsel %vm979_vm0, %v10983_v58, 0  ;;  %v11018_v58 = vld [vmem:[%s11346_s3 + $0x130] sm:$0xff]  }
 0xcf5   : > { %v2721_v61 = vpop.xlane.xlu0 %2720 }
 0xcf6   : > { %v2722_v62 = vsub.f32 %v2718_v59, %v2721_v61  ;;  %v3917_v59 = vsel %vm979_vm0, %v10982_v57, 0  ;;  %v10984_v61 = vld [vmem:[%s11346_s3 + $0x70] sm:$0xff]  }
 0xcf7   : > { %v11017_v57 = vld [vmem:[%s11346_s3 + $0x1f0] sm:$0xff]  }
 0xcf8   : > { %v2723_v63 = vmul.f32 1.442695, %v2722_v62  ;;  %v10985_v62 = vld [vmem:[%s11346_s3 + $0xf0] sm:$0xff]  }
 0xcfa   : > { %11228 = vpow2.f32 %v2723_v63  ;;  %v10986_v63 = vld [vmem:[%s11346_s3 + $0x30] sm:$0xff]  }
 0xd04   : > { %v11229_v0 = vpop.eup %11228 }
 0xd05   : > { %v2725_v1 = vsel %vm1214_vm2, %v11229_v0, 0.0 }
 0xd06   : > { %2726 = vadd.xlane.f32.xlu1 %v2725_v1  ;;  %v3920_v1 = vsel %vm979_vm0, %v10986_v63, 0  ;;  %v11021_v63 = vld [vmem:[%s11346_s3 + $0x1f8] sm:$0xff]  }
 0xd93   : > { %v2727_v16 = vpop.xlane.xlu1 %2726 }
 0xd94   : > { %11230 = vrcp.f32 %v2727_v16  ;;  %v3923_v16 = vsel %vm979_vm0, %v10990_v7, 0  ;;  %v11025_v7 = vld [vmem:[%s11346_s3 + $0x2c0] sm:$0xff]  }
 0xd9e   : > { %v11231_v9 = vpop.eup %11230 }
 0xd9f   : > { %v2729_v10 = vmul.f32 %v11231_v9, %v11229_v0  ;;  %v10987_v0 = vld [vmem:[%s11346_s3 + $0xb0] sm:$0xff]   ;;  %v3971_v9 = vsel %vm979_vm0, %v10991_v8, 0  ;;  %v11026_v8 = vld [vmem:[%s11346_s3 + $0x200] sm:$0xff]  }
 0xda0   : > { %v3968_v3 = vsel %vm979_vm0, %v10987_v0, 0  ;;  %v11022_v0 = vld [vmem:[%s11346_s3 + $0x138] sm:$0xff]  }
 0xda1   : > { %10628 = vmatmul.mubr.msk.f32.vlgmr.msra.gmra.mrb[22].mxu0 %vm1214_vm2, %v2729_v10  ;;  %v10992_v10 = vld [vmem:[%s11346_s3 + $0x140] sm:$0xff]  }
 0xe74   : > { %v2799_v11 = vpop.f32.mrb[22].mxu0 }
 0xe75   : > { %v10629_v12 = vpop.f32.mrb[23].mxu0  ;;  %10633 = vmatmul.mubr.msk.f32.vlgmr.msra.gmra.mrb[22].mxu1 %vm1214_vm2, %v2799_v11  ;;  %v10993_v11 = vld [vmem:[%s11346_s3 + $0x1c0] sm:$0xff]  }
 0xe76   : > { %10189 = vmatpush3.bf16.xpose.msra.mxu1 %v3950_v27  ;;  %v10997_v27 = vld [vmem:[%s11346_s3 + $0x1c8] sm:$0xff]  }
 0xe77   : > { %10799 = vmatprep.subr.msk.bf16.mxu1 %vm979_vm0, %v10965_v26  ;;  %v4046_v26 = vsel %vm979_vm0, %v10995_v22, 0 }
 0xe7e   : > { %10191 = vmatpush3.bf16.xpose.msra.mxu1 %v3953_v32  ;;  %v11000_v32 = vld [vmem:[%s11346_s3 + $0x150] sm:$0xff]  }
 0xe7f   : > { %10800 = vmatprep.subr.msk.bf16.mxu1 %vm979_vm0, %v10969_v33  ;;  %v11001_v33 = vld [vmem:[%s11346_s3 + $0x1d0] sm:$0xff]  }
 0xe86   : > { %10193 = vmatpush3.bf16.xpose.msra.mxu1 %v3956_v38  ;;  %v11004_v38 = vld [vmem:[%s11346_s3 + $0x158] sm:$0xff]  }
 0xe87   : > { %10801 = vmatprep.subr.msk.bf16.mxu1 %vm979_vm0, %v10973_v39  ;;  %v11005_v39 = vld [vmem:[%s11346_s3 + $0x1d8] sm:$0xff]  }
 0xe8e   : > { %10195 = vmatpush3.bf16.xpose.msra.mxu1 %v3959_v44  ;;  %v11008_v44 = vld [vmem:[%s11346_s3 + $0x160] sm:$0xff]  }
 0xe8f   : > { %10802 = vmatprep.subr.msk.bf16.mxu1 %vm979_vm0, %v10977_v45  ;;  %v11009_v45 = vld [vmem:[%s11346_s3 + $0x1e0] sm:$0xff]  }
 0xf48   : > { %v2873_v13 = vpop.f32.mrb[22].mxu1 }
 0xf49   : > { %v2877_v15 = vadd.f32 %v2873_v13, %v2403_v47  ;;  %v10634_v17 = vpop.f32.mrb[23].mxu1  ;;  %v10979_v47 = vld [vmem:[%s11346_s3 + $0xa0] sm:$0xff]  }
 0xf4a   : > { %v3962_v50 = vsel %vm979_vm0, %v10979_v47, 0  ;;  %v9709_v17 = vld [vmem:[%s11366_s24] ss:$0 sm:$0xff] }
 0xf4b   : > { %v2885_v18 = vadd.f32 %v9708_v14, %v2877_v15  ;;  %10197 = vmatpush3.bf16.xpose.msra.mxu1 %v3962_v50  ;;  %v11011_v47 = vld [vmem:[%s11346_s3 + $0x1a0] sm:$0xff]   ;;  %v11012_v50 = vld [vmem:[%s11346_s3 + $0x168] sm:$0xff]  }
 0xf4c   : > { %10803 = vmatprep.subr.msk.bf16.mxu1 %vm979_vm0, %v10981_v51  ;;  %v11013_v51 = vld [vmem:[%s11346_s3 + $0x1e8] sm:$0xff]  }
 0xf4d   : > { %v2886_v19 = vadd.f32 %v2885_v18, %v11495_v5  ;;  %v3902_v5 = vsel %vm979_vm0, %v10962_v23, 0 }
 0xf4e   : > { %10171 = vmatpush3.bf16.xpose.msra.mxu0 %v3902_v5  ;;  %v10996_v5 = vld [vmem:[%s11346_s3 + $0x148] sm:$0xff]  }
 0xf4f   : > { %v2889_v20 = vsel %vm979_vm0, %v2886_v19, 0.0  ;;  %10791 = vmatprep.subr.msk.bf16.mxu0 %vm979_vm0, %v10964_v25  ;;  %v3998_v25 = vsel %vm979_vm0, %v10994_v21, 0  ;;  %v11035_v21 = vld [vmem:[%s11346_s3 + $0x290] sm:$0xff]  }
 0xf50   : > { %2890 = vadd.xlane.f32.xlu0 %v2889_v20 }
 0xf53   : > { %10199 = vmatpush3.bf16.xpose.msra.mxu1 %v3965_v60  ;;  %v4016_v60 = vsel %vm979_vm0, %v11018_v58, 0  ;;  %v11059_v58 = vld [vmem:[%s11346_s3 + $0x380] sm:$0xff]  }
 0xf54   : > { %10804 = vmatprep.subr.msk.bf16.mxu1 %vm979_vm0, %v10985_v62  ;;  %v11020_v62 = vld [vmem:[%s11346_s3 + $0x178] sm:$0xff]  }
 0xf56   : > { %10173 = vmatpush3.bf16.xpose.msra.mxu0 %v3905_v30  ;;  %v4001_v30 = vsel %vm979_vm0, %v10998_v28, 0  ;;  %v11039_v28 = vld [vmem:[%s11346_s3 + $0x298] sm:$0xff]  }
 0xf57   : > { %10792 = vmatprep.subr.msk.bf16.mxu0 %vm979_vm0, %v10968_v31  ;;  %v4049_v31 = vsel %vm979_vm0, %v10999_v29, 0 }
 0xf5b   : > { %10201 = vmatpush3.bf16.xpose.msra.mxu1 %v3968_v3  ;;  %v4019_v3 = vsel %vm979_vm0, %v11022_v0, 0  ;;  %v11063_v0 = vld [vmem:[%s11346_s3 + $0x388] sm:$0xff]  }
 0xf5c   : > { %10805 = vmatprep.subr.msk.bf16.mxu1 %vm979_vm0, %v10989_v6  ;;  %v11024_v6 = vld [vmem:[%s11346_s3 + $0x240] sm:$0xff]  }
 0xf5e   : > { %10175 = vmatpush3.bf16.xpose.msra.mxu0 %v3908_v36  ;;  %v4004_v36 = vsel %vm979_vm0, %v11002_v34, 0  ;;  %v11043_v34 = vld [vmem:[%s11346_s3 + $0x2a0] sm:$0xff]  }
 0xf5f   : > { %10793 = vmatprep.subr.msk.bf16.mxu0 %vm979_vm0, %v10972_v37  ;;  %v4052_v37 = vsel %vm979_vm0, %v11003_v35, 0 }
 0xf63   : > { %10203 = vmatpush3.bf16.xpose.msra.mxu1 %v3971_v9  ;;  %v4094_v9 = vsel %vm979_vm0, %v11026_v8, 0  ;;  %v11067_v8 = vld [vmem:[%s11346_s3 + $0x390] sm:$0xff]  }
 0xf64   : > { %10814 = vmatprep.subr.msk.bf16.mxu1 %vm979_vm0, %v10993_v11  ;;  %v11028_v11 = vld [vmem:[%s11346_s3 + $0x248] sm:$0xff]  }
 0xf66   : > { %10177 = vmatpush3.bf16.xpose.msra.mxu0 %v3911_v42  ;;  %v4007_v42 = vsel %vm979_vm0, %v11006_v40, 0  ;;  %v11047_v40 = vld [vmem:[%s11346_s3 + $0x2a8] sm:$0xff]  }
 0xf67   : > { %10794 = vmatprep.subr.msk.bf16.mxu0 %vm979_vm0, %v10976_v43  ;;  %v4055_v43 = vsel %vm979_vm0, %v11007_v41, 0 }
 0xf6e   : > { %10179 = vmatpush3.bf16.xpose.msra.mxu0 %v3914_v48  ;;  %v4010_v48 = vsel %vm979_vm0, %v11010_v46, 0  ;;  %v11051_v46 = vld [vmem:[%s11346_s3 + $0x2b0] sm:$0xff]  }
 0xf6f   : > { %10795 = vmatprep.subr.msk.bf16.mxu0 %vm979_vm0, %v10980_v49  ;;  %v4058_v49 = vsel %vm979_vm0, %v11011_v47, 0 }
 0xf76   : > { %10181 = vmatpush3.bf16.xpose.msra.mxu0 %v3917_v59  ;;  %v11019_v59 = vld [vmem:[%s11346_s3 + $0x1b0] sm:$0xff]  }
 0xf77   : > { %10796 = vmatprep.subr.msk.bf16.mxu0 %vm979_vm0, %v10984_v61  ;;  %v4064_v61 = vsel %vm979_vm0, %v11019_v59, 0 }
 0xf7e   : > { %10183 = vmatpush3.bf16.xpose.msra.mxu0 %v3920_v1  ;;  %v11023_v1 = vld [vmem:[%s11346_s3 + $0x1b8] sm:$0xff]  }
 0xf7f   : > { %10797 = vmatprep.subr.msk.bf16.mxu0 %vm979_vm0, %v10988_v4  ;;  %v4067_v4 = vsel %vm979_vm0, %v11023_v1, 0 }
 0xf86   : > { %10185 = vmatpush3.bf16.xpose.msra.mxu0 %v3923_v16  ;;  %v11027_v16 = vld [vmem:[%s11346_s3 + $0x280] sm:$0xff]  }
 0xf87   : > { %10806 = vmatprep.subr.msk.bf16.mxu0 %vm979_vm0, %v10992_v10  ;;  %v4142_v10 = vsel %vm979_vm0, %v11027_v16, 0 }
 0xfdd   : > { %v2891_v52 = vpop.xlane.xlu0 %2890 }
 0xfde   : > { %v2893_v53 = vmul.f32 0.03125, %v2891_v52  ;;  %v11014_v52 = vld [vmem:[%s11346_s3 + $0x128] sm:$0xff]  }
 0xfe0   : > { %v2894_v54 = vsub.f32 %v2886_v19, %v2893_v53  ;;  %v9710_v19 = vld [vmem:[%s11371_s30] ss:$0 sm:$0xff]  ;;  %v11015_v53 = vld [vmem:[%s11346_s3 + $0x1a8] sm:$0xff]  }
 0xfe2   : > { %v2895_v55 = vmul.f32 %v2894_v54, %v2894_v54 }
 0xfe4   : > { %v2896_v56 = vsel %vm979_vm0, %v2895_v55, 0.0  ;;  %v4061_v55 = vsel %vm979_vm0, %v11015_v53, 0 }
 0xfe5   : > { %2897 = vadd.xlane.f32.xlu1 %v2896_v56  ;;  %v11016_v56 = vld [vmem:[%s11346_s3 + $0x170] sm:$0xff]  }
0x1072   : > { %v2898_v12 = vpop.xlane.xlu1 %2897 }
0x1073   : > { %v2899_v13 = vmul.f32 0.03125, %v2898_v12  ;;  %v11029_v12 = vld [vmem:[%s11346_s3 + $0x2c8] sm:$0xff]  }
0x1075   : > { %v2900_v14 = vadd.f32 1e-05, %v2899_v13  ;;  %v11030_v13 = vld [vmem:[%s11346_s3 + $0x208] sm:$0xff]  }
0x1077   : > { %11232 = vrsqrt.f32 %v2900_v14  ;;  %v11031_v14 = vld [vmem:[%s11346_s3 + $0x288] sm:$0xff]  }
0x1081   : > { %v11233_v15 = vpop.eup %11232 }
0x1082   : > { %v2902_v18 = vmul.f32 %v11233_v15, %v2894_v54  ;;  %v4013_v54 = vsel %vm979_vm0, %v11014_v52, 0  ;;  %v4097_v15 = vsel %vm979_vm0, %v11030_v13, 0  ;;  %v11055_v52 = vld [vmem:[%s11346_s3 + $0x2b8] sm:$0xff]  }
0x1083   : > { %v11071_v13 = vld [vmem:[%s11346_s3 + $0x398] sm:$0xff]  }
0x1084   : > { %v2909_v20 = vmul.f32 %v9709_v17, %v2902_v18  ;;  %v11032_v17 = vld [vmem:[%s11346_s3 + $0x250] sm:$0xff]   ;;  %v4145_v18 = vsel %vm979_vm0, %v11031_v14, 0 }
0x1086   : > { %v11732_v23 = vadd.f32 %v9710_v19, %v2909_v20  ;;  %v11033_v19 = vld [vmem:[%s11346_s3 + $0x2d0] sm:$0xff]  }
0x1087   : > { %v11034_v20 = vld [vmem:[%s11346_s3 + $0x210] sm:$0xff]  }
0x1088   : > { %v11736_v24 = vpack.c.bf16 %v11732_v23, %v11732_v23  ;;  %v4100_v22 = vsel %vm979_vm0, %v11034_v20, 0  ;;  %v11075_v20 = vld [vmem:[%s11346_s3 + $0x3a0] sm:$0xff]  }
0x108a   : > { %10186 = vmatprep.mubr.msk.bf16.mxu0 %vm979_vm0, %v11736_v24  ;;  %10204 = vmatprep.mubr.msk.bf16.mxu1 %vm979_vm0, %v11736_v24 }
0x108b   : > { %10187 = vmatmul.mubr.msk.bf16.vlgmr.msra.gmra.mrb[24].mxu0 %vm979_vm0, %v11736_v24  ;;  %10205 = vmatmul.mubr.msk.bf16.vlgmr.msra.gmra.mrb[24].mxu1 %vm979_vm0, %v11736_v24 }
0x108c   : > { %10207 = vmatpush3.bf16.xpose.msra.mxu0 %v3998_v25  ;;  %10225 = vmatpush3.bf16.xpose.msra.mxu1 %v4046_v26  ;;  %v11036_v25 = vld [vmem:[%s11346_s3 + $0x258] sm:$0xff]   ;;  %v4148_v26 = vsel %vm979_vm0, %v11035_v21, 0  ;;  %v11927_v21 = vld [vmem:[%s11356_s14 + $0x20] sm:$0xff] }
0x108d   : > { %10222 = vmatprep.mubr.msk.bf16.mxu0 %vm979_vm0, %v11736_v24  ;;  %10240 = vmatprep.mubr.msk.bf16.mxu1 %vm979_vm0, %v11736_v24 }
0x108e   : > { %10807 = vmatprep.subr.msk.bf16.mxu0 %vm979_vm0, %v10996_v5  ;;  %10815 = vmatprep.subr.msk.bf16.mxu1 %vm979_vm0, %v10997_v27  ;;  %v11037_v5 = vld [vmem:[%s11346_s3 + $0x2d8] sm:$0xff]  }
0x108f   : > { %v11038_v27 = vld [vmem:[%s11346_s3 + $0x218] sm:$0xff]  }
0x1090   : > { %v4103_v29 = vsel %vm979_vm0, %v11038_v27, 0  ;;  %v4250_v27 = vsel %vm979_vm0, %v11075_v20, 0 }
0x1094   : > { %10209 = vmatpush3.bf16.xpose.msra.mxu0 %v4001_v30  ;;  %10227 = vmatpush3.bf16.xpose.msra.mxu1 %v4049_v31  ;;  %v11040_v30 = vld [vmem:[%s11346_s3 + $0x260] sm:$0xff]   ;;  %v4151_v31 = vsel %vm979_vm0, %v11039_v28, 0  ;;  %v11077_v28 = vld [vmem:[%s11346_s3 + $0x3e8] sm:$0xff]  }
0x1095   : > { %10808 = vmatprep.subr.msk.bf16.mxu0 %vm979_vm0, %v11000_v32  ;;  %10816 = vmatprep.subr.msk.bf16.mxu1 %vm979_vm0, %v11001_v33  ;;  %v11041_v32 = vld [vmem:[%s11346_s3 + $0x2e0] sm:$0xff]  }
0x1096   : > { %v11042_v33 = vld [vmem:[%s11346_s3 + $0x220] sm:$0xff]  }
0x1097   : > { %v4106_v35 = vsel %vm979_vm0, %v11042_v33, 0 }
0x109c   : > { %10211 = vmatpush3.bf16.xpose.msra.mxu0 %v4004_v36  ;;  %10229 = vmatpush3.bf16.xpose.msra.mxu1 %v4052_v37  ;;  %v11044_v36 = vld [vmem:[%s11346_s3 + $0x268] sm:$0xff]   ;;  %v4154_v37 = vsel %vm979_vm0, %v11043_v34, 0  ;;  %v11081_v34 = vld [vmem:[%s11346_s3 + $0x3f0] sm:$0xff]  }
0x109d   : > { %10809 = vmatprep.subr.msk.bf16.mxu0 %vm979_vm0, %v11004_v38  ;;  %10817 = vmatprep.subr.msk.bf16.mxu1 %vm979_vm0, %v11005_v39  ;;  %v11045_v38 = vld [vmem:[%s11346_s3 + $0x2e8] sm:$0xff]  }
0x109e   : > { %v11046_v39 = vld [vmem:[%s11346_s3 + $0x228] sm:$0xff]  }
0x109f   : > { %v4109_v41 = vsel %vm979_vm0, %v11046_v39, 0 }
0x10a4   : > { %10213 = vmatpush3.bf16.xpose.msra.mxu0 %v4007_v42  ;;  %10231 = vmatpush3.bf16.xpose.msra.mxu1 %v4055_v43  ;;  %v11048_v42 = vld [vmem:[%s11346_s3 + $0x270] sm:$0xff]   ;;  %v4157_v43 = vsel %vm979_vm0, %v11047_v40, 0  ;;  %v11085_v40 = vld [vmem:[%s11346_s3 + $0x3f8] sm:$0xff]  }
0x10a5   : > { %10810 = vmatprep.subr.msk.bf16.mxu0 %vm979_vm0, %v11008_v44  ;;  %10818 = vmatprep.subr.msk.bf16.mxu1 %vm979_vm0, %v11009_v45  ;;  %v11049_v44 = vld [vmem:[%s11346_s3 + $0x2f0] sm:$0xff]  }
0x10a6   : > { %v11050_v45 = vld [vmem:[%s11346_s3 + $0x230] sm:$0xff]  }
0x10a7   : > { %v4112_v47 = vsel %vm979_vm0, %v11050_v45, 0  ;;  %v4629_v45 = vld [vmem:[%s11356_s14] sm:$0xff] }
0x10ac   : > { %10215 = vmatpush3.bf16.xpose.msra.mxu0 %v4010_v48  ;;  %10233 = vmatpush3.bf16.xpose.msra.mxu1 %v4058_v49  ;;  %v11052_v48 = vld [vmem:[%s11346_s3 + $0x278] sm:$0xff]   ;;  %v4160_v49 = vsel %vm979_vm0, %v11051_v46, 0  ;;  %v4637_v46 = vld [vmem:[%s11356_s14 + $0x40] sm:$0xff] }
0x10ad   : > { %10811 = vmatprep.subr.msk.bf16.mxu0 %vm979_vm0, %v11012_v50  ;;  %10819 = vmatprep.subr.msk.bf16.mxu1 %vm979_vm0, %v11013_v51  ;;  %v11053_v50 = vld [vmem:[%s11346_s3 + $0x2f8] sm:$0xff]  }
0x10ae   : > { %v11054_v51 = vld [vmem:[%s11346_s3 + $0x238] sm:$0xff]  }
0x10af   : > { %v4115_v53 = vsel %vm979_vm0, %v11054_v51, 0  ;;  %v4647_v51 = vld [vmem:[%s11356_s14 + $0x90] sm:$0xff] }
0x10b4   : > { %10217 = vmatpush3.bf16.xpose.msra.mxu0 %v4013_v54  ;;  %10235 = vmatpush3.bf16.xpose.msra.mxu1 %v4061_v55  ;;  %v11056_v54 = vld [vmem:[%s11346_s3 + $0x340] sm:$0xff]   ;;  %v4163_v55 = vsel %vm979_vm0, %v11055_v52, 0  ;;  %v4655_v52 = vld [vmem:[%s11356_s14 + $0xd0] sm:$0xff] }
0x10b5   : > { %10812 = vmatprep.subr.msk.bf16.mxu0 %vm979_vm0, %v11016_v56  ;;  %10820 = vmatprep.subr.msk.bf16.mxu1 %vm979_vm0, %v11017_v57  ;;  %v11057_v56 = vld [vmem:[%s11346_s3 + $0x3c0] sm:$0xff]  }
0x10b6   : > { %v11058_v57 = vld [vmem:[%s11346_s3 + $0x300] sm:$0xff]  }
0x10b7   : > { %v4190_v59 = vsel %vm979_vm0, %v11058_v57, 0  ;;  %v9869_v57 = vcombine.high %v4647_v51, %v4655_v52 }
0x10bc   : > { %10219 = vmatpush3.bf16.xpose.msra.mxu0 %v4016_v60  ;;  %10237 = vmatpush3.bf16.xpose.msra.mxu1 %v4064_v61  ;;  %v4238_v60 = vsel %vm979_vm0, %v11059_v58, 0  ;;  %v11060_v61 = vld [vmem:[%s11346_s3 + $0x348] sm:$0xff]  }
0x10bd   : > { %10813 = vmatprep.subr.msk.bf16.mxu0 %vm979_vm0, %v11020_v62  ;;  %10821 = vmatprep.subr.msk.bf16.mxu1 %vm979_vm0, %v11021_v63  ;;  %v11061_v62 = vld [vmem:[%s11346_s3 + $0x3c8] sm:$0xff]  }
0x10be   : > { %v11062_v63 = vld [vmem:[%s11346_s3 + $0x308] sm:$0xff]  }
0x10bf   : > { %v4193_v1 = vsel %vm979_vm0, %v11062_v63, 0 }
0x10c4   : > { %10221 = vmatpush3.bf16.xpose.msra.mxu0 %v4019_v3  ;;  %10239 = vmatpush3.bf16.xpose.msra.mxu1 %v4067_v4  ;;  %v11064_v3 = vld [vmem:[%s11346_s3 + $0x350] sm:$0xff]   ;;  %v4241_v4 = vsel %vm979_vm0, %v11063_v0, 0 }
0x10c5   : > { %10822 = vmatprep.subr.msk.bf16.mxu0 %vm979_vm0, %v11024_v6  ;;  %10830 = vmatprep.subr.msk.bf16.mxu1 %vm979_vm0, %v11025_v7  ;;  %v11065_v6 = vld [vmem:[%s11346_s3 + $0x3d0] sm:$0xff]  }
0x10c6   : > { %v11066_v7 = vld [vmem:[%s11346_s3 + $0x310] sm:$0xff]  }
0x10c7   : > { %v4196_v16 = vsel %vm979_vm0, %v11066_v7, 0 }
0x10cb   : > { %10223 = vmatmul.mubr.msk.bf16.vlgmr.msra.gmra.mrb[28].mxu0 %vm979_vm0, %v11736_v24  ;;  %10241 = vmatmul.mubr.msk.bf16.vlgmr.msra.gmra.mrb[28].mxu1 %vm979_vm0, %v11736_v24 }
0x10cc   : > { %10243 = vmatpush3.bf16.xpose.msra.mxu0 %v4094_v9  ;;  %10258 = vmatprep.mubr.msk.bf16.mxu0 %vm979_vm0, %v11736_v24  ;;  %v11068_v9 = vld [vmem:[%s11346_s3 + $0x358] sm:$0xff]  }
0x10cd   : > { %10261 = vmatpush3.bf16.xpose.msra.mxu1 %v4142_v10  ;;  %10276 = vmatprep.mubr.msk.bf16.mxu1 %vm979_vm0, %v11736_v24  ;;  %v4244_v10 = vsel %vm979_vm0, %v11067_v8, 0 }
0x10ce   : > { %10823 = vmatprep.subr.msk.bf16.mxu0 %vm979_vm0, %v11028_v11  ;;  %10831 = vmatprep.subr.msk.bf16.mxu1 %vm979_vm0, %v11029_v12  ;;  %v11069_v11 = vld [vmem:[%s11346_s3 + $0x3d8] sm:$0xff]  }
0x10cf   : > { %v11070_v12 = vld [vmem:[%s11346_s3 + $0x318] sm:$0xff]  }
0x10d0   : > { %v4199_v14 = vsel %vm979_vm0, %v11070_v12, 0 }
0x10d4   : > { %10245 = vmatpush3.bf16.xpose.msra.mxu0 %v4097_v15  ;;  %v11072_v15 = vld [vmem:[%s11346_s3 + $0x360] sm:$0xff]  }
0x10d5   : > { %10263 = vmatpush3.bf16.xpose.msra.mxu1 %v4145_v18  ;;  %10824 = vmatprep.subr.msk.bf16.mxu0 %vm979_vm0, %v11032_v17  ;;  %v4247_v17 = vsel %vm979_vm0, %v11071_v13, 0  ;;  %v11073_v18 = vld [vmem:[%s11346_s3 + $0x3e0] sm:$0xff]  }
0x10d6   : > { %10832 = vmatprep.subr.msk.bf16.mxu1 %vm979_vm0, %v11033_v19  ;;  %v11074_v19 = vld [vmem:[%s11346_s3 + $0x320] sm:$0xff]  }
0x10dc   : > { %10247 = vmatpush3.bf16.xpose.msra.mxu0 %v4100_v22  ;;  %v11930_v22 = vld [vmem:[%s11356_s14 + $0x60] sm:$0xff] }
0x10dd   : > { %10265 = vmatpush3.bf16.xpose.msra.mxu1 %v4148_v26  ;;  %10825 = vmatprep.subr.msk.bf16.mxu0 %vm979_vm0, %v11036_v25  ;;  %v9856_v25 = vcombine.low %v11927_v21, %v11930_v22  ;;  %v4202_v26 = vsel %vm979_vm0, %v11074_v19, 0  ;;  %v9857_v0 = vcombine.high %v11927_v21, %v11930_v22 }
0x10de   : > { %10833 = vmatprep.subr.msk.bf16.mxu1 %vm979_vm0, %v11037_v5  ;;  %v11076_v5 = vld [vmem:[%s11346_s3 + $0x368] sm:$0xff]  }
0x10e4   : > { %10249 = vmatpush3.bf16.xpose.msra.mxu0 %v4103_v29  ;;  %v11078_v29 = vld [vmem:[%s11346_s3 + $0x328] sm:$0xff]  }
0x10e5   : > { %10267 = vmatpush3.bf16.xpose.msra.mxu1 %v4151_v31  ;;  %10826 = vmatprep.subr.msk.bf16.mxu0 %vm979_vm0, %v11040_v30  ;;  %v11079_v30 = vld [vmem:[%s11346_s3 + $0x3a8] sm:$0xff]   ;;  %v4205_v31 = vsel %vm979_vm0, %v11078_v29, 0 }
0x10e6   : > { %10834 = vmatprep.subr.msk.bf16.mxu1 %vm979_vm0, %v11041_v32  ;;  %v11080_v32 = vld [vmem:[%s11346_s3 + $0x370] sm:$0xff]   ;;  %v4253_v33 = vsel %vm979_vm0, %v11079_v30, 0  ;;  %v4646_v29 = vld [vmem:[%s11356_s14 + $0x88] sm:$0xff] }
0x10e7   : > { %v4654_v30 = vld [vmem:[%s11356_s14 + $0xc8] sm:$0xff] }
0x10ec   : > { %10251 = vmatpush3.bf16.xpose.msra.mxu0 %v4106_v35  ;;  %v11082_v35 = vld [vmem:[%s11346_s3 + $0x330] sm:$0xff]  }
0x10ed   : > { %10269 = vmatpush3.bf16.xpose.msra.mxu1 %v4154_v37  ;;  %10827 = vmatprep.subr.msk.bf16.mxu0 %vm979_vm0, %v11044_v36  ;;  %v11083_v36 = vld [vmem:[%s11346_s3 + $0x3b0] sm:$0xff]   ;;  %v4208_v37 = vsel %vm979_vm0, %v11082_v35, 0  ;;  %v9867_v35 = vcombine.high %v4646_v29, %v4654_v30 }
0x10ee   : > { %10835 = vmatprep.subr.msk.bf16.mxu1 %vm979_vm0, %v11045_v38  ;;  %v11084_v38 = vld [vmem:[%s11346_s3 + $0x378] sm:$0xff]   ;;  %v4256_v39 = vsel %vm979_vm0, %v11083_v36, 0 }
0x10f4   : > { %10253 = vmatpush3.bf16.xpose.msra.mxu0 %v4109_v41  ;;  %v11086_v41 = vld [vmem:[%s11346_s3 + $0x338] sm:$0xff]  }
0x10f5   : > { %10271 = vmatpush3.bf16.xpose.msra.mxu1 %v4157_v43  ;;  %10828 = vmatprep.subr.msk.bf16.mxu0 %vm979_vm0, %v11048_v42  ;;  %v11087_v42 = vld [vmem:[%s11346_s3 + $0x3b8] sm:$0xff]   ;;  %v4631_v43 = vld [vmem:[%s11356_s14 + $0x10] sm:$0xff] }
0x10f6   : > { %10836 = vmatprep.subr.msk.bf16.mxu1 %vm979_vm0, %v11049_v44  ;;  %v4639_v44 = vld [vmem:[%s11356_s14 + $0x50] sm:$0xff] }
0x10fc   : > { %10255 = vmatpush3.bf16.xpose.msra.mxu0 %v4112_v47  ;;  %v4211_v47 = vsel %vm979_vm0, %v11086_v41, 0 }
0x10fd   : > { %10273 = vmatpush3.bf16.xpose.msra.mxu1 %v4160_v49  ;;  %10829 = vmatprep.subr.msk.bf16.mxu0 %vm979_vm0, %v11052_v48  ;;  %v9853_v48 = vcombine.high %v4631_v43, %v4639_v44  ;;  %v4259_v49 = vsel %vm979_vm0, %v11087_v42, 0 }
0x10fe   : > { %10837 = vmatprep.subr.msk.bf16.mxu1 %vm979_vm0, %v11053_v50  ;;  %v9849_v50 = vcombine.high %v4629_v45, %v4637_v46 }
0x1104   : > { %10257 = vmatpush3.bf16.xpose.msra.mxu0 %v4115_v53  ;;  %v4645_v53 = vld [vmem:[%s11356_s14 + $0x80] sm:$0xff] }
0x1105   : > { %10275 = vmatpush3.bf16.xpose.msra.mxu1 %v4163_v55  ;;  %10838 = vmatprep.subr.msk.bf16.mxu0 %vm979_vm0, %v11056_v54  ;;  %v4653_v54 = vld [vmem:[%s11356_s14 + $0xc0] sm:$0xff]  ;;  %v9852_v55 = vcombine.low %v4631_v43, %v4639_v44  ;;  %v4648_v44 = vld [vmem:[%s11356_s14 + $0x98] sm:$0xff] }
0x1106   : > { %10846 = vmatprep.subr.msk.bf16.mxu1 %vm979_vm0, %v11057_v56  ;;  %v9848_v56 = vcombine.low %v4629_v45, %v4637_v46  ;;  %v9865_v58 = vcombine.high %v4645_v53, %v4653_v54  ;;  %v9864_v63 = vcombine.low %v4645_v53, %v4653_v54  ;;  %v4656_v45 = vld [vmem:[%s11356_s14 + $0xd8] sm:$0xff] }
0x110b   : > { %10259 = vmatmul.mubr.msk.bf16.vlgmr.msra.gmra.mrb[32].mxu0 %vm979_vm0, %v11736_v24 }
0x110c   : > { %10277 = vmatmul.mubr.msk.bf16.vlgmr.msra.gmra.mrb[32].mxu1 %vm979_vm0, %v11736_v24  ;;  %10279 = vmatpush3.bf16.xpose.msra.mxu0 %v4190_v59  ;;  %v3178_v59 = vlaneseq }
0x110d   : > { %10294 = vmatprep.mubr.msk.bf16.mxu0 %vm979_vm0, %v11736_v24  ;;  %10297 = vmatpush3.bf16.xpose.msra.mxu1 %v4238_v60  ;;  %v4630_v60 = vld [vmem:[%s11356_s14 + $0x8] sm:$0xff] }
0x110e   : > { %10312 = vmatprep.mubr.msk.bf16.mxu1 %vm979_vm0, %v11736_v24  ;;  %10839 = vmatprep.subr.msk.bf16.mxu0 %vm979_vm0, %v11060_v61  ;;  %v4638_v61 = vld [vmem:[%s11356_s14 + $0x48] sm:$0xff] }
0x110f   : > { %10847 = vmatprep.subr.msk.bf16.mxu1 %vm979_vm0, %v11061_v62  ;;  %v9868_v62 = vcombine.low %v4647_v51, %v4655_v52  ;;  %v9870_v51 = vcombine.low %v4648_v44, %v4656_v45 }
0x1114   : > { %10281 = vmatpush3.bf16.xpose.msra.mxu0 %v4193_v1  ;;  %v9851_v1 = vcombine.high %v4630_v60, %v4638_v61 }
0x1115   : > { %10299 = vmatpush3.bf16.xpose.msra.mxu1 %v4241_v4  ;;  %10840 = vmatprep.subr.msk.bf16.mxu0 %vm979_vm0, %v11064_v3  ;;  %v11976_v3 = vshrl.u32 %v3178_v59, 7  ;;  %v11982_v4 = vld [vmem:[%s11351_s8] sm:$0xff] }
0x1116   : > { %10848 = vmatprep.subr.msk.bf16.mxu1 %vm979_vm0, %v11065_v6 }
0x1117   : > { %v11985_v6 = vsub.s32 1, %v11976_v3  ;;  %v11988_v7 = vsub.s32 3, %v11976_v3  ;;  %v12010_v53 = vsub.s32 4, %v11976_v3  ;;  %v12013_v54 = vsub.s32 6, %v11976_v3 }
0x111c   : > { %10283 = vmatpush3.bf16.xpose.msra.mxu0 %v4196_v16  ;;  %v3185_v16 = vrot.slane %v11982_v4, %v11985_v6 }
0x111d   : > { %10301 = vmatpush3.bf16.xpose.msra.mxu1 %v4244_v10  ;;  %10841 = vmatprep.subr.msk.bf16.mxu0 %vm979_vm0, %v11068_v9  ;;  %v3193_v9 = vrot.slane %v11982_v4, %v11988_v7 }
0x111e   : > { %10849 = vmatprep.subr.msk.bf16.mxu1 %vm979_vm0, %v11069_v11 }
0x1124   : > { %10285 = vmatpush3.bf16.xpose.msra.mxu0 %v4199_v14 }
0x1125   : > { %10303 = vmatpush3.bf16.xpose.msra.mxu1 %v4247_v17  ;;  %10842 = vmatprep.subr.msk.bf16.mxu0 %vm979_vm0, %v11072_v15 }
0x1126   : > { %10850 = vmatprep.subr.msk.bf16.mxu1 %vm979_vm0, %v11073_v18 }
0x112c   : > { %10287 = vmatpush3.bf16.xpose.msra.mxu0 %v4202_v26 }
0x112d   : > { %10305 = vmatpush3.bf16.xpose.msra.mxu1 %v4250_v27  ;;  %10843 = vmatprep.subr.msk.bf16.mxu0 %vm979_vm0, %v11076_v5 }
0x112e   : > { %10851 = vmatprep.subr.msk.bf16.mxu1 %vm979_vm0, %v11077_v28 }
0x1134   : > { %10289 = vmatpush3.bf16.xpose.msra.mxu0 %v4205_v31 }
0x1135   : > { %10307 = vmatpush3.bf16.xpose.msra.mxu1 %v4253_v33  ;;  %10844 = vmatprep.subr.msk.bf16.mxu0 %vm979_vm0, %v11080_v32  ;;  %v9850_v32 = vcombine.low %v4630_v60, %v4638_v61 }
0x1136   : > { %10852 = vmatprep.subr.msk.bf16.mxu1 %vm979_vm0, %v11081_v34  ;;  %v11999_v34 = vsub.s32 2, %v11976_v3 }
0x113c   : > { %10291 = vmatpush3.bf16.xpose.msra.mxu0 %v4208_v37  ;;  %v3189_v37 = vrot.slane %v11982_v4, %v11999_v34 }
0x113d   : > { %10309 = vmatpush3.bf16.xpose.msra.mxu1 %v4256_v39  ;;  %10845 = vmatprep.subr.msk.bf16.mxu0 %vm979_vm0, %v11084_v38  ;;  %v4632_v38 = vld [vmem:[%s11356_s14 + $0x18] sm:$0xff] }
0x113e   : > { %10853 = vmatprep.subr.msk.bf16.mxu1 %vm979_vm0, %v11085_v40  ;;  %v4640_v39 = vld [vmem:[%s11356_s14 + $0x58] sm:$0xff]  ;;  %v9866_v40 = vcombine.low %v4646_v29, %v4654_v30 }
0x113f   : > { %v9855_v42 = vcombine.high %v4632_v38, %v4640_v39  ;;  %v9854_v46 = vcombine.low %v4632_v38, %v4640_v39 }
0x1144   : > { %10293 = vmatpush3.bf16.xpose.msra.mxu0 %v4211_v47 }
0x1145   : > { %10311 = vmatpush3.bf16.xpose.msra.mxu1 %v4259_v49  ;;  %4924 = vmatprep.subr.bf16.mxu0 %v9853_v48  ;;  %v9871_v48 = vcombine.high %v4648_v44, %v4656_v45  ;;  %v4634_v49 = vld [vmem:[%s11356_s14 + $0x28] sm:$0xff] }
0x1146   : > { %4844 = vmatprep.subr.bf16.mxu1 %v9849_v50  ;;  %v4642_v50 = vld [vmem:[%s11356_s14 + $0x68] sm:$0xff] }
0x1147   : > { %v9859_v52 = vcombine.high %v4634_v49, %v4642_v50 }
0x114b   : > { %10295 = vmatmul.mubr.msk.bf16.vlgmr.msra.gmra.mrb[36].mxu0 %vm979_vm0, %v11736_v24 }
0x114c   : > { %10313 = vmatmul.mubr.msk.bf16.vlgmr.msra.gmra.mrb[36].mxu1 %vm979_vm0, %v11736_v24  ;;  %4925 = vmatpush1.bf16.xpose.msra.mxu0 %v9852_v55  ;;  %v11979_v24 = vsub.s32 0, %v11976_v3  ;;  %v12016_v55 = vsub.s32 5, %v11976_v3 }
0x114d   : > { %4845 = vmatpush1.bf16.xpose.msra.mxu1 %v9848_v56  ;;  %4926 = vmatprep.subr.bf16.mxu0 %v9869_v57  ;;  %v12019_v56 = vsub.s32 7, %v11976_v3  ;;  %v3197_v57 = vrot.slane %v11982_v4, %v12010_v53 }
0x114e   : > { %4846 = vmatprep.subr.bf16.mxu1 %v9865_v58  ;;  %v3181_v8 = vrot.slane %v11982_v4, %v11979_v24  ;;  %v3205_v58 = vrot.slane %v11982_v4, %v12013_v54  ;;  %v3201_v59 = vrot.slane %v11982_v4, %v12016_v55 }
0x114f   : > { %v3209_v60 = vrot.slane %v11982_v4, %v12019_v56 }
0x1154   : > { %4927 = vmatpush1.bf16.xpose.msra.mxu0 %v9868_v62 }
0x1155   : > { %4847 = vmatpush1.bf16.xpose.msra.mxu1 %v9864_v63  ;;  %5004 = vmatprep.subr.bf16.mxu0 %v9857_v0 }
0x1156   : > { %4884 = vmatprep.subr.bf16.mxu1 %v9851_v1 }
0x115e   : > { %v4319_v10 = vpop.f32.mrb[24].mxu0  ;;  %v4360_v11 = vpop.f32.mrb[24].mxu1 }
0x115f   : > { %v4320_v12 = vadd.f32 %v4319_v10, %v3181_v8  ;;  %v4321_v13 = vpop.f32.mrb[25].mxu0  ;;  %v4362_v14 = vpop.f32.mrb[25].mxu1  ;;  %v4361_v41 = vadd.f32 %v4360_v11, %v3189_v37 }
0x1160   : > { %v4322_v15 = vadd.f32 %v4321_v13, %v3185_v16  ;;  %v4363_v17 = vadd.f32 %v4362_v14, %v3193_v9  ;;  %v4323_v18 = vpop.f32.mrb[26].mxu0  ;;  %v4364_v19 = vpop.f32.mrb[26].mxu1 }
0x1161   : > { %v4613_v20 = vmax.f32 %v4320_v12, 0.0  ;;  %v4324_v26 = vpop.f32.mrb[27].mxu0  ;;  %v4365_v5 = vpop.f32.mrb[27].mxu1  ;;  %v4615_v43 = vmax.f32 %v4361_v41, 0.0  ;;  %v4657_v18 = vld [vmem:[%s11356_s14 + $0xe0] sm:$0xff]  ;;  %v4650_v19 = vld [vmem:[%s11356_s14 + $0xa8] sm:$0xff] }
0x1162   : > { %v4614_v27 = vmax.f32 %v4322_v15, 0.0  ;;  %v4616_v28 = vmax.f32 %v4363_v17, 0.0  ;;  %v4649_v15 = vld [vmem:[%s11356_s14 + $0xa0] sm:$0xff]  ;;  %v3175_v41 = vld [vmem:[%s11351_s8 + $0x8] sm:$0xff] }
0x1163   : > { %v4661_v33 = vpack.c.bf16 %v4613_v20, %v4613_v20  ;;  %v4663_v47 = vpack.c.bf16 %v4615_v43, %v4615_v43  ;;  %v4658_v20 = vld [vmem:[%s11356_s14 + $0xe8] sm:$0xff]  ;;  %v9873_v30 = vcombine.high %v4649_v15, %v4657_v18  ;;  %v9872_v37 = vcombine.low %v4649_v15, %v4657_v18 }
0x1164   : > { %v4662_v31 = vpack.c.bf16 %v4614_v27, %v4614_v27  ;;  %v4664_v36 = vpack.c.bf16 %v4616_v28, %v4616_v28  ;;  %v9858_v27 = vcombine.low %v4634_v49, %v4642_v50  ;;  %v9874_v38 = vcombine.low %v4650_v19, %v4658_v20 }
0x1165   : > { %v3213_v21 = vrot.slane %v3175_v41, %v11979_v24  ;;  %v3221_v22 = vrot.slane %v3175_v41, %v11999_v34  ;;  %v3237_v18 = vrot.slane %v3175_v41, %v12013_v54 }
0x1166   : > { %4876 = vmatprep.mubr.bf16.mxu1 %v4662_v31  ;;  %v9875_v31 = vcombine.high %v4650_v19, %v4658_v20  ;;  %v3233_v19 = vrot.slane %v3175_v41, %v12016_v55  ;;  %v3241_v20 = vrot.slane %v3175_v41, %v12019_v56 }
0x1167   : > { %4877 = vmatmul.mubr.bf16.vlgmr.msra.gmra.mrb[40].mxu1 %v4661_v33  ;;  %v4643_v33 = vld [vmem:[%s11356_s14 + $0x70] sm:$0xff] }
0x1168   : > { %4885 = vmatpush1.bf16.xpose.msra.mxu1 %v9850_v32  ;;  %4916 = vmatprep.mubr.bf16.mxu1 %v4664_v36  ;;  %v4635_v32 = vld [vmem:[%s11356_s14 + $0x30] sm:$0xff]  ;;  %v4644_v36 = vld [vmem:[%s11356_s14 + $0x78] sm:$0xff] }
0x1169   : > { %4886 = vmatprep.subr.bf16.mxu1 %v9867_v35  ;;  %v4636_v35 = vld [vmem:[%s11356_s14 + $0x38] sm:$0xff]  ;;  %v9861_v39 = vcombine.high %v4635_v32, %v4643_v33 }
0x1170   : > { %4887 = vmatpush1.bf16.xpose.msra.mxu1 %v9866_v40  ;;  %v9863_v40 = vcombine.high %v4636_v35, %v4644_v36 }
0x1171   : > { %4964 = vmatprep.subr.bf16.mxu1 %v9855_v42  ;;  %v3225_v42 = vrot.slane %v3175_v41, %v11988_v7 }
0x1177   : > { %4917 = vmatmul.mubr.bf16.vlgmr.msra.gmra.mrb[44].mxu1 %v4663_v47 }
0x1178   : > { %4965 = vmatpush1.bf16.xpose.msra.mxu1 %v9854_v46 }
0x1179   : > { %4966 = vmatprep.subr.bf16.mxu1 %v9871_v48 }
0x1180   : > { %4967 = vmatpush1.bf16.xpose.msra.mxu1 %v9870_v51 }
0x1181   : > { %5044 = vmatprep.subr.bf16.mxu1 %v9859_v52 }
0x119e   : > { %v4401_v61 = vpop.f32.mrb[28].mxu0  ;;  %v4442_v62 = vpop.f32.mrb[28].mxu1 }
0x119f   : > { %v4402_v63 = vadd.f32 %v4401_v61, %v3197_v57  ;;  %v4443_v0 = vadd.f32 %v4442_v62, %v3205_v58  ;;  %v4403_v1 = vpop.f32.mrb[29].mxu0  ;;  %v4444_v3 = vpop.f32.mrb[29].mxu1  ;;  %v4651_v62 = vld [vmem:[%s11356_s14 + $0xb0] sm:$0xff] }
0x11a0   : > { %v4404_v8 = vadd.f32 %v4403_v1, %v3201_v59  ;;  %v4445_v16 = vadd.f32 %v4444_v3, %v3209_v60  ;;  %v4405_v9 = vpop.f32.mrb[30].mxu0  ;;  %v4446_v10 = vpop.f32.mrb[30].mxu1  ;;  %v4652_v1 = vld [vmem:[%s11356_s14 + $0xb8] sm:$0xff] }
0x11a1   : > { %v4617_v11 = vmax.f32 %v4402_v63, 0.0  ;;  %v4619_v12 = vmax.f32 %v4443_v0, 0.0  ;;  %v4406_v13 = vpop.f32.mrb[31].mxu0  ;;  %v4447_v14 = vpop.f32.mrb[31].mxu1  ;;  %v4659_v63 = vld [vmem:[%s11356_s14 + $0xf0] sm:$0xff]  ;;  %v4660_v3 = vld [vmem:[%s11356_s14 + $0xf8] sm:$0xff] }
0x11a2   : > { %v4618_v17 = vmax.f32 %v4404_v8, 0.0  ;;  %v4620_v4 = vmax.f32 %v4445_v16, 0.0  ;;  %v9860_v16 = vcombine.low %v4635_v32, %v4643_v33  ;;  %v9879_v14 = vcombine.high %v4652_v1, %v4660_v3 }
0x11a3   : > { %v4665_v28 = vpack.c.bf16 %v4617_v11, %v4617_v11  ;;  %v4667_v29 = vpack.c.bf16 %v4619_v12, %v4619_v12  ;;  %v9862_v11 = vcombine.low %v4636_v35, %v4644_v36  ;;  %v9877_v12 = vcombine.high %v4651_v62, %v4659_v63 }
0x11a4   : > { %v4666_v26 = vpack.c.bf16 %v4618_v17, %v4618_v17  ;;  %v4668_v5 = vpack.c.bf16 %v4620_v4, %v4620_v4  ;;  %v9876_v15 = vcombine.low %v4651_v62, %v4659_v63  ;;  %v9878_v17 = vcombine.low %v4652_v1, %v4660_v3 }
0x11a5   : > { %v3229_v4 = vrot.slane %v3175_v41, %v12010_v53 }
0x11a6   : > { %4956 = vmatprep.mubr.bf16.mxu0 %v4666_v26  ;;  %4996 = vmatprep.mubr.bf16.mxu1 %v4668_v5 }
0x11a7   : > { %4957 = vmatmul.mubr.bf16.vlgmr.msra.gmra.mrb[40].mxu0 %v4665_v28  ;;  %4997 = vmatmul.mubr.bf16.vlgmr.msra.gmra.mrb[48].mxu1 %v4667_v29 }
0x11a8   : > { %5005 = vmatpush1.bf16.xpose.msra.mxu0 %v9856_v25  ;;  %5045 = vmatpush1.bf16.xpose.msra.mxu1 %v9858_v27  ;;  %v3217_v25 = vrot.slane %v3175_v41, %v11985_v6 }
0x11a9   : > { %5006 = vmatprep.subr.bf16.mxu0 %v9873_v30  ;;  %5046 = vmatprep.subr.bf16.mxu1 %v9875_v31 }
0x11b0   : > { %5007 = vmatpush1.bf16.xpose.msra.mxu0 %v9872_v37  ;;  %5047 = vmatpush1.bf16.xpose.msra.mxu1 %v9874_v38 }
0x11b1   : > { %5084 = vmatprep.subr.bf16.mxu0 %v9861_v39  ;;  %5124 = vmatprep.subr.bf16.mxu1 %v9863_v40 }
0x11de   : > { %v4483_v43 = vpop.f32.mrb[32].mxu0 }
0x11df   : > { %v4484_v44 = vadd.f32 %v4483_v43, %v3213_v21  ;;  %v4524_v45 = vpop.f32.mrb[32].mxu1  ;;  %v4485_v46 = vpop.f32.mrb[33].mxu0 }
0x11e0   : > { %v4525_v47 = vadd.f32 %v4524_v45, %v3221_v22  ;;  %v4486_v48 = vadd.f32 %v4485_v46, %v3217_v25  ;;  %v4526_v49 = vpop.f32.mrb[33].mxu1  ;;  %v4487_v50 = vpop.f32.mrb[34].mxu0 }
0x11e1   : > { %v4621_v51 = vmax.f32 %v4484_v44, 0.0  ;;  %v4527_v52 = vadd.f32 %v4526_v49, %v3225_v42  ;;  %v4528_v57 = vpop.f32.mrb[34].mxu1  ;;  %v4488_v58 = vpop.f32.mrb[35].mxu0 }
0x11e2   : > { %v4623_v59 = vmax.f32 %v4525_v47, 0.0  ;;  %v4622_v60 = vmax.f32 %v4486_v48, 0.0  ;;  %v4529_v61 = vpop.f32.mrb[35].mxu1  ;;  %v9847_v47 = vld [vmem:[%s11361_s19] ss:$0 sm:$0xff] }
0x11e3   : > { %v4624_v0 = vmax.f32 %v4527_v52, 0.0  ;;  %v4669_v9 = vpack.c.bf16 %v4621_v51, %v4621_v51 }
0x11e4   : > { %v4670_v8 = vpack.c.bf16 %v4622_v60, %v4622_v60  ;;  %v4671_v13 = vpack.c.bf16 %v4623_v59, %v4623_v59 }
0x11e5   : > { %v4672_v10 = vpack.c.bf16 %v4624_v0, %v4624_v0 }
0x11e6   : > { %5036 = vmatprep.mubr.bf16.mxu0 %v4670_v8 }
0x11e7   : > { %5076 = vmatprep.mubr.bf16.mxu1 %v4672_v10  ;;  %5037 = vmatmul.mubr.bf16.vlgmr.msra.gmra.mrb[44].mxu0 %v4669_v9 }
0x11e8   : > { %5077 = vmatmul.mubr.bf16.vlgmr.msra.gmra.mrb[52].mxu1 %v4671_v13  ;;  %5085 = vmatpush1.bf16.xpose.msra.mxu0 %v9860_v16 }
0x11e9   : > { %5125 = vmatpush1.bf16.xpose.msra.mxu1 %v9862_v11  ;;  %5086 = vmatprep.subr.bf16.mxu0 %v9877_v12 }
0x11ea   : > { %5126 = vmatprep.subr.bf16.mxu1 %v9879_v14 }
0x11f0   : > { %5087 = vmatpush1.bf16.xpose.msra.mxu0 %v9876_v15 }
0x11f1   : > { %5127 = vmatpush1.bf16.xpose.msra.mxu1 %v9878_v17  ;;  %10635 = vmatprep.subr.mxu0 %v11300_v2 }
0x11f2   : > { %10640 = vmatprep.subr.mxu1 %v11300_v2 }
0x121e   : > { %v4565_v26 = vpop.f32.mrb[36].mxu0 }
0x121f   : > { %v4566_v5 = vadd.f32 %v4565_v26, %v3229_v4  ;;  %v4606_v27 = vpop.f32.mrb[36].mxu1  ;;  %v4567_v28 = vpop.f32.mrb[37].mxu0 }
0x1220   : > { %v4607_v29 = vadd.f32 %v4606_v27, %v3237_v18  ;;  %v4568_v30 = vadd.f32 %v4567_v28, %v3233_v19  ;;  %v4608_v31 = vpop.f32.mrb[37].mxu1  ;;  %v4569_v32 = vpop.f32.mrb[38].mxu0 }
0x1221   : > { %v4625_v33 = vmax.f32 %v4566_v5, 0.0  ;;  %v4609_v35 = vadd.f32 %v4608_v31, %v3241_v20  ;;  %v4610_v36 = vpop.f32.mrb[38].mxu1  ;;  %v4570_v37 = vpop.f32.mrb[39].mxu0 }
0x1222   : > { %v4627_v38 = vmax.f32 %v4607_v29, 0.0  ;;  %v4626_v39 = vmax.f32 %v4568_v30, 0.0  ;;  %v4611_v40 = vpop.f32.mrb[39].mxu1 }
0x1223   : > { %v4628_v21 = vmax.f32 %v4609_v35, 0.0  ;;  %v4673_v25 = vpack.c.bf16 %v4625_v33, %v4625_v33  ;;  %v5276_v40 = vld [vmem:[%s11386_s20 + $0x20] sm:$0xff] }
0x1224   : > { %v4674_v22 = vpack.c.bf16 %v4626_v39, %v4626_v39  ;;  %v4675_v42 = vpack.c.bf16 %v4627_v38, %v4627_v38 }
0x1225   : > { %v4676_v41 = vpack.c.bf16 %v4628_v21, %v4628_v21  ;;  %v5194_v21 = vld [vmem:[%s11386_s20] sm:$0xff] }
0x1226   : > { %5116 = vmatprep.mubr.bf16.mxu0 %v4674_v22 }
0x1227   : > { %5156 = vmatprep.mubr.bf16.mxu1 %v4676_v41  ;;  %5117 = vmatmul.mubr.bf16.vlgmr.msra.gmra.mrb[48].mxu0 %v4673_v25 }
0x1228   : > { %5157 = vmatmul.mubr.bf16.vlgmr.msra.gmra.mrb[56].mxu1 %v4675_v42  ;;  %10637 = vmatprep.mubr.msk.f32.mxu0 %vm11301_vm1, %v11300_v2  ;;  %v9880_v42 = vld [vmem:[%s12655_s1] ss:$0 sm:$0xff]  ;;  %s12665_s1 = sld [smem:[#allocation10_spill]] }
0x1229   : > { %10642 = vmatprep.mubr.msk.f32.mxu1 %vm11301_vm1, %v11300_v2  ;;  %10641 = vmatpush3.xpose.msk.msra.mxu1 %vm979_vm0, %v5276_v40 }
0x122a   : > { %10636 = vmatpush3.xpose.msk.msra.mxu0 %vm979_vm0, %v5194_v21  ;;  %10650 = vmatprep.subr.mxu1 %v11300_v2 }
0x122b   : > { %10645 = vmatprep.subr.mxu0 %v11300_v2 }
0x123a   : > { %v4878_v43 = vpop.f32.mrb[40].mxu1 }
0x123b   : > { %v4880_v44 = vpop.f32.mrb[41].mxu1  ;;  %v4879_v48 = vadd.f32 %v9847_v47, %v4878_v43  ;;  %v5355_v47 = vld [vmem:[%s11386_s20 + $0x40] sm:$0xff] }
0x123c   : > { %v4881_v45 = vpop.f32.mrb[42].mxu1  ;;  %v9881_v44 = vld [vmem:[%s12656_s2] ss:$0 sm:$0xff]  ;;  %s12666_s2 = sld [smem:[#allocation15_spill]] }
0x123d   : > { %v4882_v46 = vpop.f32.mrb[43].mxu1 }
0x124a   : > { %v4918_v49 = vpop.f32.mrb[44].mxu1 }
0x124b   : > { %v4919_v50 = vadd.f32 %v4918_v49, %v4879_v48  ;;  %v4920_v51 = vpop.f32.mrb[45].mxu1  ;;  %v9885_v48 = vld [vmem:[%s12657_s7 + $0x4] ss:$0 sm:$0xff] }
0x124c   : > { %v4921_v52 = vpop.f32.mrb[46].mxu1  ;;  %v9882_v51 = vld [vmem:[%s12657_s7] ss:$0 sm:$0xff] }
0x124d   : > { %v4922_v57 = vpop.f32.mrb[47].mxu1 }
0x127a   : > { %v4958_v58 = vpop.f32.mrb[40].mxu0  ;;  %v4998_v59 = vpop.f32.mrb[48].mxu1 }
0x127b   : > { %v4959_v60 = vadd.f32 %v4958_v58, %v4919_v50  ;;  %v4960_v61 = vpop.f32.mrb[41].mxu0  ;;  %v5000_v62 = vpop.f32.mrb[49].mxu1 }
0x127c   : > { %v4961_v63 = vpop.f32.mrb[42].mxu0  ;;  %v5001_v0 = vpop.f32.mrb[50].mxu1  ;;  %v5597_v62 = vld [vmem:[%s11386_s20 + $0x8] sm:$0xff] }
0x127d   : > { %v4999_v1 = vadd.f32 %v4998_v59, %v4959_v60  ;;  %v4962_v3 = vpop.f32.mrb[43].mxu0  ;;  %v5002_v8 = vpop.f32.mrb[51].mxu1  ;;  %v9888_v59 = vld [vmem:[%s12657_s7 + $0x8] ss:$0 sm:$0xff] }
0x12ba   : > { %v5038_v16 = vpop.f32.mrb[44].mxu0 }
0x12bb   : > { %v5039_v9 = vadd.f32 %v5038_v16, %v4999_v1  ;;  %v5078_v10 = vpop.f32.mrb[52].mxu1  ;;  %v5040_v11 = vpop.f32.mrb[45].mxu0  ;;  %v5755_v1 = vld [vmem:[%s11386_s20 + $0x48] sm:$0xff] }
0x12bc   : > { %v5080_v12 = vpop.f32.mrb[53].mxu1  ;;  %v5041_v13 = vpop.f32.mrb[46].mxu0 }
0x12bd   : > { %v5079_v14 = vadd.f32 %v5078_v10, %v5039_v9  ;;  %v5081_v15 = vpop.f32.mrb[54].mxu1  ;;  %v5042_v17 = vpop.f32.mrb[47].mxu0  ;;  %v12112_v9 = vld [vmem:[%s11521_s28] ss:$0 sm:$0xff]  ;;  %s12664_s28 = sld [smem:[#allocation8_spill]] }
0x12be   : > { %v5082_v4 = vpop.f32.mrb[55].mxu1 }
0x12fa   : > { %v5118_v18 = vpop.f32.mrb[48].mxu0 }
0x12fb   : > { %v5119_v19 = vadd.f32 %v5118_v18, %v5079_v14  ;;  %v5158_v20 = vpop.f32.mrb[56].mxu1  ;;  %v5120_v26 = vpop.f32.mrb[49].mxu0  ;;  %v9900_v14 = vld [vmem:[%s12657_s7 + $0x9] ss:$0 sm:$0xff] }
0x12fc   : > { %v5160_v5 = vpop.f32.mrb[57].mxu1  ;;  %v5121_v27 = vpop.f32.mrb[50].mxu0 }
0x12fd   : > { %v5159_v28 = vadd.f32 %v5158_v20, %v5119_v19  ;;  %v5161_v29 = vpop.f32.mrb[58].mxu1  ;;  %v5122_v30 = vpop.f32.mrb[51].mxu0 }
0x12fe   : > { %v5162_v31 = vpop.f32.mrb[59].mxu1  ;;  %v5676_v30 = vld [vmem:[%s11386_s20 + $0x28] sm:$0xff] }
0x12ff   : > { %v5164_v32 = vadd.f32 %v5159_v28, %v11732_v23 }
0x1301   : > { %v5167_v33 = vsel %vm979_vm0, %v5164_v32, 0.0 }
0x1302   : > { %5168 = vadd.xlane.f32.xlu0 %v5167_v33  ;;  %v9897_v33 = vld [vmem:[%s12657_s7 + $0x5] ss:$0 sm:$0xff] }
0x138f   : > { %v5169_v35 = vpop.xlane.xlu0 %5168 }
0x1390   : > { %v5170_v36 = vmul.f32 0.03125, %v5169_v35 }
0x1392   : > { %v5171_v37 = vsub.f32 %v5164_v32, %v5170_v36  ;;  %v9894_v36 = vld [vmem:[%s12657_s7 + $0x1] ss:$0 sm:$0xff] }
0x1394   : > { %v5172_v38 = vmul.f32 %v5171_v37, %v5171_v37 }
0x1396   : > { %v5173_v39 = vsel %vm979_vm0, %v5172_v38, 0.0 }
0x1397   : > { %5174 = vadd.xlane.f32.xlu1 %v5173_v39 }
0x1424   : > { %v5175_v23 = vpop.xlane.xlu1 %5174 }
0x1425   : > { %v5176_v22 = vmul.f32 0.03125, %v5175_v23 }
0x1427   : > { %v5177_v25 = vadd.f32 1e-05, %v5176_v22 }
0x1429   : > { %11234 = vrsqrt.f32 %v5177_v25 }
0x1433   : > { %v11235_v41 = vpop.eup %11234 }
0x1434   : > { %v5179_v43 = vmul.f32 %v11235_v41, %v5171_v37 }
0x1436   : > { %v5186_v45 = vmul.f32 %v9880_v42, %v5179_v43 }
0x1438   : > { %v12071_v46 = vadd.f32 %v9881_v44, %v5186_v45 }
0x143a   : > { %10638 = vmatmul.mubr.msk.f32.vlgmr.msra.gmra.mrb[52].mxu0 %vm979_vm0, %v12071_v46  ;;  %10643 = vmatmul.mubr.msk.f32.vlgmr.msra.gmra.mrb[60].mxu1 %vm979_vm0, %v12071_v46 }
0x143b   : > { %10646 = vmatpush3.xpose.msk.msra.mxu0 %vm979_vm0, %v5355_v47  ;;  %10647 = vmatprep.mubr.msk.f32.mxu0 %vm11301_vm1, %v11300_v2  ;;  %v5996_v47 = vld [vmem:[%s12658_s10 + $0x8] sm:$0xff] }
0x143c   : > { %10652 = vmatprep.mubr.msk.f32.mxu1 %vm11301_vm1, %v11300_v2  ;;  %10655 = vmatprep.subr.mxu0 %v11300_v2 }
0x143e   : > { %10648 = vmatmul.mubr.msk.f32.vlgmr.msra.gmra.mrb[54].mxu0 %vm979_vm0, %v12071_v46 }
0x143f   : > { %10657 = vmatprep.mubr.msk.f32.mxu0 %vm11301_vm1, %v11300_v2 }
0x150d   : > { %v5272_v49 = vpop.f32.mrb[52].mxu0  ;;  %v5351_v50 = vpop.f32.mrb[60].mxu1 }
0x150e   : > { %v5352_v52 = vadd.f32 %v9885_v48, %v5351_v50  ;;  %v10639_v57 = vpop.f32.mrb[53].mxu0  ;;  %v10644_v58 = vpop.f32.mrb[61].mxu1  ;;  %v5273_v60 = vadd.f32 %v9882_v51, %v5272_v49  ;;  %v5596_v51 = vld [vmem:[%s12658_s10] sm:$0xff] }
0x150f   : > { %v6143_v57 = vld [vmem:[%s11386_s20 + $0x10] sm:$0xff] }
0x1510   : > { %10651 = vmatpush3.xpose.msk.msra.mxu1 %vm1214_vm2, %v5352_v52  ;;  %v6222_v52 = vld [vmem:[%s11386_s20 + $0x30] sm:$0xff] }
0x1511   : > { %v5430_v61 = vpop.f32.mrb[54].mxu0  ;;  %10660 = vmatprep.subr.mxu1 %v11300_v2 }
0x1512   : > { %v5431_v63 = vadd.f32 %v9888_v59, %v5430_v61  ;;  %v10649_v0 = vpop.f32.mrb[55].mxu0 }
0x1513   : > { %10653 = vmatmul.mubr.msk.f32.vlgmr.msra.gmra.mrb[62].mxu1 %vm1214_vm2, %v5273_v60  ;;  %v6301_v60 = vld [vmem:[%s11386_s20 + $0x50] sm:$0xff] }
0x1514   : > { %10656 = vmatpush3.msra.mxu0 %v5431_v63  ;;  %10661 = vmatpush3.xpose.msk.msra.mxu1 %vm979_vm0, %v5597_v62  ;;  %v9911_v63 = vld [vmem:[%s12657_s7 + $0x6] ss:$0 sm:$0xff] }
0x1515   : > { %10662 = vmatprep.mubr.msk.f32.mxu1 %vm11301_vm1, %v11300_v2  ;;  %10670 = vmatprep.subr.mxu1 %v11300_v2 }
0x1516   : > { %10665 = vmatprep.subr.mxu0 %v11300_v2 }
0x1517   : > { %10663 = vmatmul.mubr.msk.f32.vlgmr.msra.gmra.mrb[64].mxu1 %vm979_vm0, %v12071_v46 }
0x1518   : > { %10671 = vmatpush3.xpose.msk.msra.mxu1 %vm979_vm0, %v5755_v1  ;;  %10672 = vmatprep.mubr.msk.f32.mxu1 %vm11301_vm1, %v11300_v2 }
0x1519   : > { %10680 = vmatprep.subr.mxu1 %v11300_v2 }
0x151b   : > { %10673 = vmatmul.mubr.msk.f32.vlgmr.msra.gmra.mrb[66].mxu1 %vm979_vm0, %v12071_v46 }
0x151c   : > { %10682 = vmatprep.mubr.msk.f32.mxu1 %vm11301_vm1, %v11300_v2 }
0x15e6   : > { %v5506_v3 = vpop.f32.mrb[62].mxu1 }
0x15e7   : > { %v5510_v8 = vmul.f32 0.35355338, %v5506_v3  ;;  %v10654_v16 = vpop.f32.mrb[63].mxu1 }
0x15e9   : > { %v5511_v10 = vadd.f32 %v12112_v9, %v5510_v8 }
0x15ea   : > { %v5672_v11 = vpop.f32.mrb[64].mxu1 }
0x15eb   : > { %v10664_v12 = vpop.f32.mrb[65].mxu1  ;;  %v5512_v13 = vsel %vm1214_vm2, %v5511_v10, -inf  ;;  %v5673_v39 = vadd.f32 %v9894_v36, %v5672_v11  ;;  %v9908_v11 = vld [vmem:[%s12657_s7 + $0x2] ss:$0 sm:$0xff] }
0x15ec   : > { %5513 = vmax.xlane.f32.xlu0 %v5512_v13 }
0x15ee   : > { %v5830_v15 = vpop.f32.mrb[66].mxu1 }
0x15ef   : > { %v5831_v17 = vadd.f32 %v9900_v14, %v5830_v15  ;;  %v10674_v4 = vpop.f32.mrb[67].mxu1  ;;  %v9914_v15 = vld [vmem:[%s12657_s7 + $0xa] ss:$0 sm:$0xff] }
0x15f1   : > { %10681 = vmatpush3.msra.mxu1 %v5831_v17 }
0x15f2   : > { %10690 = vmatprep.subr.mxu1 %v11300_v2 }
0x1679   : > { %v5514_v18 = vpop.xlane.xlu0 %5513 }
0x167a   : > { %v5515_v19 = vsub.f32 %v5511_v10, %v5514_v18 }
0x167c   : > { %v5516_v20 = vmul.f32 1.442695, %v5515_v19 }
0x167e   : > { %11236 = vpow2.f32 %v5516_v20 }
0x1688   : > { %v11237_v26 = vpop.eup %11236 }
0x1689   : > { %v5518_v5 = vsel %vm1214_vm2, %v11237_v26, 0.0 }
0x168a   : > { %5519 = vadd.xlane.f32.xlu1 %v5518_v5 }
0x1717   : > { %v5520_v27 = vpop.xlane.xlu1 %5519 }
0x1718   : > { %11238 = vrcp.f32 %v5520_v27 }
0x1722   : > { %v11239_v28 = vpop.eup %11238 }
0x1723   : > { %v5522_v29 = vmul.f32 %v11239_v28, %v11237_v26 }
0x1725   : > { %10658 = vmatmul.mubr.msk.f32.vlgmr.msra.gmra.mrb[56].mxu0 %vm1214_vm2, %v5522_v29 }
0x1726   : > { %10666 = vmatpush3.xpose.msk.msra.mxu0 %vm979_vm0, %v5676_v30  ;;  %10667 = vmatprep.mubr.msk.f32.mxu0 %vm11301_vm1, %v11300_v2 }
0x1727   : > { %10675 = vmatprep.subr.mxu0 %v11300_v2 }
0x1729   : > { %10668 = vmatmul.mubr.msk.f32.vlgmr.msra.gmra.mrb[58].mxu0 %vm979_vm0, %v12071_v46 }
0x172a   : > { %10677 = vmatprep.mubr.msk.f32.mxu0 %vm11301_vm1, %v11300_v2 }
0x17f8   : > { %v5592_v31 = vpop.f32.mrb[56].mxu0 }
0x17f9   : > { %v10659_v32 = vpop.f32.mrb[57].mxu0 }
0x17fc   : > { %v5751_v35 = vpop.f32.mrb[58].mxu0 }
0x17fd   : > { %v5752_v37 = vadd.f32 %v9897_v33, %v5751_v35  ;;  %v10669_v38 = vpop.f32.mrb[59].mxu0  ;;  %v6542_v33 = vld [vmem:[%s12658_s10 + $0x10] sm:$0xff] }
0x17fe   : > { %v6617_v38 = vld [vmem:[%s11386_s20 + $0x18] sm:$0xff] }
0x17ff   : > { %10676 = vmatpush3.xpose.msk.msra.mxu0 %vm1214_vm2, %v5752_v37 }
0x1800   : > { %10685 = vmatprep.subr.mxu0 %v11300_v2 }
0x1802   : > { %10678 = vmatmul.mubr.msk.f32.vlgmr.msra.gmra.mrb[60].mxu0 %vm1214_vm2, %v5673_v39  ;;  %v6775_v39 = vld [vmem:[%s11386_s20 + $0x58] sm:$0xff] }
0x1803   : > { %10687 = vmatprep.mubr.msk.f32.mxu0 %vm11301_vm1, %v11300_v2  ;;  %10686 = vmatpush3.msra.mxu0 %v5996_v47 }
0x1804   : > { %10695 = vmatprep.subr.mxu0 %v11300_v2 }
0x18d5   : > { %v5906_v40 = vpop.f32.mrb[60].mxu0 }
0x18d6   : > { %v5910_v21 = vmul.f32 0.35355338, %v5906_v40  ;;  %v10679_v23 = vpop.f32.mrb[61].mxu0  ;;  %v6696_v40 = vld [vmem:[%s11386_s20 + $0x38] sm:$0xff] }
0x18d8   : > { %v5911_v22 = vadd.f32 %v12112_v9, %v5910_v21 }
0x18da   : > { %v5912_v25 = vsel %vm1214_vm2, %v5911_v22, -inf }
0x18db   : > { %5913 = vmax.xlane.f32.xlu0 %v5912_v25 }
0x1968   : > { %v5914_v41 = vpop.xlane.xlu0 %5913 }
0x1969   : > { %v5915_v42 = vsub.f32 %v5911_v22, %v5914_v41  ;;  %v9927_v41 = vld [vmem:[%s12657_s7 + $0xb] ss:$0 sm:$0xff] }
0x196b   : > { %v5916_v43 = vmul.f32 1.442695, %v5915_v42 }
0x196d   : > { %11240 = vpow2.f32 %v5916_v43 }
0x1977   : > { %v11241_v44 = vpop.eup %11240 }
0x1978   : > { %v5918_v45 = vsel %vm1214_vm2, %v11241_v44, 0.0 }
0x1979   : > { %5919 = vadd.xlane.f32.xlu1 %v5918_v45 }
0x1a06   : > { %v5920_v48 = vpop.xlane.xlu1 %5919 }
0x1a07   : > { %11242 = vrcp.f32 %v5920_v48 }
0x1a11   : > { %v11243_v49 = vpop.eup %11242 }
0x1a12   : > { %v5922_v50 = vmul.f32 %v11243_v49, %v11241_v44  ;;  %v9924_v49 = vld [vmem:[%s12657_s7 + $0x7] ss:$0 sm:$0xff] }
0x1a14   : > { %10683 = vmatmul.mubr.msk.f32.vlgmr.msra.gmra.mrb[68].mxu1 %vm1214_vm2, %v5922_v50 }
0x1a15   : > { %10691 = vmatpush3.msra.mxu1 %v5596_v51  ;;  %10692 = vmatprep.mubr.msk.f32.mxu1 %vm11301_vm1, %v11300_v2  ;;  %v9921_v51 = vld [vmem:[%s12657_s7 + $0x3] ss:$0 sm:$0xff] }
0x1a16   : > { %10700 = vmatprep.subr.mxu1 %v11300_v2 }
0x1a18   : > { %10693 = vmatmul.mubr.msk.f32.vlgmr.msra.gmra.mrb[70].mxu1 %vm1214_vm2, %v5592_v31 }
0x1a19   : > { %10702 = vmatprep.mubr.msk.f32.mxu1 %vm11301_vm1, %v11300_v2 }
0x1a1c   : > { %10701 = vmatpush3.xpose.msk.msra.mxu1 %vm979_vm0, %v6222_v52 }
0x1a1d   : > { %10710 = vmatprep.subr.mxu1 %v11300_v2 }
0x1a1f   : > { %10703 = vmatmul.mubr.msk.f32.vlgmr.msra.gmra.mrb[72].mxu1 %vm979_vm0, %v12071_v46 }
0x1a20   : > { %10712 = vmatprep.mubr.msk.f32.mxu1 %vm11301_vm1, %v11300_v2 }
0x1ae7   : > { %v5992_v58 = vpop.f32.mrb[68].mxu1 }
0x1ae8   : > { %v10684_v59 = vpop.f32.mrb[69].mxu1  ;;  %10688 = vmatmul.mubr.msk.f32.vlgmr.msra.gmra.mrb[62].mxu0 %vm1214_vm2, %v5992_v58 }
0x1ae9   : > { %10696 = vmatpush3.xpose.msk.msra.mxu0 %vm979_vm0, %v6143_v57  ;;  %10697 = vmatprep.mubr.msk.f32.mxu0 %vm11301_vm1, %v11300_v2 }
0x1aea   : > { %10705 = vmatprep.subr.mxu0 %v11300_v2 }
0x1aeb   : > { %v6139_v61 = vpop.f32.mrb[70].mxu1 }
0x1aec   : > { %v10694_v62 = vpop.f32.mrb[71].mxu1  ;;  %10698 = vmatmul.mubr.msk.f32.vlgmr.msra.gmra.mrb[64].mxu0 %vm979_vm0, %v12071_v46 }
0x1aed   : > { %10706 = vmatpush3.xpose.msk.msra.mxu0 %vm979_vm0, %v6301_v60  ;;  %10707 = vmatprep.mubr.msk.f32.mxu0 %vm11301_vm1, %v11300_v2 }
0x1aee   : > { %10715 = vmatprep.subr.mxu0 %v11300_v2 }
0x1af0   : > { %10708 = vmatmul.mubr.msk.f32.vlgmr.msra.gmra.mrb[66].mxu0 %vm979_vm0, %v12071_v46 }
0x1af1   : > { %10717 = vmatprep.mubr.msk.f32.mxu0 %vm11301_vm1, %v11300_v2 }
0x1af2   : > { %v6297_v0 = vpop.f32.mrb[72].mxu1 }
0x1af3   : > { %v6298_v1 = vadd.f32 %v9911_v63, %v6297_v0  ;;  %v10704_v3 = vpop.f32.mrb[73].mxu1 }
0x1af5   : > { %10711 = vmatpush3.xpose.msk.msra.mxu1 %vm1214_vm2, %v6298_v1 }
0x1af6   : > { %10720 = vmatprep.subr.mxu1 %v11300_v2 }
0x1bbb   : > { %v6066_v8 = vpop.f32.mrb[62].mxu0 }
0x1bbc   : > { %v12176_v16 = vadd.f32 %v6139_v61, %v6066_v8  ;;  %v10689_v10 = vpop.f32.mrb[63].mxu0 }
0x1bbd   : > { %v7016_v10 = vld [vmem:[%s12658_s10 + $0x18] sm:$0xff] }
0x1bbf   : > { %v6218_v12 = vpop.f32.mrb[64].mxu0 }
0x1bc0   : > { %v6219_v13 = vadd.f32 %v9908_v11, %v6218_v12  ;;  %v10699_v14 = vpop.f32.mrb[65].mxu0 }
0x1bc2   : > { %10713 = vmatmul.mubr.msk.f32.vlgmr.msra.gmra.mrb[74].mxu1 %vm1214_vm2, %v6219_v13 }
0x1bc3   : > { %v6376_v17 = vpop.f32.mrb[66].mxu0  ;;  %10722 = vmatprep.mubr.msk.f32.mxu1 %vm11301_vm1, %v11300_v2  ;;  %10721 = vmatpush3.msra.mxu1 %v6542_v33  ;;  %v11094_v33 = vld [vmem:[%s12660_s15 + $0x8] sm:$0xff]  }
0x1bc4   : > { %v6377_v4 = vadd.f32 %v9914_v15, %v6376_v17  ;;  %v10709_v18 = vpop.f32.mrb[67].mxu0  ;;  %10730 = vmatprep.subr.mxu1 %v11300_v2  ;;  %v9934_v17 = vld [vmem:[%s12659_s11] ss:$0 sm:$0xff]  ;;  %s12669_s11 = sld [smem:[#allocation13_spill]] }
0x1bc6   : > { %10716 = vmatpush3.msra.mxu0 %v6377_v4 }
0x1bc7   : > { %10725 = vmatprep.subr.mxu0 %v11300_v2 }
0x1c95   : > { %v6452_v19 = vpop.f32.mrb[74].mxu1 }
0x1c96   : > { %v6456_v20 = vmul.f32 0.35355338, %v6452_v19  ;;  %v10714_v26 = vpop.f32.mrb[75].mxu1 }
0x1c98   : > { %v6457_v5 = vadd.f32 %v12112_v9, %v6456_v20 }
0x1c9a   : > { %v6458_v27 = vsel %vm1214_vm2, %v6457_v5, -inf }
0x1c9b   : > { %6459 = vmax.xlane.f32.xlu0 %v6458_v27  ;;  %v11089_v27 = vld [vmem:[%s12660_s15 + $0xc0] sm:$0xff]  }
0x1d28   : > { %v6460_v28 = vpop.xlane.xlu0 %6459 }
0x1d29   : > { %v6461_v29 = vsub.f32 %v6457_v5, %v6460_v28  ;;  %v11088_v5 = vld [vmem:[%s12660_s15 + $0x40] sm:$0xff]  }
0x1d2a   : > { %v11090_v28 = vld [vmem:[%s12660_s15] sm:$0xff]  }
0x1d2b   : > { %v6462_v30 = vmul.f32 1.442695, %v6461_v29  ;;  %v11091_v29 = vld [vmem:[%s12660_s15 + $0x80] sm:$0xff]  }
0x1d2d   : > { %11244 = vpow2.f32 %v6462_v30  ;;  %v11092_v30 = vld [vmem:[%s12660_s15 + $0x48] sm:$0xff]  }
0x1d37   : > { %v11245_v31 = vpop.eup %11244 }
0x1d38   : > { %v6464_v32 = vsel %vm1214_vm2, %v11245_v31, 0.0 }
0x1d39   : > { %6465 = vadd.xlane.f32.xlu1 %v6464_v32  ;;  %v8162_v32 = vsel %vm979_vm0, %v11091_v29, 0 }
0x1dc6   : > { %v6466_v35 = vpop.xlane.xlu1 %6465 }
0x1dc7   : > { %11246 = vrcp.f32 %v6466_v35  ;;  %v11095_v35 = vld [vmem:[%s12660_s15 + $0x88] sm:$0xff]  }
0x1dd1   : > { %v11247_v36 = vpop.eup %11246 }
0x1dd2   : > { %v6468_v37 = vmul.f32 %v11247_v36, %v11245_v31  ;;  %v11093_v31 = vld [vmem:[%s12660_s15 + $0xc8] sm:$0xff]   ;;  %v8117_v36 = vsel %vm979_vm0, %v11094_v33, 0  ;;  %v11122_v33 = vld [vmem:[%s12660_s15 + $0x100] sm:$0xff]  }
0x1dd4   : > { %10718 = vmatmul.mubr.msk.f32.vlgmr.msra.gmra.mrb[68].mxu0 %vm1214_vm2, %v6468_v37  ;;  %v11096_v37 = vld [vmem:[%s12660_s15 + $0x50] sm:$0xff]  }
0x1dd5   : > { %10726 = vmatpush3.xpose.msk.msra.mxu0 %vm979_vm0, %v6617_v38  ;;  %10727 = vmatprep.mubr.msk.f32.mxu0 %vm11301_vm1, %v11300_v2  ;;  %v8165_v38 = vsel %vm979_vm0, %v11095_v35, 0  ;;  %v11123_v35 = vld [vmem:[%s12660_s15 + $0x180] sm:$0xff]  }
0x1dd6   : > { %10735 = vmatprep.subr.mxu0 %v11300_v2 }
0x1dd8   : > { %10728 = vmatmul.mubr.msk.f32.vlgmr.msra.gmra.mrb[70].mxu0 %vm979_vm0, %v12071_v46 }
0x1dd9   : > { %10736 = vmatpush3.xpose.msk.msra.mxu0 %vm979_vm0, %v6775_v39  ;;  %10737 = vmatprep.mubr.msk.f32.mxu0 %vm11301_vm1, %v11300_v2  ;;  %v11097_v39 = vld [vmem:[%s12660_s15 + $0xd0] sm:$0xff]  }
0x1dda   : > { %10745 = vmatprep.subr.mxu0 %v11300_v2 }
0x1ddc   : > { %10738 = vmatmul.mubr.msk.f32.vlgmr.msra.gmra.mrb[72].mxu0 %vm979_vm0, %v12071_v46 }
0x1ddd   : > { %10747 = vmatprep.mubr.msk.f32.mxu0 %vm11301_vm1, %v11300_v2 }
0x1ea7   : > { %v6538_v21 = vpop.f32.mrb[68].mxu0 }
0x1ea8   : > { %v10719_v23 = vpop.f32.mrb[69].mxu0  ;;  %10723 = vmatmul.mubr.msk.f32.vlgmr.msra.gmra.mrb[76].mxu1 %vm1214_vm2, %v6538_v21  ;;  %v11099_v21 = vld [vmem:[%s12660_s15 + $0x90] sm:$0xff]  }
0x1ea9   : > { %10731 = vmatpush3.xpose.msk.msra.mxu1 %vm979_vm0, %v6696_v40  ;;  %10732 = vmatprep.mubr.msk.f32.mxu1 %vm11301_vm1, %v11300_v2  ;;  %v11098_v40 = vld [vmem:[%s12660_s15 + $0x10] sm:$0xff]  }
0x1eaa   : > { %10740 = vmatprep.subr.mxu1 %v11300_v2  ;;  %v8120_v23 = vsel %vm979_vm0, %v11098_v40, 0  ;;  %v11124_v40 = vld [vmem:[%s12660_s15 + $0x148] sm:$0xff]  }
0x1eab   : > { %v6692_v22 = vpop.f32.mrb[70].mxu0 }
0x1eac   : > { %v10729_v25 = vpop.f32.mrb[71].mxu0  ;;  %10733 = vmatmul.mubr.msk.f32.vlgmr.msra.gmra.mrb[78].mxu1 %vm979_vm0, %v12071_v46  ;;  %v6693_v58 = vadd.f32 %v9921_v51, %v6692_v22  ;;  %v11100_v22 = vld [vmem:[%s12660_s15 + $0x58] sm:$0xff]  }
0x1ead   : > { %10742 = vmatprep.mubr.msk.f32.mxu1 %vm11301_vm1, %v11300_v2  ;;  %v8168_v25 = vsel %vm979_vm0, %v11099_v21, 0  ;;  %v11125_v21 = vld [vmem:[%s12660_s15 + $0x1c8] sm:$0xff]  }
0x1eaf   : > { %v6850_v42 = vpop.f32.mrb[72].mxu0 }
0x1eb0   : > { %v6851_v43 = vadd.f32 %v9927_v41, %v6850_v42  ;;  %v10739_v44 = vpop.f32.mrb[73].mxu0  ;;  %v11101_v41 = vld [vmem:[%s12660_s15 + $0xd8] sm:$0xff]  }
0x1eb1   : > { %v11102_v42 = vld [vmem:[%s12660_s15 + $0x18] sm:$0xff]  }
0x1eb2   : > { %10746 = vmatpush3.msra.mxu0 %v6851_v43  ;;  %v11103_v43 = vld [vmem:[%s12660_s15 + $0x98] sm:$0xff]   ;;  %v8123_v44 = vsel %vm979_vm0, %v11102_v42, 0  ;;  %v11128_v42 = vld [vmem:[%s12660_s15 + $0x150] sm:$0xff]  }
0x1eb3   : > { %10854 = vmatprep.subr.msk.bf16.mxu0 %vm979_vm0, %v11088_v5 }
0x1f7b   : > { %v6612_v45 = vpop.f32.mrb[76].mxu1 }
0x1f7c   : > { %v6616_v47 = vadd.f32 %v6612_v45, %v12176_v16  ;;  %v10724_v48 = vpop.f32.mrb[77].mxu1  ;;  %v11104_v45 = vld [vmem:[%s12660_s15 + $0x60] sm:$0xff]  }
0x1f7d   : > { %v11105_v48 = vld [vmem:[%s12660_s15 + $0xe0] sm:$0xff]  }
0x1f7f   : > { %v6771_v50 = vpop.f32.mrb[78].mxu1 }
0x1f80   : > { %v6772_v52 = vadd.f32 %v9924_v49, %v6771_v50  ;;  %v10734_v57 = vpop.f32.mrb[79].mxu1  ;;  %v11106_v49 = vld [vmem:[%s12660_s15 + $0x20] sm:$0xff]  }
0x1f81   : > { %v11107_v50 = vld [vmem:[%s12660_s15 + $0xa0] sm:$0xff]   ;;  %v8126_v51 = vsel %vm979_vm0, %v11106_v49, 0  ;;  %v11132_v49 = vld [vmem:[%s12660_s15 + $0x158] sm:$0xff]  }
0x1f82   : > { %10741 = vmatpush3.xpose.msk.msra.mxu1 %vm1214_vm2, %v6772_v52  ;;  %v11108_v52 = vld [vmem:[%s12660_s15 + $0x68] sm:$0xff]   ;;  %v8174_v57 = vsel %vm979_vm0, %v11107_v50, 0  ;;  %v11133_v50 = vld [vmem:[%s12660_s15 + $0x1d8] sm:$0xff]  }
0x1f83   : > { %10750 = vmatprep.subr.mxu1 %v11300_v2 }
0x1f85   : > { %10743 = vmatmul.mubr.msk.f32.vlgmr.msra.gmra.mrb[80].mxu1 %vm1214_vm2, %v6693_v58  ;;  %v11109_v58 = vld [vmem:[%s12660_s15 + $0xe8] sm:$0xff]  }
0x1f86   : > { %10752 = vmatprep.mubr.msk.f32.mxu1 %vm11301_vm1, %v11300_v2  ;;  %10751 = vmatpush3.msra.mxu1 %v7016_v10  ;;  %v11113_v10 = vld [vmem:[%s12660_s15 + $0xf0] sm:$0xff]  }
0x1f87   : > { %10862 = vmatprep.subr.msk.bf16.mxu1 %vm979_vm0, %v11089_v27 }
0x2058   : > { %v6926_v59 = vpop.f32.mrb[80].mxu1 }
0x2059   : > { %v6930_v60 = vmul.f32 0.35355338, %v6926_v59  ;;  %v10744_v61 = vpop.f32.mrb[81].mxu1 }
0x205b   : > { %v6931_v62 = vadd.f32 %v12112_v9, %v6930_v60 }
0x205d   : > { %v6932_v63 = vsel %vm1214_vm2, %v6931_v62, -inf }
0x205e   : > { %6933 = vmax.xlane.f32.xlu0 %v6932_v63 }
0x20eb   : > { %v6934_v0 = vpop.xlane.xlu0 %6933 }
0x20ec   : > { %v6935_v1 = vsub.f32 %v6931_v62, %v6934_v0  ;;  %v11110_v0 = vld [vmem:[%s12660_s15 + $0x28] sm:$0xff]  }
0x20ee   : > { %v6936_v3 = vmul.f32 1.442695, %v6935_v1  ;;  %v11111_v1 = vld [vmem:[%s12660_s15 + $0xa8] sm:$0xff]  }
0x20f0   : > { %11248 = vpow2.f32 %v6936_v3  ;;  %v8129_v3 = vsel %vm979_vm0, %v11110_v0, 0 }
0x20fa   : > { %v11249_v8 = vpop.eup %11248 }
0x20fb   : > { %v6938_v16 = vsel %vm1214_vm2, %v11249_v8, 0.0 }
0x20fc   : > { %6939 = vadd.xlane.f32.xlu1 %v6938_v16  ;;  %v11112_v16 = vld [vmem:[%s12660_s15 + $0x70] sm:$0xff]  }
0x2189   : > { %v6940_v11 = vpop.xlane.xlu1 %6939 }
0x218a   : > { %11250 = vrcp.f32 %v6940_v11  ;;  %v11114_v11 = vld [vmem:[%s12660_s15 + $0x30] sm:$0xff]  }
0x2194   : > { %v11251_v12 = vpop.eup %11250 }
0x2195   : > { %v6942_v9 = vmul.f32 %v11251_v12, %v11249_v8  ;;  %v8177_v8 = vsel %vm979_vm0, %v11111_v1, 0  ;;  %v11115_v12 = vld [vmem:[%s12660_s15 + $0xb0] sm:$0xff]   ;;  %v11140_v1 = vld [vmem:[%s12660_s15 + $0x168] sm:$0xff]  }
0x2197   : > { %10748 = vmatmul.mubr.msk.f32.vlgmr.msra.gmra.mrb[74].mxu0 %vm1214_vm2, %v6942_v9  ;;  %v8132_v9 = vsel %vm979_vm0, %v11114_v11, 0 }
0x226a   : > { %v7012_v13 = vpop.f32.mrb[74].mxu0 }
0x226b   : > { %v10749_v14 = vpop.f32.mrb[75].mxu0  ;;  %10753 = vmatmul.mubr.msk.f32.vlgmr.msra.gmra.mrb[82].mxu1 %vm1214_vm2, %v7012_v13  ;;  %v8180_v13 = vsel %vm979_vm0, %v11115_v12, 0  ;;  %v11144_v12 = vld [vmem:[%s12660_s15 + $0x170] sm:$0xff]  }
0x226c   : > { %10381 = vmatpush3.bf16.xpose.msra.mxu1 %v8162_v32  ;;  %v11116_v14 = vld [vmem:[%s12660_s15 + $0x78] sm:$0xff]  }
0x226d   : > { %10863 = vmatprep.subr.msk.bf16.mxu1 %vm979_vm0, %v11093_v31 }
0x2274   : > { %10383 = vmatpush3.bf16.xpose.msra.mxu1 %v8165_v38  ;;  %v8210_v38 = vsel %vm979_vm0, %v11122_v33, 0  ;;  %v11157_v33 = vld [vmem:[%s12660_s15 + $0x2c8] sm:$0xff]  }
0x2275   : > { %10864 = vmatprep.subr.msk.bf16.mxu1 %vm979_vm0, %v11097_v39  ;;  %v8258_v39 = vsel %vm979_vm0, %v11123_v35, 0  ;;  %v11158_v35 = vld [vmem:[%s12660_s15 + $0x208] sm:$0xff]  }
0x227c   : > { %10385 = vmatpush3.bf16.xpose.msra.mxu1 %v8168_v25 }
0x227d   : > { %10865 = vmatprep.subr.msk.bf16.mxu1 %vm979_vm0, %v11101_v41 }
0x233e   : > { %v7086_v15 = vpop.f32.mrb[82].mxu1 }
0x233f   : > { %v7090_v4 = vadd.f32 %v7086_v15, %v6616_v47  ;;  %v10754_v18 = vpop.f32.mrb[83].mxu1  ;;  %v8171_v47 = vsel %vm979_vm0, %v11103_v43, 0  ;;  %v11117_v15 = vld [vmem:[%s12660_s15 + $0xf8] sm:$0xff]   ;;  %v11129_v43 = vld [vmem:[%s12660_s15 + $0x1d0] sm:$0xff]  }
0x2340   : > { %10387 = vmatpush3.bf16.xpose.msra.mxu1 %v8171_v47 }
0x2341   : > { %v7098_v19 = vadd.f32 %v9934_v17, %v7090_v4  ;;  %10866 = vmatprep.subr.msk.bf16.mxu1 %vm979_vm0, %v11105_v48  ;;  %v11118_v17 = vld [vmem:[%s12660_s15 + $0x38] sm:$0xff]  }
0x2342   : > { %v11119_v4 = vld [vmem:[%s12660_s15 + $0xb8] sm:$0xff]   ;;  %v8135_v18 = vsel %vm979_vm0, %v11118_v17, 0 }
0x2343   : > { %v7099_v20 = vadd.f32 %v7098_v19, %v12071_v46  ;;  %v8114_v46 = vsel %vm979_vm0, %v11090_v28, 0  ;;  %v8183_v19 = vsel %vm979_vm0, %v11119_v4, 0  ;;  %v11148_v4 = vld [vmem:[%s12660_s15 + $0x178] sm:$0xff]  }
0x2344   : > { %10363 = vmatpush3.bf16.xpose.msra.mxu0 %v8114_v46  ;;  %v9936_v46 = vld [vmem:[%s12662_s18] ss:$0 sm:$0xff]  ;;  %s967_s18 = scalar_lea.vmem %s11466_s6, %s9653_s0 }
0x2345   : > { %v7102_v26 = vsel %vm979_vm0, %v7099_v20, 0.0  ;;  %10855 = vmatprep.subr.msk.bf16.mxu0 %vm979_vm0, %v11092_v30  ;;  %v9935_v30 = vld [vmem:[%s12661_s16] ss:$0 sm:$0xff]  ;;  %s12670_s16 = sld [smem:[#allocation14_spill]] }
0x2346   : > { %7103 = vadd.xlane.f32.xlu0 %v7102_v26  ;;  %v11121_v26 = vld [vmem:[%s12660_s15 + $0x1c0] sm:$0xff]  }
0x2348   : > { %10389 = vmatpush3.bf16.xpose.msra.mxu1 %v8174_v57 }
0x2349   : > { %10867 = vmatprep.subr.msk.bf16.mxu1 %vm979_vm0, %v11109_v58 }
0x234c   : > { %10365 = vmatpush3.bf16.xpose.msra.mxu0 %v8117_v36 }
0x234d   : > { %10856 = vmatprep.subr.msk.bf16.mxu0 %vm979_vm0, %v11096_v37 }
0x2350   : > { %10391 = vmatpush3.bf16.xpose.msra.mxu1 %v8177_v8  ;;  %v11142_v8 = vld [vmem:[%s12660_s15 + $0x128] sm:$0xff]  }
0x2351   : > { %10868 = vmatprep.subr.msk.bf16.mxu1 %vm979_vm0, %v11113_v10  ;;  %v8225_v10 = vsel %vm979_vm0, %v11142_v8, 0  ;;  %v11177_v8 = vld [vmem:[%s12660_s15 + $0x2f0] sm:$0xff]  }
0x2354   : > { %10367 = vmatpush3.bf16.xpose.msra.mxu0 %v8120_v23  ;;  %v11126_v23 = vld [vmem:[%s12660_s15 + $0x108] sm:$0xff]  }
0x2355   : > { %10857 = vmatprep.subr.msk.bf16.mxu0 %vm979_vm0, %v11100_v22  ;;  %v11127_v22 = vld [vmem:[%s12660_s15 + $0x188] sm:$0xff]   ;;  %v8213_v25 = vsel %vm979_vm0, %v11126_v23, 0  ;;  %v11161_v23 = vld [vmem:[%s12660_s15 + $0x2d0] sm:$0xff]  }
0x2356   : > { %v8261_v41 = vsel %vm979_vm0, %v11127_v22, 0  ;;  %v11162_v22 = vld [vmem:[%s12660_s15 + $0x210] sm:$0xff]  }
0x2358   : > { %10393 = vmatpush3.bf16.xpose.msra.mxu1 %v8180_v13  ;;  %v11146_v13 = vld [vmem:[%s12660_s15 + $0x130] sm:$0xff]  }
0x2359   : > { %10869 = vmatprep.subr.msk.bf16.mxu1 %vm979_vm0, %v11117_v15  ;;  %v8228_v15 = vsel %vm979_vm0, %v11146_v13, 0  ;;  %v11181_v13 = vld [vmem:[%s12660_s15 + $0x2f8] sm:$0xff]  }
0x235c   : > { %10369 = vmatpush3.bf16.xpose.msra.mxu0 %v8123_v44  ;;  %v11130_v44 = vld [vmem:[%s12660_s15 + $0x110] sm:$0xff]  }
0x235d   : > { %10858 = vmatprep.subr.msk.bf16.mxu0 %vm979_vm0, %v11104_v45  ;;  %v11131_v45 = vld [vmem:[%s12660_s15 + $0x190] sm:$0xff]   ;;  %v8216_v47 = vsel %vm979_vm0, %v11130_v44, 0  ;;  %v11165_v44 = vld [vmem:[%s12660_s15 + $0x2d8] sm:$0xff]  }
0x235e   : > { %v8264_v48 = vsel %vm979_vm0, %v11131_v45, 0  ;;  %v11166_v45 = vld [vmem:[%s12660_s15 + $0x218] sm:$0xff]  }
0x2360   : > { %10395 = vmatpush3.bf16.xpose.msra.mxu1 %v8183_v19  ;;  %v11150_v19 = vld [vmem:[%s12660_s15 + $0x138] sm:$0xff]  }
0x2361   : > { %10878 = vmatprep.subr.msk.bf16.mxu1 %vm979_vm0, %v11121_v26  ;;  %v8231_v26 = vsel %vm979_vm0, %v11150_v19, 0  ;;  %v11185_v19 = vld [vmem:[%s12660_s15 + $0x3c0] sm:$0xff]  }
0x2364   : > { %10371 = vmatpush3.bf16.xpose.msra.mxu0 %v8126_v51  ;;  %v11134_v51 = vld [vmem:[%s12660_s15 + $0x118] sm:$0xff]  }
0x2365   : > { %10859 = vmatprep.subr.msk.bf16.mxu0 %vm979_vm0, %v11108_v52  ;;  %v11135_v52 = vld [vmem:[%s12660_s15 + $0x198] sm:$0xff]   ;;  %v8219_v57 = vsel %vm979_vm0, %v11134_v51, 0  ;;  %v11169_v51 = vld [vmem:[%s12660_s15 + $0x2e0] sm:$0xff]  }
0x2366   : > { %v8267_v58 = vsel %vm979_vm0, %v11135_v52, 0  ;;  %v11170_v52 = vld [vmem:[%s12660_s15 + $0x220] sm:$0xff]  }
0x236c   : > { %10373 = vmatpush3.bf16.xpose.msra.mxu0 %v8129_v3  ;;  %v11141_v3 = vld [vmem:[%s12660_s15 + $0x1e8] sm:$0xff]  }
0x236d   : > { %10860 = vmatprep.subr.msk.bf16.mxu0 %vm979_vm0, %v11112_v16  ;;  %v11143_v16 = vld [vmem:[%s12660_s15 + $0x1a8] sm:$0xff]  }
0x236e   : > { %v8273_v11 = vsel %vm979_vm0, %v11143_v16, 0  ;;  %v11178_v16 = vld [vmem:[%s12660_s15 + $0x230] sm:$0xff]  }
0x2374   : > { %10375 = vmatpush3.bf16.xpose.msra.mxu0 %v8132_v9  ;;  %v11145_v9 = vld [vmem:[%s12660_s15 + $0x1f0] sm:$0xff]  }
0x2375   : > { %10861 = vmatprep.subr.msk.bf16.mxu0 %vm979_vm0, %v11116_v14  ;;  %v11147_v14 = vld [vmem:[%s12660_s15 + $0x1b0] sm:$0xff]  }
0x2376   : > { %v8276_v17 = vsel %vm979_vm0, %v11147_v14, 0  ;;  %v11182_v14 = vld [vmem:[%s12660_s15 + $0x238] sm:$0xff]  }
0x237c   : > { %10377 = vmatpush3.bf16.xpose.msra.mxu0 %v8135_v18  ;;  %v11149_v18 = vld [vmem:[%s12660_s15 + $0x1f8] sm:$0xff]  }
0x23d3   : > { %v7104_v59 = vpop.xlane.xlu0 %7103 }
0x23d4   : > { %v7105_v60 = vmul.f32 0.03125, %v7104_v59  ;;  %v11136_v59 = vld [vmem:[%s12660_s15 + $0x160] sm:$0xff]  }
0x23d6   : > { %v7106_v61 = vsub.f32 %v7099_v20, %v7105_v60  ;;  %v11120_v20 = vld [vmem:[%s12660_s15 + $0x140] sm:$0xff]  }
0x23d7   : > { %10870 = vmatprep.subr.msk.bf16.mxu0 %vm979_vm0, %v11120_v20  ;;  %v11137_v60 = vld [vmem:[%s12660_s15 + $0x1e0] sm:$0xff]   ;;  %v11151_v20 = vld [vmem:[%s12660_s15 + $0x1b8] sm:$0xff]  }
0x23d8   : > { %v7107_v62 = vmul.f32 %v7106_v61, %v7106_v61 }
0x23da   : > { %v7108_v63 = vsel %vm979_vm0, %v7107_v62, 0.0  ;;  %v11139_v62 = vld [vmem:[%s12660_s15 + $0x1a0] sm:$0xff]  }
0x23db   : > { %7109 = vadd.xlane.f32.xlu1 %v7108_v63  ;;  %v8270_v0 = vsel %vm979_vm0, %v11139_v62, 0  ;;  %v11174_v62 = vld [vmem:[%s12660_s15 + $0x228] sm:$0xff]  }
0x2468   : > { %v7110_v5 = vpop.xlane.xlu1 %7109 }
0x2469   : > { %v7111_v27 = vmul.f32 0.03125, %v7110_v5  ;;  %v8279_v5 = vsel %vm979_vm0, %v11151_v20, 0  ;;  %v11186_v20 = vld [vmem:[%s12660_s15 + $0x300] sm:$0xff]  }
0x246b   : > { %v7112_v28 = vadd.f32 1e-05, %v7111_v27  ;;  %v11152_v27 = vld [vmem:[%s12660_s15 + $0x240] sm:$0xff]  }
0x246d   : > { %11252 = vrsqrt.f32 %v7112_v28  ;;  %v11153_v28 = vld [vmem:[%s12660_s15 + $0x2c0] sm:$0xff]  }
0x2477   : > { %v11253_v29 = vpop.eup %11252 }
0x2478   : > { %v7114_v31 = vmul.f32 %v11253_v29, %v7106_v61  ;;  %v11138_v61 = vld [vmem:[%s12660_s15 + $0x120] sm:$0xff]  }
0x2479   : > { %v8222_v63 = vsel %vm979_vm0, %v11138_v61, 0  ;;  %v11154_v29 = vld [vmem:[%s12660_s15 + $0x200] sm:$0xff]   ;;  %v11173_v61 = vld [vmem:[%s12660_s15 + $0x2e8] sm:$0xff]  }
0x247a   : > { %v7121_v32 = vmul.f32 %v9935_v30, %v7114_v31  ;;  %v11155_v30 = vld [vmem:[%s12660_s15 + $0x280] sm:$0xff]   ;;  %v8306_v31 = vsel %vm979_vm0, %v11154_v29, 0  ;;  %v11189_v29 = vld [vmem:[%s12660_s15 + $0x3c8] sm:$0xff]  }
0x247c   : > { %v12307_v36 = vadd.f32 %v9936_v46, %v7121_v32  ;;  %v8354_v46 = vsel %vm979_vm0, %v11155_v30, 0  ;;  %v11156_v32 = vld [vmem:[%s12660_s15 + $0x248] sm:$0xff]  }
0x247d   : > { %v11190_v30 = vld [vmem:[%s12660_s15 + $0x308] sm:$0xff]  }
0x247e   : > { %v12311_v37 = vpack.c.bf16 %v12307_v36, %v12307_v36 }
0x2480   : > { %10378 = vmatprep.mubr.msk.bf16.mxu0 %vm979_vm0, %v12311_v37  ;;  %10396 = vmatprep.mubr.msk.bf16.mxu1 %vm979_vm0, %v12311_v37 }
0x2481   : > { %10379 = vmatmul.mubr.msk.bf16.vlgmr.msra.gmra.mrb[76].mxu0 %vm979_vm0, %v12311_v37  ;;  %10397 = vmatmul.mubr.msk.bf16.vlgmr.msra.gmra.mrb[84].mxu1 %vm979_vm0, %v12311_v37 }
0x2482   : > { %10399 = vmatpush3.bf16.xpose.msra.mxu0 %v8210_v38  ;;  %10417 = vmatpush3.bf16.xpose.msra.mxu1 %v8258_v39  ;;  %v11159_v38 = vld [vmem:[%s12660_s15 + $0x288] sm:$0xff]   ;;  %v8309_v39 = vsel %vm979_vm0, %v11158_v35, 0  ;;  %v11193_v35 = vld [vmem:[%s12660_s15 + $0x3d0] sm:$0xff]  }
0x2483   : > { %10414 = vmatprep.mubr.msk.bf16.mxu0 %vm979_vm0, %v12311_v37  ;;  %10432 = vmatprep.mubr.msk.bf16.mxu1 %vm979_vm0, %v12311_v37 }
0x2484   : > { %10871 = vmatprep.subr.msk.bf16.mxu0 %vm979_vm0, %v11124_v40  ;;  %10879 = vmatprep.subr.msk.bf16.mxu1 %vm979_vm0, %v11125_v21  ;;  %v11160_v40 = vld [vmem:[%s12660_s15 + $0x250] sm:$0xff]   ;;  %v8357_v21 = vsel %vm979_vm0, %v11159_v38, 0 }
0x2485   : > { %v11194_v38 = vld [vmem:[%s12660_s15 + $0x310] sm:$0xff]  }
0x248a   : > { %10401 = vmatpush3.bf16.xpose.msra.mxu0 %v8213_v25  ;;  %10419 = vmatpush3.bf16.xpose.msra.mxu1 %v8261_v41  ;;  %v11163_v25 = vld [vmem:[%s12660_s15 + $0x290] sm:$0xff]   ;;  %v8312_v41 = vsel %vm979_vm0, %v11162_v22, 0  ;;  %v11197_v22 = vld [vmem:[%s12660_s15 + $0x3d8] sm:$0xff]  }
0x248b   : > { %10872 = vmatprep.subr.msk.bf16.mxu0 %vm979_vm0, %v11128_v42  ;;  %10880 = vmatprep.subr.msk.bf16.mxu1 %vm979_vm0, %v11129_v43  ;;  %v11164_v42 = vld [vmem:[%s12660_s15 + $0x258] sm:$0xff]   ;;  %v8360_v43 = vsel %vm979_vm0, %v11163_v25, 0 }
0x248c   : > { %v11198_v25 = vld [vmem:[%s12660_s15 + $0x318] sm:$0xff]  }
0x2492   : > { %10403 = vmatpush3.bf16.xpose.msra.mxu0 %v8216_v47  ;;  %10421 = vmatpush3.bf16.xpose.msra.mxu1 %v8264_v48  ;;  %v11167_v47 = vld [vmem:[%s12660_s15 + $0x298] sm:$0xff]   ;;  %v8315_v48 = vsel %vm979_vm0, %v11166_v45, 0  ;;  %v11201_v45 = vld [vmem:[%s12660_s15 + $0x3e0] sm:$0xff]  }
0x2493   : > { %10873 = vmatprep.subr.msk.bf16.mxu0 %vm979_vm0, %v11132_v49  ;;  %10881 = vmatprep.subr.msk.bf16.mxu1 %vm979_vm0, %v11133_v50  ;;  %v11168_v49 = vld [vmem:[%s12660_s15 + $0x260] sm:$0xff]   ;;  %v8363_v50 = vsel %vm979_vm0, %v11167_v47, 0 }
0x2494   : > { %v11202_v47 = vld [vmem:[%s12660_s15 + $0x320] sm:$0xff]  }
0x249a   : > { %10405 = vmatpush3.bf16.xpose.msra.mxu0 %v8219_v57  ;;  %10423 = vmatpush3.bf16.xpose.msra.mxu1 %v8267_v58  ;;  %v11171_v57 = vld [vmem:[%s12660_s15 + $0x2a0] sm:$0xff]   ;;  %v8318_v58 = vsel %vm979_vm0, %v11170_v52, 0  ;;  %v11205_v52 = vld [vmem:[%s12660_s15 + $0x3e8] sm:$0xff]  }
0x249b   : > { %10874 = vmatprep.subr.msk.bf16.mxu0 %vm979_vm0, %v11136_v59  ;;  %10882 = vmatprep.subr.msk.bf16.mxu1 %vm979_vm0, %v11137_v60  ;;  %v11172_v59 = vld [vmem:[%s12660_s15 + $0x268] sm:$0xff]   ;;  %v8366_v60 = vsel %vm979_vm0, %v11171_v57, 0 }
0x249c   : > { %v11206_v57 = vld [vmem:[%s12660_s15 + $0x328] sm:$0xff]  }
0x24a2   : > { %10407 = vmatpush3.bf16.xpose.msra.mxu0 %v8222_v63  ;;  %10425 = vmatpush3.bf16.xpose.msra.mxu1 %v8270_v0  ;;  %v11175_v63 = vld [vmem:[%s12660_s15 + $0x2a8] sm:$0xff]   ;;  %v8321_v0 = vsel %vm979_vm0, %v11174_v62, 0  ;;  %v11209_v62 = vld [vmem:[%s12660_s15 + $0x3f0] sm:$0xff]  }
0x24a3   : > { %10875 = vmatprep.subr.msk.bf16.mxu0 %vm979_vm0, %v11140_v1  ;;  %10883 = vmatprep.subr.msk.bf16.mxu1 %vm979_vm0, %v11141_v3  ;;  %v11176_v1 = vld [vmem:[%s12660_s15 + $0x270] sm:$0xff]   ;;  %v8369_v3 = vsel %vm979_vm0, %v11175_v63, 0 }
0x24a4   : > { %v11210_v63 = vld [vmem:[%s12660_s15 + $0x330] sm:$0xff]  }
0x24aa   : > { %10409 = vmatpush3.bf16.xpose.msra.mxu0 %v8225_v10  ;;  %10427 = vmatpush3.bf16.xpose.msra.mxu1 %v8273_v11  ;;  %v11179_v10 = vld [vmem:[%s12660_s15 + $0x2b0] sm:$0xff]   ;;  %v8324_v11 = vsel %vm979_vm0, %v11178_v16, 0  ;;  %v11213_v16 = vld [vmem:[%s12660_s15 + $0x3f8] sm:$0xff]  }
0x24ab   : > { %10876 = vmatprep.subr.msk.bf16.mxu0 %vm979_vm0, %v11144_v12  ;;  %10884 = vmatprep.subr.msk.bf16.mxu1 %vm979_vm0, %v11145_v9  ;;  %v11180_v12 = vld [vmem:[%s12660_s15 + $0x278] sm:$0xff]   ;;  %v8372_v9 = vsel %vm979_vm0, %v11179_v10, 0 }
0x24ac   : > { %v11214_v10 = vld [vmem:[%s12660_s15 + $0x338] sm:$0xff]  }
0x24b2   : > { %10411 = vmatpush3.bf16.xpose.msra.mxu0 %v8228_v15  ;;  %10429 = vmatpush3.bf16.xpose.msra.mxu1 %v8276_v17  ;;  %v11183_v15 = vld [vmem:[%s12660_s15 + $0x2b8] sm:$0xff]   ;;  %v8327_v17 = vsel %vm979_vm0, %v11182_v14, 0  ;;  %v8850_v14 = vld [vmem:[%s12663_s26 + $0x48] sm:$0xff] }
0x24b3   : > { %10877 = vmatprep.subr.msk.bf16.mxu0 %vm979_vm0, %v11148_v4  ;;  %10885 = vmatprep.subr.msk.bf16.mxu1 %vm979_vm0, %v11149_v18  ;;  %v11184_v4 = vld [vmem:[%s12660_s15 + $0x340] sm:$0xff]   ;;  %v8375_v18 = vsel %vm979_vm0, %v11183_v15, 0  ;;  %v8423_v15 = vsel %vm979_vm0, %v11214_v10, 0 }
0x24ba   : > { %10413 = vmatpush3.bf16.xpose.msra.mxu0 %v8231_v26  ;;  %10431 = vmatpush3.bf16.xpose.msra.mxu1 %v8279_v5  ;;  %v11187_v26 = vld [vmem:[%s12660_s15 + $0x380] sm:$0xff]   ;;  %v8402_v5 = vsel %vm979_vm0, %v11186_v20, 0 }
0x24bb   : > { %10886 = vmatprep.subr.msk.bf16.mxu0 %vm979_vm0, %v11152_v27  ;;  %10894 = vmatprep.subr.msk.bf16.mxu1 %vm979_vm0, %v11153_v28  ;;  %v8450_v27 = vsel %vm979_vm0, %v11187_v26, 0  ;;  %v11188_v28 = vld [vmem:[%s12660_s15 + $0x348] sm:$0xff]   ;;  %v8865_v20 = vld [vmem:[%s12663_s26 + $0xc0] sm:$0xff] }
0x24bc   : > { %v8858_v26 = vld [vmem:[%s12663_s26 + $0x88] sm:$0xff] }
0x24c1   : > { %10415 = vmatmul.mubr.msk.bf16.vlgmr.msra.gmra.mrb[80].mxu0 %vm979_vm0, %v12311_v37  ;;  %10433 = vmatmul.mubr.msk.bf16.vlgmr.msra.gmra.mrb[88].mxu1 %vm979_vm0, %v12311_v37 }
0x24c2   : > { %10435 = vmatpush3.bf16.xpose.msra.mxu0 %v8306_v31  ;;  %10450 = vmatprep.mubr.msk.bf16.mxu0 %vm979_vm0, %v12311_v37  ;;  %v11191_v31 = vld [vmem:[%s12660_s15 + $0x388] sm:$0xff]  }
0x24c3   : > { %10453 = vmatpush3.bf16.xpose.msra.mxu1 %v8354_v46  ;;  %10468 = vmatprep.mubr.msk.bf16.mxu1 %vm979_vm0, %v12311_v37  ;;  %v8405_v46 = vsel %vm979_vm0, %v11190_v30, 0 }
0x24c4   : > { %10887 = vmatprep.subr.msk.bf16.mxu0 %vm979_vm0, %v11156_v32  ;;  %10895 = vmatprep.subr.msk.bf16.mxu1 %vm979_vm0, %v11157_v33  ;;  %v11192_v32 = vld [vmem:[%s12660_s15 + $0x350] sm:$0xff]   ;;  %v8453_v33 = vsel %vm979_vm0, %v11191_v31, 0 }
0x24c5   : > { %v8843_v31 = vld [vmem:[%s12663_s26 + $0x10] sm:$0xff] }
0x24ca   : > { %10437 = vmatpush3.bf16.xpose.msra.mxu0 %v8309_v39  ;;  %v11195_v39 = vld [vmem:[%s12660_s15 + $0x390] sm:$0xff]  }
0x24cb   : > { %10455 = vmatpush3.bf16.xpose.msra.mxu1 %v8357_v21  ;;  %10888 = vmatprep.subr.msk.bf16.mxu0 %vm979_vm0, %v11160_v40  ;;  %v8408_v40 = vsel %vm979_vm0, %v11194_v38, 0  ;;  %v11196_v21 = vld [vmem:[%s12660_s15 + $0x358] sm:$0xff]  }
0x24cc   : > { %10896 = vmatprep.subr.msk.bf16.mxu1 %vm979_vm0, %v11161_v23  ;;  %v8456_v23 = vsel %vm979_vm0, %v11195_v39, 0 }
0x24d2   : > { %10439 = vmatpush3.bf16.xpose.msra.mxu0 %v8312_v41  ;;  %v11199_v41 = vld [vmem:[%s12660_s15 + $0x398] sm:$0xff]  }
0x24d3   : > { %10457 = vmatpush3.bf16.xpose.msra.mxu1 %v8360_v43  ;;  %10889 = vmatprep.subr.msk.bf16.mxu0 %vm979_vm0, %v11164_v42  ;;  %v8411_v42 = vsel %vm979_vm0, %v11198_v25, 0  ;;  %v11200_v43 = vld [vmem:[%s12660_s15 + $0x360] sm:$0xff]  }
0x24d4   : > { %10897 = vmatprep.subr.msk.bf16.mxu1 %vm979_vm0, %v11165_v44  ;;  %v8459_v44 = vsel %vm979_vm0, %v11199_v41, 0 }
0x24da   : > { %10441 = vmatpush3.bf16.xpose.msra.mxu0 %v8315_v48  ;;  %v11203_v48 = vld [vmem:[%s12660_s15 + $0x3a0] sm:$0xff]  }
0x24db   : > { %10459 = vmatpush3.bf16.xpose.msra.mxu1 %v8363_v50  ;;  %10890 = vmatprep.subr.msk.bf16.mxu0 %vm979_vm0, %v11168_v49  ;;  %v8414_v49 = vsel %vm979_vm0, %v11202_v47, 0  ;;  %v11204_v50 = vld [vmem:[%s12660_s15 + $0x368] sm:$0xff]  }
0x24dc   : > { %10898 = vmatprep.subr.msk.bf16.mxu1 %vm979_vm0, %v11169_v51  ;;  %v8462_v51 = vsel %vm979_vm0, %v11203_v48, 0 }
0x24e2   : > { %10443 = vmatpush3.bf16.xpose.msra.mxu0 %v8318_v58  ;;  %v11207_v58 = vld [vmem:[%s12660_s15 + $0x3a8] sm:$0xff]  }
0x24e3   : > { %10461 = vmatpush3.bf16.xpose.msra.mxu1 %v8366_v60  ;;  %10891 = vmatprep.subr.msk.bf16.mxu0 %vm979_vm0, %v11172_v59  ;;  %v8417_v59 = vsel %vm979_vm0, %v11206_v57, 0  ;;  %v11208_v60 = vld [vmem:[%s12660_s15 + $0x370] sm:$0xff]  }
0x24e4   : > { %10899 = vmatprep.subr.msk.bf16.mxu1 %vm979_vm0, %v11173_v61  ;;  %v8465_v61 = vsel %vm979_vm0, %v11207_v58, 0 }
0x24ea   : > { %10445 = vmatpush3.bf16.xpose.msra.mxu0 %v8321_v0  ;;  %v11211_v0 = vld [vmem:[%s12660_s15 + $0x3b0] sm:$0xff]  }
0x24eb   : > { %10463 = vmatpush3.bf16.xpose.msra.mxu1 %v8369_v3  ;;  %10892 = vmatprep.subr.msk.bf16.mxu0 %vm979_vm0, %v11176_v1  ;;  %v8420_v1 = vsel %vm979_vm0, %v11210_v63, 0  ;;  %v11212_v3 = vld [vmem:[%s12660_s15 + $0x378] sm:$0xff]   ;;  %v8867_v63 = vld [vmem:[%s12663_s26 + $0xd0] sm:$0xff] }
0x24ec   : > { %10900 = vmatprep.subr.msk.bf16.mxu1 %vm979_vm0, %v11177_v8  ;;  %v8468_v8 = vsel %vm979_vm0, %v11211_v0, 0  ;;  %v8860_v0 = vld [vmem:[%s12663_s26 + $0x98] sm:$0xff] }
0x24f2   : > { %10447 = vmatpush3.bf16.xpose.msra.mxu0 %v8324_v11  ;;  %v11215_v11 = vld [vmem:[%s12660_s15 + $0x3b8] sm:$0xff]  }
0x24f3   : > { %10465 = vmatpush3.bf16.xpose.msra.mxu1 %v8372_v9  ;;  %10893 = vmatprep.subr.msk.bf16.mxu0 %vm979_vm0, %v11180_v12  ;;  %v8841_v12 = vld [vmem:[%s12663_s26] sm:$0xff] }
0x24f4   : > { %10901 = vmatprep.subr.msk.bf16.mxu1 %vm979_vm0, %v11181_v13  ;;  %v8849_v9 = vld [vmem:[%s12663_s26 + $0x40] sm:$0xff]  ;;  %v8842_v13 = vld [vmem:[%s12663_s26 + $0x8] sm:$0xff] }
0x24fa   : > { %10449 = vmatpush3.bf16.xpose.msra.mxu0 %v8327_v17  ;;  %v10075_v17 = vcombine.high %v8841_v12, %v8849_v9 }
0x24fb   : > { %10467 = vmatpush3.bf16.xpose.msra.mxu1 %v8375_v18  ;;  %10902 = vmatprep.subr.msk.bf16.mxu0 %vm979_vm0, %v11184_v4  ;;  %v8471_v4 = vsel %vm979_vm0, %v11215_v11, 0  ;;  %v10077_v18 = vcombine.high %v8842_v13, %v8850_v14 }
0x24fc   : > { %10910 = vmatprep.subr.msk.bf16.mxu1 %vm979_vm0, %v11185_v19  ;;  %v8857_v19 = vld [vmem:[%s12663_s26 + $0x80] sm:$0xff] }
0x2501   : > { %10451 = vmatmul.mubr.msk.bf16.vlgmr.msra.gmra.mrb[84].mxu0 %vm979_vm0, %v12311_v37 }
0x2502   : > { %10469 = vmatmul.mubr.msk.bf16.vlgmr.msra.gmra.mrb[92].mxu1 %vm979_vm0, %v12311_v37  ;;  %10471 = vmatpush3.bf16.xpose.msra.mxu0 %v8402_v5  ;;  %v8866_v5 = vld [vmem:[%s12663_s26 + $0xc8] sm:$0xff] }
0x2503   : > { %10486 = vmatprep.mubr.msk.bf16.mxu0 %vm979_vm0, %v12311_v37  ;;  %10489 = vmatpush3.bf16.xpose.msra.mxu1 %v8450_v27  ;;  %v10074_v27 = vcombine.low %v8841_v12, %v8849_v9  ;;  %v10093_v30 = vcombine.high %v8858_v26, %v8866_v5  ;;  %v10092_v38 = vcombine.low %v8858_v26, %v8866_v5 }
0x2504   : > { %10504 = vmatprep.mubr.msk.bf16.mxu1 %vm979_vm0, %v12311_v37  ;;  %10903 = vmatprep.subr.msk.bf16.mxu0 %vm979_vm0, %v11188_v28  ;;  %v10076_v28 = vcombine.low %v8842_v13, %v8850_v14  ;;  %v8845_v14 = vld [vmem:[%s12663_s26 + $0x20] sm:$0xff] }
0x2505   : > { %10911 = vmatprep.subr.msk.bf16.mxu1 %vm979_vm0, %v11189_v29  ;;  %v10091_v29 = vcombine.high %v8857_v19, %v8865_v20 }
0x250a   : > { %10473 = vmatpush3.bf16.xpose.msra.mxu0 %v8405_v46  ;;  %v8851_v46 = vld [vmem:[%s12663_s26 + $0x50] sm:$0xff] }
0x250b   : > { %10491 = vmatpush3.bf16.xpose.msra.mxu1 %v8453_v33  ;;  %10904 = vmatprep.subr.msk.bf16.mxu0 %vm979_vm0, %v11192_v32  ;;  %v8844_v32 = vld [vmem:[%s12663_s26 + $0x18] sm:$0xff]  ;;  %v10079_v39 = vcombine.high %v8843_v31, %v8851_v46 }
0x250c   : > { %10912 = vmatprep.subr.msk.bf16.mxu1 %vm979_vm0, %v11193_v35  ;;  %v8852_v33 = vld [vmem:[%s12663_s26 + $0x58] sm:$0xff]  ;;  %v10090_v35 = vcombine.low %v8857_v19, %v8865_v20 }
0x250d   : > { %v10080_v10 = vcombine.low %v8844_v32, %v8852_v33 }
0x2512   : > { %10475 = vmatpush3.bf16.xpose.msra.mxu0 %v8408_v40  ;;  %v10081_v40 = vcombine.high %v8844_v32, %v8852_v33 }
0x2513   : > { %10493 = vmatpush3.bf16.xpose.msra.mxu1 %v8456_v23  ;;  %10905 = vmatprep.subr.msk.bf16.mxu0 %vm979_vm0, %v11196_v21  ;;  %v12544_v21 = vld [vmem:[%s12664_s28] sm:$0xff] }
0x2514   : > { %10913 = vmatprep.subr.msk.bf16.mxu1 %vm979_vm0, %v11197_v22  ;;  %v7401_v23 = vrot.slane %v12544_v21, %v11999_v34  ;;  %v7397_v22 = vrot.slane %v12544_v21, %v11985_v6  ;;  %v7405_v25 = vrot.slane %v12544_v21, %v11988_v7  ;;  %v7409_v5 = vrot.slane %v12544_v21, %v12010_v53 }
0x251a   : > { %10477 = vmatpush3.bf16.xpose.msra.mxu0 %v8411_v42 }
0x251b   : > { %10495 = vmatpush3.bf16.xpose.msra.mxu1 %v8459_v44  ;;  %10906 = vmatprep.subr.msk.bf16.mxu0 %vm979_vm0, %v11200_v43 }
0x251c   : > { %10914 = vmatprep.subr.msk.bf16.mxu1 %vm979_vm0, %v11201_v45 }
0x2522   : > { %10479 = vmatpush3.bf16.xpose.msra.mxu0 %v8414_v49 }
0x2523   : > { %10497 = vmatpush3.bf16.xpose.msra.mxu1 %v8462_v51  ;;  %10907 = vmatprep.subr.msk.bf16.mxu0 %vm979_vm0, %v11204_v50 }
0x2524   : > { %10915 = vmatprep.subr.msk.bf16.mxu1 %vm979_vm0, %v11205_v52 }
0x252a   : > { %10481 = vmatpush3.bf16.xpose.msra.mxu0 %v8417_v59 }
0x252b   : > { %10499 = vmatpush3.bf16.xpose.msra.mxu1 %v8465_v61  ;;  %10908 = vmatprep.subr.msk.bf16.mxu0 %vm979_vm0, %v11208_v60  ;;  %v8859_v60 = vld [vmem:[%s12663_s26 + $0x90] sm:$0xff] }
0x252c   : > { %10916 = vmatprep.subr.msk.bf16.mxu1 %vm979_vm0, %v11209_v62  ;;  %v10095_v9 = vcombine.high %v8859_v60, %v8867_v63 }
0x2532   : > { %10483 = vmatpush3.bf16.xpose.msra.mxu0 %v8420_v1  ;;  %v8868_v1 = vld [vmem:[%s12663_s26 + $0xd8] sm:$0xff] }
0x2533   : > { %10501 = vmatpush3.bf16.xpose.msra.mxu1 %v8468_v8  ;;  %10909 = vmatprep.subr.msk.bf16.mxu0 %vm979_vm0, %v11212_v3  ;;  %v10097_v13 = vcombine.high %v8860_v0, %v8868_v1  ;;  %v10096_v19 = vcombine.low %v8860_v0, %v8868_v1 }
0x2534   : > { %10917 = vmatprep.subr.msk.bf16.mxu1 %vm979_vm0, %v11213_v16  ;;  %v10078_v16 = vcombine.low %v8843_v31, %v8851_v46 }
0x253a   : > { %10485 = vmatpush3.bf16.xpose.msra.mxu0 %v8423_v15  ;;  %v8853_v15 = vld [vmem:[%s12663_s26 + $0x60] sm:$0xff] }
0x253b   : > { %10503 = vmatpush3.bf16.xpose.msra.mxu1 %v8471_v4  ;;  %9056 = vmatprep.subr.bf16.mxu0 %v10075_v17  ;;  %v8846_v17 = vld [vmem:[%s12663_s26 + $0x28] sm:$0xff]  ;;  %v10083_v20 = vcombine.high %v8845_v14, %v8853_v15 }
0x253c   : > { %9096 = vmatprep.subr.bf16.mxu1 %v10077_v18  ;;  %v8854_v4 = vld [vmem:[%s12663_s26 + $0x68] sm:$0xff]  ;;  %v10094_v18 = vcombine.low %v8859_v60, %v8867_v63  ;;  %v8847_v60 = vld [vmem:[%s12663_s26 + $0x30] sm:$0xff]  ;;  %v8856_v63 = vld [vmem:[%s12663_s26 + $0x78] sm:$0xff] }
0x253d   : > { %v10085_v26 = vcombine.high %v8846_v17, %v8854_v4 }
0x2541   : > { %10487 = vmatmul.mubr.msk.bf16.vlgmr.msra.gmra.mrb[88].mxu0 %vm979_vm0, %v12311_v37 }
0x2542   : > { %10505 = vmatmul.mubr.msk.bf16.vlgmr.msra.gmra.mrb[96].mxu1 %vm979_vm0, %v12311_v37  ;;  %9057 = vmatpush1.bf16.xpose.msra.mxu0 %v10074_v27  ;;  %v7393_v37 = vrot.slane %v12544_v21, %v11979_v24  ;;  %v7417_v27 = vrot.slane %v12544_v21, %v12013_v54 }
0x2543   : > { %9097 = vmatpush1.bf16.xpose.msra.mxu1 %v10076_v28  ;;  %9058 = vmatprep.subr.bf16.mxu0 %v10091_v29  ;;  %v7413_v28 = vrot.slane %v12544_v21, %v12016_v55  ;;  %v7421_v29 = vrot.slane %v12544_v21, %v12019_v56 }
0x2544   : > { %9098 = vmatprep.subr.bf16.mxu1 %v10093_v30 }
0x254a   : > { %9059 = vmatpush1.bf16.xpose.msra.mxu0 %v10090_v35 }
0x254b   : > { %9099 = vmatpush1.bf16.xpose.msra.mxu1 %v10092_v38  ;;  %9136 = vmatprep.subr.bf16.mxu0 %v10079_v39 }
0x254c   : > { %9176 = vmatprep.subr.bf16.mxu1 %v10081_v40 }
0x2554   : > { %v8531_v41 = vpop.f32.mrb[76].mxu0  ;;  %v8572_v42 = vpop.f32.mrb[84].mxu1 }
0x2555   : > { %v8532_v43 = vadd.f32 %v8531_v41, %v7393_v37  ;;  %v8573_v44 = vadd.f32 %v8572_v42, %v7401_v23  ;;  %v8533_v45 = vpop.f32.mrb[77].mxu0  ;;  %v8574_v47 = vpop.f32.mrb[85].mxu1  ;;  %v8861_v42 = vld [vmem:[%s12663_s26 + $0xa0] sm:$0xff] }
0x2556   : > { %v8534_v48 = vadd.f32 %v8533_v45, %v7397_v22  ;;  %v8575_v49 = vadd.f32 %v8574_v47, %v7405_v25  ;;  %v8535_v50 = vpop.f32.mrb[78].mxu0  ;;  %v8576_v51 = vpop.f32.mrb[86].mxu1  ;;  %v8862_v45 = vld [vmem:[%s12663_s26 + $0xa8] sm:$0xff] }
0x2557   : > { %v8825_v52 = vmax.f32 %v8532_v43, 0.0  ;;  %v8827_v57 = vmax.f32 %v8573_v44, 0.0  ;;  %v8536_v58 = vpop.f32.mrb[79].mxu0  ;;  %v8577_v59 = vpop.f32.mrb[87].mxu1  ;;  %v8869_v44 = vld [vmem:[%s12663_s26 + $0xe0] sm:$0xff]  ;;  %v8870_v47 = vld [vmem:[%s12663_s26 + $0xe8] sm:$0xff]  ;;  %v10082_v50 = vcombine.low %v8845_v14, %v8853_v15  ;;  %v10084_v51 = vcombine.low %v8846_v17, %v8854_v4 }
0x2558   : > { %v8826_v61 = vmax.f32 %v8534_v48, 0.0  ;;  %v8828_v62 = vmax.f32 %v8575_v49, 0.0  ;;  %v10099_v58 = vcombine.high %v8861_v42, %v8869_v44  ;;  %v10101_v59 = vcombine.high %v8862_v45, %v8870_v47 }
0x2559   : > { %v8873_v11 = vpack.c.bf16 %v8825_v52, %v8825_v52  ;;  %v8875_v12 = vpack.c.bf16 %v8827_v57, %v8827_v57  ;;  %v10098_v0 = vcombine.low %v8861_v42, %v8869_v44  ;;  %v10100_v1 = vcombine.low %v8862_v45, %v8870_v47 }
0x255a   : > { %v8874_v3 = vpack.c.bf16 %v8826_v61, %v8826_v61  ;;  %v8876_v8 = vpack.c.bf16 %v8828_v62, %v8828_v62  ;;  %v8855_v61 = vld [vmem:[%s12663_s26 + $0x70] sm:$0xff]  ;;  %v8848_v62 = vld [vmem:[%s12663_s26 + $0x38] sm:$0xff] }
0x255c   : > { %9088 = vmatprep.mubr.bf16.mxu0 %v8874_v3  ;;  %9128 = vmatprep.mubr.bf16.mxu1 %v8876_v8  ;;  %v10087_v3 = vcombine.high %v8847_v60, %v8855_v61  ;;  %v10089_v8 = vcombine.high %v8848_v62, %v8856_v63 }
0x255d   : > { %9089 = vmatmul.mubr.bf16.vlgmr.msra.gmra.mrb[92].mxu0 %v8873_v11  ;;  %9129 = vmatmul.mubr.bf16.vlgmr.msra.gmra.mrb[100].mxu1 %v8875_v12 }
0x255e   : > { %9137 = vmatpush1.bf16.xpose.msra.mxu0 %v10078_v16  ;;  %9177 = vmatpush1.bf16.xpose.msra.mxu1 %v10080_v10  ;;  %v7387_v16 = vld [vmem:[%s12664_s28 + $0x8] sm:$0xff] }
0x255f   : > { %9138 = vmatprep.subr.bf16.mxu0 %v10095_v9  ;;  %9178 = vmatprep.subr.bf16.mxu1 %v10097_v13  ;;  %v7425_v10 = vrot.slane %v7387_v16, %v11979_v24  ;;  %v7433_v11 = vrot.slane %v7387_v16, %v11999_v34  ;;  %v7429_v12 = vrot.slane %v7387_v16, %v11985_v6 }
0x2560   : > { %v7437_v9 = vrot.slane %v7387_v16, %v11988_v7  ;;  %v8863_v7 = vld [vmem:[%s12663_s26 + $0xb0] sm:$0xff]  ;;  %v7449_v42 = vrot.slane %v7387_v16, %v12013_v54 }
0x2566   : > { %9139 = vmatpush1.bf16.xpose.msra.mxu0 %v10094_v18  ;;  %9179 = vmatpush1.bf16.xpose.msra.mxu1 %v10096_v19 }
0x2567   : > { %9216 = vmatprep.subr.bf16.mxu0 %v10083_v20  ;;  %9256 = vmatprep.subr.bf16.mxu1 %v10085_v26 }
0x2594   : > { %v8613_v30 = vpop.f32.mrb[80].mxu0  ;;  %v8654_v31 = vpop.f32.mrb[88].mxu1 }
0x2595   : > { %v8614_v46 = vadd.f32 %v8613_v30, %v7409_v5  ;;  %v8655_v32 = vadd.f32 %v8654_v31, %v7417_v27  ;;  %v8615_v33 = vpop.f32.mrb[81].mxu0  ;;  %v8656_v35 = vpop.f32.mrb[89].mxu1  ;;  %v8864_v31 = vld [vmem:[%s12663_s26 + $0xb8] sm:$0xff] }
0x2596   : > { %v8616_v38 = vadd.f32 %v8615_v33, %v7413_v28  ;;  %v8657_v39 = vadd.f32 %v8656_v35, %v7421_v29  ;;  %v8617_v40 = vpop.f32.mrb[82].mxu0  ;;  %v8658_v37 = vpop.f32.mrb[90].mxu1  ;;  %v8871_v29 = vld [vmem:[%s12663_s26 + $0xf0] sm:$0xff]  ;;  %v10086_v33 = vcombine.low %v8847_v60, %v8855_v61 }
0x2597   : > { %v8829_v23 = vmax.f32 %v8614_v46, 0.0  ;;  %v8831_v22 = vmax.f32 %v8655_v32, 0.0  ;;  %v8618_v25 = vpop.f32.mrb[83].mxu0  ;;  %v8659_v41 = vpop.f32.mrb[91].mxu1  ;;  %v8872_v46 = vld [vmem:[%s12663_s26 + $0xf8] sm:$0xff]  ;;  %v10103_v40 = vcombine.high %v8863_v7, %v8871_v29 }
0x2598   : > { %v8830_v43 = vmax.f32 %v8616_v38, 0.0  ;;  %v8832_v21 = vmax.f32 %v8657_v39, 0.0  ;;  %v10088_v39 = vcombine.low %v8848_v62, %v8856_v63  ;;  %v10104_v25 = vcombine.low %v8864_v31, %v8872_v46 }
0x2599   : > { %v8877_v52 = vpack.c.bf16 %v8829_v23, %v8829_v23  ;;  %v8879_v57 = vpack.c.bf16 %v8831_v22, %v8831_v22  ;;  %v10105_v23 = vcombine.high %v8864_v31, %v8872_v46  ;;  %v10102_v22 = vcombine.low %v8863_v7, %v8871_v29 }
0x259a   : > { %v8878_v48 = vpack.c.bf16 %v8830_v43, %v8830_v43  ;;  %v8880_v49 = vpack.c.bf16 %v8832_v21, %v8832_v21  ;;  %v7441_v41 = vrot.slane %v7387_v16, %v12010_v53  ;;  %v7445_v43 = vrot.slane %v7387_v16, %v12016_v55 }
0x259b   : > { %v7453_v21 = vrot.slane %v7387_v16, %v12019_v56 }
0x259c   : > { %9168 = vmatprep.mubr.bf16.mxu0 %v8878_v48  ;;  %9208 = vmatprep.mubr.bf16.mxu1 %v8880_v49 }
0x259d   : > { %9169 = vmatmul.mubr.bf16.vlgmr.msra.gmra.mrb[96].mxu0 %v8877_v52  ;;  %9209 = vmatmul.mubr.bf16.vlgmr.msra.gmra.mrb[104].mxu1 %v8879_v57 }
0x259e   : > { %9217 = vmatpush1.bf16.xpose.msra.mxu0 %v10082_v50  ;;  %9257 = vmatpush1.bf16.xpose.msra.mxu1 %v10084_v51 }
0x259f   : > { %9218 = vmatprep.subr.bf16.mxu0 %v10099_v58  ;;  %9258 = vmatprep.subr.bf16.mxu1 %v10101_v59 }
0x25a6   : > { %9219 = vmatpush1.bf16.xpose.msra.mxu0 %v10098_v0  ;;  %9259 = vmatpush1.bf16.xpose.msra.mxu1 %v10100_v1  ;;  %v10073_v1 = vld [vmem:[%s12665_s1] ss:$0 sm:$0xff] }
0x25a7   : > { %9296 = vmatprep.subr.bf16.mxu0 %v10087_v3  ;;  %9336 = vmatprep.subr.bf16.mxu1 %v10089_v8 }
0x25d4   : > { %v8695_v13 = vpop.f32.mrb[84].mxu0 }
0x25d5   : > { %v8696_v14 = vadd.f32 %v8695_v13, %v7425_v10  ;;  %v8736_v15 = vpop.f32.mrb[92].mxu1  ;;  %v8697_v17 = vpop.f32.mrb[85].mxu0 }
0x25d6   : > { %v8737_v4 = vadd.f32 %v8736_v15, %v7433_v11  ;;  %v8698_v18 = vadd.f32 %v8697_v17, %v7429_v12  ;;  %v8738_v19 = vpop.f32.mrb[93].mxu1  ;;  %v8699_v20 = vpop.f32.mrb[86].mxu0 }
0x25d7   : > { %v8833_v26 = vmax.f32 %v8696_v14, 0.0  ;;  %v8739_v24 = vadd.f32 %v8738_v19, %v7437_v9  ;;  %v8740_v5 = vpop.f32.mrb[94].mxu1  ;;  %v8700_v34 = vpop.f32.mrb[87].mxu0 }
0x25d8   : > { %v8835_v27 = vmax.f32 %v8737_v4, 0.0  ;;  %v8834_v6 = vmax.f32 %v8698_v18, 0.0  ;;  %v8741_v28 = vpop.f32.mrb[95].mxu1 }
0x25d9   : > { %v8836_v30 = vmax.f32 %v8739_v24, 0.0  ;;  %v8881_v35 = vpack.c.bf16 %v8833_v26, %v8833_v26 }
0x25da   : > { %v8882_v32 = vpack.c.bf16 %v8834_v6, %v8834_v6  ;;  %v8883_v37 = vpack.c.bf16 %v8835_v27, %v8835_v27 }
0x25db   : > { %v8884_v38 = vpack.c.bf16 %v8836_v30, %v8836_v30 }
0x25dc   : > { %9248 = vmatprep.mubr.bf16.mxu0 %v8882_v32 }
0x25dd   : > { %9288 = vmatprep.mubr.bf16.mxu1 %v8884_v38  ;;  %9249 = vmatmul.mubr.bf16.vlgmr.msra.gmra.mrb[100].mxu0 %v8881_v35 }
0x25de   : > { %9289 = vmatmul.mubr.bf16.vlgmr.msra.gmra.mrb[108].mxu1 %v8883_v37  ;;  %9297 = vmatpush1.bf16.xpose.msra.mxu0 %v10086_v33 }
0x25df   : > { %9337 = vmatpush1.bf16.xpose.msra.mxu1 %v10088_v39  ;;  %9298 = vmatprep.subr.bf16.mxu0 %v10103_v40 }
0x25e0   : > { %9338 = vmatprep.subr.bf16.mxu1 %v10105_v23 }
0x25e6   : > { %9299 = vmatpush1.bf16.xpose.msra.mxu0 %v10102_v22 }
0x25e7   : > { %9339 = vmatpush1.bf16.xpose.msra.mxu1 %v10104_v25 }
0x2614   : > { %v8777_v44 = vpop.f32.mrb[88].mxu0 }
0x2615   : > { %v8778_v45 = vadd.f32 %v8777_v44, %v7441_v41  ;;  %v8818_v47 = vpop.f32.mrb[96].mxu1  ;;  %v8779_v48 = vpop.f32.mrb[89].mxu0  ;;  %v9406_v44 = vld [vmem:[%s12666_s2] sm:$0xff] }
0x2616   : > { %v8819_v49 = vadd.f32 %v8818_v47, %v7449_v42  ;;  %v8780_v50 = vadd.f32 %v8779_v48, %v7445_v43  ;;  %v8820_v51 = vpop.f32.mrb[97].mxu1  ;;  %v8781_v52 = vpop.f32.mrb[90].mxu0  ;;  %v11302_v48 = vmov 0.0|0.0  }
0x2617   : > { %v8837_v57 = vmax.f32 %v8778_v45, 0.0  ;;  %v8821_v58 = vadd.f32 %v8820_v51, %v7453_v21  ;;  %v8822_v59 = vpop.f32.mrb[98].mxu1  ;;  %v8782_v60 = vpop.f32.mrb[91].mxu0  ;;  %v9407_v45 = vld [vmem:[%s12666_s2 + $0x8] sm:$0xff]  ;;  %10774 = vmatprep.subr.bf16.mxu0 %v11302_v48 }
0x2618   : > { %v8839_v53 = vmax.f32 %v8819_v49, 0.0  ;;  %v8838_v61 = vmax.f32 %v8780_v50, 0.0  ;;  %v8823_v54 = vpop.f32.mrb[99].mxu1  ;;  %v10775_v49 = vpack.c.bf16 %v9407_v45, %v9406_v44  ;;  %v9409_v50 = vld [vmem:[%s12666_s2 + $0x18] sm:$0xff] }
0x2619   : > { %v8840_v62 = vmax.f32 %v8821_v58, 0.0  ;;  %v8885_v63 = vpack.c.bf16 %v8837_v57, %v8837_v57 }
0x261a   : > { %v8886_v55 = vpack.c.bf16 %v8838_v61, %v8838_v61  ;;  %v8887_v0 = vpack.c.bf16 %v8839_v53, %v8839_v53  ;;  %v9410_v53 = vld [vmem:[%s12666_s2 + $0x20] sm:$0xff]  ;;  %v9411_v61 = vld [vmem:[%s12666_s2 + $0x28] sm:$0xff] }
0x261b   : > { %v8888_v56 = vpack.c.bf16 %v8840_v62, %v8840_v62  ;;  %v10783_v54 = vpack.c.bf16 %v9411_v61, %v9410_v53  ;;  %v9412_v62 = vld [vmem:[%s12666_s2 + $0x30] sm:$0xff] }
0x261c   : > { %9328 = vmatprep.mubr.bf16.mxu0 %v8886_v55  ;;  %v9413_v55 = vld [vmem:[%s12666_s2 + $0x38] sm:$0xff] }
0x261d   : > { %9368 = vmatprep.mubr.bf16.mxu1 %v8888_v56  ;;  %9329 = vmatmul.mubr.bf16.vlgmr.msra.gmra.mrb[104].mxu0 %v8885_v63  ;;  %v10787_v63 = vpack.c.bf16 %v9413_v55, %v9412_v62 }
0x261e   : > { %9369 = vmatmul.mubr.bf16.vlgmr.msra.gmra.mrb[112].mxu1 %v8887_v0  ;;  %10771 = vmatprep.mubr.msk.f32.mxu0 %vm11301_vm1, %v11300_v2 }
0x261f   : > { %10777 = vmatpush3.bf16.xpose.msk.msra.mxu0 %vm12600_vm3, %v10775_v49 }
0x2620   : > { %10778 = vmatprep.subr.bf16.mxu0 %v11302_v48 }
0x2630   : > { %v9090_v3 = vpop.f32.mrb[92].mxu0  ;;  %v9130_v8 = vpop.f32.mrb[100].mxu1 }
0x2631   : > { %v9091_v16 = vadd.f32 %v10073_v1, %v9090_v3  ;;  %v9092_v10 = vpop.f32.mrb[93].mxu0  ;;  %v9132_v11 = vpop.f32.mrb[101].mxu1 }
0x2632   : > { %v9093_v12 = vpop.f32.mrb[94].mxu0  ;;  %v9133_v9 = vpop.f32.mrb[102].mxu1  ;;  %v10107_v10 = vld [vmem:[%s12670_s16] ss:$0 sm:$0xff] }
0x2633   : > { %v9131_v13 = vadd.f32 %v9130_v8, %v9091_v16  ;;  %v9094_v14 = vpop.f32.mrb[95].mxu0  ;;  %v9134_v15 = vpop.f32.mrb[103].mxu1  ;;  %v10106_v8 = vld [vmem:[%s12669_s11] ss:$0 sm:$0xff] }
0x2634   : > { %v10108_v9 = vld [vmem:[%s11451_s27] ss:$0 sm:$0xff] }
0x2670   : > { %v9170_v17 = vpop.f32.mrb[96].mxu0  ;;  %v9210_v4 = vpop.f32.mrb[104].mxu1 }
0x2671   : > { %v9171_v18 = vadd.f32 %v9170_v17, %v9131_v13  ;;  %v9172_v19 = vpop.f32.mrb[97].mxu0  ;;  %v9212_v20 = vpop.f32.mrb[105].mxu1 }
0x2672   : > { %v9173_v26 = vpop.f32.mrb[98].mxu0  ;;  %v9213_v24 = vpop.f32.mrb[106].mxu1 }
0x2673   : > { %v9211_v5 = vadd.f32 %v9210_v4, %v9171_v18  ;;  %v9174_v2 = vpop.f32.mrb[99].mxu0  ;;  %v9214_v34 = vpop.f32.mrb[107].mxu1 }
0x26b0   : > { %v9250_v27 = vpop.f32.mrb[100].mxu0 }
0x26b1   : > { %v9251_v6 = vadd.f32 %v9250_v27, %v9211_v5  ;;  %v9290_v28 = vpop.f32.mrb[108].mxu1  ;;  %v9252_v7 = vpop.f32.mrb[101].mxu0 }
0x26b2   : > { %v9292_v29 = vpop.f32.mrb[109].mxu1  ;;  %v9253_v30 = vpop.f32.mrb[102].mxu0 }
0x26b3   : > { %v9291_v31 = vadd.f32 %v9290_v28, %v9251_v6  ;;  %v9293_v46 = vpop.f32.mrb[110].mxu1  ;;  %v9254_v32 = vpop.f32.mrb[103].mxu0  ;;  %v10118_v30 = vld [vmem:[%s11456_s4] ss:$0 sm:$0xff] }
0x26b4   : > { %v9294_v33 = vpop.f32.mrb[111].mxu1  ;;  %v10119_v46 = vld [vmem:[%s11461_s12] ss:$0 sm:$0xff] }
0x26f0   : > { %v9330_v35 = vpop.f32.mrb[104].mxu0 }
0x26f1   : > { %v9331_v38 = vadd.f32 %v9330_v35, %v9291_v31  ;;  %v9370_v39 = vpop.f32.mrb[112].mxu1  ;;  %v9332_v40 = vpop.f32.mrb[105].mxu0 }
0x26f2   : > { %v9372_v37 = vpop.f32.mrb[113].mxu1  ;;  %v9333_v23 = vpop.f32.mrb[106].mxu0 }
0x26f3   : > { %v9371_v22 = vadd.f32 %v9370_v39, %v9331_v38  ;;  %v9373_v25 = vpop.f32.mrb[114].mxu1  ;;  %v9334_v41 = vpop.f32.mrb[107].mxu0 }
0x26f4   : > { %v9374_v42 = vpop.f32.mrb[115].mxu1 }
0x26f5   : > { %v9376_v43 = vadd.f32 %v9371_v22, %v12307_v36  ;;  %v9408_v36 = vld [vmem:[%s12666_s2 + $0x10] sm:$0xff] }
0x26f6   : > { %v10779_v51 = vpack.c.bf16 %v9409_v50, %v9408_v36 }
0x26f7   : > { %v9379_v21 = vsel %vm979_vm0, %v9376_v43, 0.0 }
0x26f8   : > { %9380 = vadd.xlane.f32.xlu0 %v9379_v21  ;;  %10781 = vmatpush3.bf16.xpose.msk.msra.mxu0 %vm12600_vm3, %v10779_v51 }
0x26f9   : > { %10782 = vmatprep.subr.bf16.mxu0 %v11302_v48 }
0x2700   : > { %10785 = vmatpush3.bf16.xpose.msk.msra.mxu0 %vm12600_vm3, %v10783_v54 }
0x2701   : > { %10786 = vmatprep.subr.bf16.mxu0 %v11302_v48 }
0x2708   : > { %10789 = vmatpush3.bf16.xpose.msk.msra.mxu0 %vm12600_vm3, %v10787_v63 }
0x2785   : > { %v9381_v52 = vpop.xlane.xlu0 %9380 }
0x2786   : > { %v9382_v57 = vmul.f32 0.03125, %v9381_v52 }
0x2788   : > { %v9383_v58 = vsub.f32 %v9376_v43, %v9382_v57 }
0x278a   : > { %v9384_v59 = vmul.f32 %v9383_v58, %v9383_v58 }
0x278c   : > { %v9385_v60 = vsel %vm979_vm0, %v9384_v59, 0.0 }
0x278d   : > { %9386 = vadd.xlane.f32.xlu1 %v9385_v60 }
0x281a   : > { %v9387_v56 = vpop.xlane.xlu1 %9386 }
0x281b   : > { %v9388_v0 = vmul.f32 0.03125, %v9387_v56 }
0x281d   : > { %v9389_v1 = vadd.f32 1e-05, %v9388_v0 }
0x281f   : > { %11254 = vrsqrt.f32 %v9389_v1 }
0x2829   : > { %v11255_v3 = vpop.eup %11254 }
0x282a   : > { %v9391_v16 = vmul.f32 %v11255_v3, %v9383_v58 }
0x282c   : > { %v9398_v11 = vmul.f32 %v10106_v8, %v9391_v16 }
0x282e   : > { %v9405_v12 = vadd.f32 %v10107_v10, %v9398_v11 }
0x2830   : > { %10772 = vmatmul.mubr.msk.f32.vlgmr.msra.gmra.mrb[108].mxu0 %vm979_vm0, %v9405_v12 }
0x2903   : > { %v9514_v13 = vpop.f32.mrb[108].mxu0 }
0x2904   : > { %v9515_v14 = vadd.f32 %v10108_v9, %v9514_v13  ;;  %v10773_v15 = vpop.f32.mrb[109].mxu0 }
0x2906   : > { %v9519_v17 = vmul.f32 0.70710677, %v9515_v14  ;;  %v9518_v18 = vmul.f32 0.5, %v9515_v14 }
0x2908   : > { %11256 = verf.f32 %v9519_v17 }
0x2912   : > { %v11257_v4 = vpop.eup %11256 }
0x2913   : > { %v9521_v19 = vadd.f32 1.0, %v11257_v4 }
0x2915   : > { %v9522_v20 = vmul.f32 %v9521_v19, %v9518_v18 }
0x2917   : > { %v9526_v26 = vsel %vm9525_vm4, %v9522_v20, 0.0 }
0x2918   : > { %9527 = vadd.xlane.f32.xlu0 %v9526_v26 }
0x29a5   : > { %v9528_v24 = vpop.xlane.xlu0 %9527 }
0x29a6   : > { %v9530_v5 = vmul.f32 0.015625, %v9528_v24 }
0x29a8   : > { %v9531_v2 = vsub.f32 %v9522_v20, %v9530_v5 }
0x29aa   : > { %v9532_v34 = vmul.f32 %v9531_v2, %v9531_v2 }
0x29ac   : > { %v9533_v27 = vsel %vm9525_vm4, %v9532_v34, 0.0 }
0x29ad   : > { %9534 = vadd.xlane.f32.xlu1 %v9533_v27 }
0x2a3a   : > { %v9535_v6 = vpop.xlane.xlu1 %9534 }
0x2a3b   : > { %v9536_v28 = vmul.f32 0.015625, %v9535_v6 }
0x2a3d   : > { %v9537_v7 = vadd.f32 1e-05, %v9536_v28 }
0x2a3f   : > { %11258 = vrsqrt.f32 %v9537_v7 }
0x2a49   : > { %v11259_v29 = vpop.eup %11258 }
0x2a4a   : > { %v9539_v31 = vmul.f32 %v11259_v29, %v9531_v2 }
0x2a4c   : > { %v9546_v32 = vmul.f32 %v10118_v30, %v9539_v31 }
0x2a4e   : > { %v9553_v33 = vadd.f32 %v10119_v46, %v9546_v32 }
0x2a50   : > { %9554 = vst.msk [vmem:[%s967_s18] sm:$0xff] %vm9525_vm4, %v9553_v33 }
0x2a51 PF: > { %s73_s22 = sadd.s32 1, %s11267_s22  }
0x2a52   : > { %p70_p4 = scmp.ge.s32.totalorder %s73_s22, 4  }
0x2a54   :  { %72 = sbr.rel (!%p70_p4) target bundleno = 50 (0x32), region = 208 }

</bundles_post_ra>
